<compile_context>
chip_gen: v5e
topology: v5e:2x2
jax: 0.10.0
libtpu: 0.0.40
codegen_flags: <defaults>
</compile_context>

<pallas_src>
import functools
import math

import jax
import jax.numpy as jnp
from jax.experimental import pallas as pl
from jax.experimental.pallas import tpu as pltpu


_COMPILER_PARAMS = pltpu.CompilerParams(
    dimension_semantics=("parallel", "arbitrary"),
    vmem_limit_bytes=32 * 1024 * 1024,
)


# -----------------------------------------------------------------------------
# Pallas kernels
# -----------------------------------------------------------------------------
def _stem_branch_kernel(x_ref, w1_ref, b1_ref, wbr_ref, bbr_ref,
                        red_ref, suma_ref, *, ca):
    """Fused: stem 3x3x3 conv (im2col matmul) + ReLU
              -> both inception 1x1x1 branches (b1a || b1b_reduce) in ONE matmul
              -> write only the b1b_reduce activation to HBM
              -> accumulate branch-a's per-batch global-pool column sums.

    Grid = (batch, row-tiles-within-batch). K fits one tile, so there is no
    K-reduction loop and no accumulator scratch.
    """
    j = pl.program_id(1)

    # Stem conv: (tm, 27*Cin) bf16 @ (27*Cin, 8) bf16 -> f32 on the MXU.
    s = jnp.dot(x_ref[...], w1_ref[...], preferred_element_type=jnp.float32)
    s = jnp.maximum(s + b1_ref[...], 0.0)

    # Fused inception 1x1x1 branches: one (8 -> 12) matmul.
    r = jnp.dot(s.astype(jnp.bfloat16), wbr_ref[...],
                preferred_element_type=jnp.float32)
    r = jnp.maximum(r + bbr_ref[...], 0.0)

    branch_a = r[:, :ca]     # b1a output: only its global pool is ever needed.
    reduce_b = r[:, ca:]     # b1b_reduce output: feeds the 3x3x3 branch conv.

    red_ref[...] = reduce_b.astype(red_ref.dtype)

    @pl.when(j == 0)
    def _():
        suma_ref[...] = jnp.zeros_like(suma_ref)

    suma_ref[...] += jnp.sum(branch_a, axis=0).reshape(suma_ref.shape)


def _conv3_pool_kernel(x_ref, w_ref, b_ref, sumb_ref):
    """b1b 3x3x3 conv (im2col matmul) + ReLU, emitting ONLY the per-batch
    global-pool column sums (the full activation never touches HBM)."""
    j = pl.program_id(1)

    r = jnp.dot(x_ref[...], w_ref[...], preferred_element_type=jnp.float32)
    r = jnp.maximum(r + b_ref[...], 0.0)

    @pl.when(j == 0)
    def _():
        sumb_ref[...] = jnp.zeros_like(sumb_ref)

    sumb_ref[...] += jnp.sum(r, axis=0).reshape(sumb_ref.shape)


# -----------------------------------------------------------------------------
# Pallas wrappers
# -----------------------------------------------------------------------------
def _pick_row_tile(rows_per_batch):
    """Largest tile (<=1024, multiple of 8) that divides T*H*W -> no M padding."""
    for t in (1024, 512, 256, 128, 64, 32, 16, 8):
        if rows_per_batch % t == 0:
            return t
    raise ValueError(f"rows_per_batch={rows_per_batch} must be a multiple of 8")


def stem_branch_fused(patches, w1, b1, wbr, bbr, *, nb, rows_per_batch, ca, cr):
    """patches: [N*T*H*W, 27*Cin] bf16 -> (b1b_reduce [M, cr] bf16,
                                            branch-a pooled sums [N, ca] f32)."""
    M, K = patches.shape
    c1 = w1.shape[1]
    cbr = wbr.shape[1]
    tm = _pick_row_tile(rows_per_batch)
    tpb = rows_per_batch // tm

    red, sums = pl.pallas_call(
        functools.partial(_stem_branch_kernel, ca=ca),
        out_shape=(
            jax.ShapeDtypeStruct((M, cr), jnp.bfloat16),
            jax.ShapeDtypeStruct((nb, 1, ca), jnp.float32),
        ),
        grid_spec=pltpu.PrefetchScalarGridSpec(
            num_scalar_prefetch=0,
            grid=(nb, tpb),
            in_specs=[
                pl.BlockSpec((tm, K), lambda n, j: (n * tpb + j, 0)),
                pl.BlockSpec((K, c1), lambda n, j: (0, 0)),
                pl.BlockSpec((1, c1), lambda n, j: (0, 0)),
                pl.BlockSpec((c1, cbr), lambda n, j: (0, 0)),
                pl.BlockSpec((1, cbr), lambda n, j: (0, 0)),
            ],
            out_specs=[
                pl.BlockSpec((tm, cr), lambda n, j: (n * tpb + j, 0)),
                pl.BlockSpec((1, 1, ca), lambda n, j: (n, 0, 0)),
            ],
        ),
        compiler_params=_COMPILER_PARAMS,
    )(patches, w1, b1, wbr, bbr)
    return red, sums[:, 0, :]


def conv3x3_pool(patches, w, b, *, nb, rows_per_batch):
    """patches: [N*T*H*W, 27*Cin] bf16 -> per-batch pooled column sums [N, Cout]."""
    M, K = patches.shape
    cout = w.shape[1]
    tm = _pick_row_tile(rows_per_batch)
    tpb = rows_per_batch // tm

    sums = pl.pallas_call(
        _conv3_pool_kernel,
        out_shape=jax.ShapeDtypeStruct((nb, 1, cout), jnp.float32),
        grid_spec=pltpu.PrefetchScalarGridSpec(
            num_scalar_prefetch=0,
            grid=(nb, tpb),
            in_specs=[
                pl.BlockSpec((tm, K), lambda n, j: (n * tpb + j, 0)),
                pl.BlockSpec((K, cout), lambda n, j: (0, 0)),
                pl.BlockSpec((1, cout), lambda n, j: (0, 0)),
            ],
            out_specs=pl.BlockSpec((1, 1, cout), lambda n, j: (n, 0, 0)),
        ),
        compiler_params=_COMPILER_PARAMS,
    )(patches, w, b)
    return sums[:, 0, :]


# -----------------------------------------------------------------------------
# im2col (XLA glue, bf16) for 3x3x3 'same' convolution
# -----------------------------------------------------------------------------
def _im2col_3x3x3(x):
    """x: [N, T, H, W, C] -> [N*T*H*W, 27*C], tap order (dt, dh, dw, c) to match
    the row-major w.reshape(-1, Cout) ordering of (k,k,k,Cin,Cout) weights."""
    nb, t, h, w, c = x.shape
    xp = jnp.pad(x, ((0, 0), (1, 1), (1, 1), (1, 1), (0, 0)))
    slices = [xp[:, dt:dt + t, dh:dh + h, dw:dw + w, :]
              for dt in range(3) for dh in range(3) for dw in range(3)]
    return jnp.concatenate(slices, axis=-1).reshape(nb * t * h * w, 27 * c)


# -----------------------------------------------------------------------------
# Mini Inception3D RGB stream (deterministic synthetic parameters)
# -----------------------------------------------------------------------------
def init_conv(key, k, cin, cout):
    kw, kb = jax.random.split(key)
    scale = 1.0 / math.sqrt(k * k * k * cin)
    w = jax.random.normal(kw, (k, k, k, cin, cout), jnp.float32) * scale
    b = jax.random.normal(kb, (cout,), jnp.float32) * 0.01
    return w, b


def init_params(key, cin=3, num_classes=10):
    ks = jax.random.split(key, 5)
    params = {
        "conv1": init_conv(ks[0], 3, cin, 8),       # stem: 3x3x3 conv
        "b1a": init_conv(ks[1], 1, 8, 8),           # inception branch a: 1x1x1
        "b1b_reduce": init_conv(ks[2], 1, 8, 4),    # inception branch b: 1x1x1 reduce
        "b1b": init_conv(ks[3], 3, 4, 8),           # inception branch b: 3x3x3
    }
    kw, kb = jax.random.split(ks[4])
    fc_w = jax.random.normal(kw, (16, num_classes), jnp.float32) / math.sqrt(16.0)
    fc_b = jax.random.normal(kb, (num_classes,), jnp.float32) * 0.01
    params["fc"] = (fc_w, fc_b)
    return params


def prep_params(params):
    """One-time weight prep: reshape to matmul form, fuse the two 1x1 branches
    along Cout, cast MXU operands to bf16.  Done once, not per forward call."""
    w1, b1 = params["conv1"]
    wa, ba = params["b1a"]
    wr, br = params["b1b_reduce"]
    w3, b3 = params["b1b"]
    return {
        "w1": w1.reshape(-1, w1.shape[-1]).astype(jnp.bfloat16),      # (27*Cin, 8)
        "b1": b1.reshape(1, -1),                                      # (1, 8) f32
        "wbr": jnp.concatenate(
            [wa.reshape(-1, wa.shape[-1]), wr.reshape(-1, wr.shape[-1])],
            axis=1).astype(jnp.bfloat16),                             # (8, 12)
        "bbr": jnp.concatenate([ba, br]).reshape(1, -1),              # (1, 12) f32
        "w3": w3.reshape(-1, w3.shape[-1]).astype(jnp.bfloat16),      # (108, 8)
        "b3": b3.reshape(1, -1),                                      # (1, 8) f32
        "fc_w": params["fc"][0],
        "fc_b": params["fc"][1],
    }


def inception_rgb_forward(p, rgb, flow=None, attn=None):
    """Mirrors InceptionRGB.forward: out = RGBStream(rgb, attn); out.squeeze()."""
    del flow                   # USE_FLOW = False; dropout unused in forward().
    # TODO(synk): attention-augmented path (attn is not None -> out[-1]) not
    # implemented; the synthetic stream only supports attn=None.
    assert attn is None

    ca = p["wbr"].shape[1] - p["w3"].shape[0] // 27   # b1a channels (8)
    cr = p["w3"].shape[0] // 27                       # b1b_reduce channels (4)

    # NCDHW (PyTorch) -> NDHWC (TPU lane-friendly), bf16 for the MXU path.
    x = jnp.transpose(rgb, (0, 2, 3, 4, 1)).astype(jnp.bfloat16)
    nb, t, h, w, _ = x.shape
    s_spatial = t * h * w

    # Stem conv + ReLU + fused 1x1 inception branches + branch-a global pool,
    # all in one Pallas kernel.
    patches1 = _im2col_3x3x3(x)                                   # [M, 27*Cin]
    red, sum_a = stem_branch_fused(
        patches1, p["w1"], p["b1"], p["wbr"], p["bbr"],
        nb=nb, rows_per_batch=s_spatial, ca=ca, cr=cr)

    # Branch-b 3x3x3 conv + ReLU; only its pooled sums are ever materialized.
    patches2 = _im2col_3x3x3(red.reshape(nb, t, h, w, cr))        # [M, 27*cr]
    sum_b = conv3x3_pool(patches2, p["w3"], p["b3"],
                         nb=nb, rows_per_batch=s_spatial)

    # Global spatio-temporal average pool of concat([ba, bb]) == concat of the
    # per-branch sums, scaled by 1/(T*H*W).
    pooled = jnp.concatenate([sum_a, sum_b], axis=-1) * (1.0 / s_spatial)

    # Logits head: (2,16)@(16,10) ~ 320 FLOPs -> plain XLA (a Pallas launch
    # plus lane padding would cost more than the useful work).
    logits = pooled @ p["fc_w"] + p["fc_b"]

    # .squeeze() as in the PyTorch forward
    return jnp.squeeze(logits)


# -----------------------------------------------------------------------------
# Main
# -----------------------------------------------------------------------------
if __name__ == "__main__":
    key = jax.random.PRNGKey(0)
    k_param, k_rgb, k_flow = jax.random.split(key, 3)

    params = init_params(k_param, cin=3, num_classes=10)
    prepped = prep_params(params)

    # Small I3D-style input: N=2, C=3 (RGB), T=8, H=W=16  (PyTorch NCDHW layout)
    rgb = jax.random.normal(k_rgb, (2, 3, 8, 16, 16), jnp.float32)
    flow = jax.random.normal(k_flow, (2, 2, 8, 16, 16), jnp.float32)  # unused

    fwd = jax.jit(inception_rgb_forward)
    out = fwd(prepped, rgb, flow, attn=None)
    out = jax.block_until_ready(out)

    assert out.shape == (2, 10), out.shape
    assert jnp.all(jnp.isfinite(out))
    print("KERNEL_OK")
</pallas_src>

<mosaic_0001>
module attributes {stable_mosaic.version = 11 : i64} {
  func.func @_stem_branch_kernel(%arg0: i32, %arg1: i32, %arg2: memref<1024x81xbf16, #tpu.memory_space<vmem>>, %arg3: memref<81x8xbf16, #tpu.memory_space<vmem>>, %arg4: memref<1x8xf32, #tpu.memory_space<vmem>>, %arg5: memref<8x12xbf16, #tpu.memory_space<vmem>>, %arg6: memref<1x12xf32, #tpu.memory_space<vmem>>, %arg7: memref<1024x4xbf16, #tpu.memory_space<vmem>>, %arg8: memref<1x1x8xf32, #tpu.memory_space<vmem>>) attributes {dimension_semantics = [#tpu.dimension_semantics<parallel>, #tpu.dimension_semantics<arbitrary>], iteration_bounds = array<i64: 2, 2>, scalar_prefetch = 0 : i64, scratch_operands = 0 : i64, tpu.core_type = #tpu.core_type<tc>, window_params = [{transform_indices = @transform_0, window_bounds = array<i64: 1024, 81>}, {pipeline_mode = #tpu.pipeline_mode<synchronous>, transform_indices = @transform_1, window_bounds = array<i64: 81, 8>}, {pipeline_mode = #tpu.pipeline_mode<synchronous>, transform_indices = @transform_2, window_bounds = array<i64: 1, 8>}, {pipeline_mode = #tpu.pipeline_mode<synchronous>, transform_indices = @transform_3, window_bounds = array<i64: 8, 12>}, {pipeline_mode = #tpu.pipeline_mode<synchronous>, transform_indices = @transform_4, window_bounds = array<i64: 1, 12>}, {transform_indices = @transform_5, window_bounds = array<i64: 1024, 4>}, {transform_indices = @transform_6, window_bounds = array<i64: 1, 1, 8>}]} {
    %c0 = arith.constant 0 : index
    %c0_0 = arith.constant 0 : index
    %0 = vector.load %arg2[%c0, %c0_0] : memref<1024x81xbf16, #tpu.memory_space<vmem>>, vector<1024x81xbf16>
    %c0_1 = arith.constant 0 : index
    %c0_2 = arith.constant 0 : index
    %1 = vector.load %arg3[%c0_1, %c0_2] : memref<81x8xbf16, #tpu.memory_space<vmem>>, vector<81x8xbf16>
    %cst = arith.constant dense<0.000000e+00> : vector<1024x8xf32>
    %2 = tpu.matmul %0, %1, %cst {dimension_numbers = #tpu.dot_dimension_numbers<[1], [0], [0], [1], [0, 0, 1, 1], [], []>} : vector<1024x81xbf16>, vector<81x8xbf16>, vector<1024x8xf32> -> vector<1024x8xf32>
    %c0_3 = arith.constant 0 : index
    %c0_4 = arith.constant 0 : index
    %3 = vector.load %arg4[%c0_3, %c0_4] : memref<1x8xf32, #tpu.memory_space<vmem>>, vector<1x8xf32>
    %4 = vector.broadcast %3 : vector<1x8xf32> to vector<1024x8xf32>
    %5 = arith.addf %2, %4 : vector<1024x8xf32>
    %cst_5 = arith.constant 0.000000e+00 : f32
    %6 = vector.broadcast %cst_5 : f32 to vector<1024x8xf32>
    %7 = arith.maximumf %5, %6 : vector<1024x8xf32>
    %8 = arith.truncf %7 : vector<1024x8xf32> to vector<1024x8xbf16>
    %c0_6 = arith.constant 0 : index
    %c0_7 = arith.constant 0 : index
    %9 = vector.load %arg5[%c0_6, %c0_7] : memref<8x12xbf16, #tpu.memory_space<vmem>>, vector<8x12xbf16>
    %cst_8 = arith.constant dense<0.000000e+00> : vector<1024x12xf32>
    %10 = tpu.matmul %8, %9, %cst_8 {dimension_numbers = #tpu.dot_dimension_numbers<[1], [0], [0], [1], [0, 0, 1, 1], [], []>} : vector<1024x8xbf16>, vector<8x12xbf16>, vector<1024x12xf32> -> vector<1024x12xf32>
    %c0_9 = arith.constant 0 : index
    %c0_10 = arith.constant 0 : index
    %11 = vector.load %arg6[%c0_9, %c0_10] : memref<1x12xf32, #tpu.memory_space<vmem>>, vector<1x12xf32>
    %12 = vector.broadcast %11 : vector<1x12xf32> to vector<1024x12xf32>
    %13 = arith.addf %10, %12 : vector<1024x12xf32>
    %cst_11 = arith.constant 0.000000e+00 : f32
    %14 = vector.broadcast %cst_11 : f32 to vector<1024x12xf32>
    %15 = arith.maximumf %13, %14 : vector<1024x12xf32>
    %16 = vector.extract_strided_slice %15 {offsets = [0, 0], sizes = [1024, 8], strides = [1, 1]} : vector<1024x12xf32> to vector<1024x8xf32>
    %17 = vector.extract_strided_slice %15 {offsets = [0, 8], sizes = [1024, 4], strides = [1, 1]} : vector<1024x12xf32> to vector<1024x4xf32>
    %18 = arith.truncf %17 : vector<1024x4xf32> to vector<1024x4xbf16>
    %c0_12 = arith.constant 0 : index
    %c0_13 = arith.constant 0 : index
    %19 = vector.load %arg7[%c0_12, %c0_13] : memref<1024x4xbf16, #tpu.memory_space<vmem>>, vector<1024x4xbf16>
    tpu.vector_store %arg7[%c0_12, %c0_13], %18 {strides = array<i32>} : memref<1024x4xbf16, #tpu.memory_space<vmem>>, vector<1024x4xbf16>,
    %c0_i32 = arith.constant 0 : i32
    %20 = arith.cmpi eq, %arg1, %c0_i32 : i32
    %21 = arith.extui %20 : i1 to i32
    %c0_i32_14 = arith.constant 0 : i32
    %22 = arith.cmpi ne, %21, %c0_i32_14 : i32
    scf.if %22 {
      %cst_22 = arith.constant 0.000000e+00 : f32
      %28 = vector.broadcast %cst_22 : f32 to vector<1x1x8xf32>
      %c0_23 = arith.constant 0 : index
      %c0_24 = arith.constant 0 : index
      %c0_25 = arith.constant 0 : index
      %29 = vector.load %arg8[%c0_23, %c0_24, %c0_25] : memref<1x1x8xf32, #tpu.memory_space<vmem>>, vector<1x1x8xf32>
      tpu.vector_store %arg8[%c0_23, %c0_24, %c0_25], %28 {strides = array<i32>} : memref<1x1x8xf32, #tpu.memory_space<vmem>>, vector<1x1x8xf32>,
    } else {
    }
    %c0_15 = arith.constant 0 : index
    %c0_16 = arith.constant 0 : index
    %c0_17 = arith.constant 0 : index
    %23 = vector.load %arg8[%c0_15, %c0_16, %c0_17] : memref<1x1x8xf32, #tpu.memory_space<vmem>>, vector<1x1x8xf32>
    %cst_18 = arith.constant dense<0.000000e+00> : vector<8xf32>
    %24 = vector.multi_reduction <add>, %16, %cst_18 [0] : vector<1024x8xf32> to vector<8xf32>
    %25 = vector.shape_cast %24 : vector<8xf32> to vector<1x1x8xf32>
    %26 = arith.addf %23, %25 : vector<1x1x8xf32>
    %c0_19 = arith.constant 0 : index
    %c0_20 = arith.constant 0 : index
    %c0_21 = arith.constant 0 : index
    %27 = vector.load %arg8[%c0_19, %c0_20, %c0_21] : memref<1x1x8xf32, #tpu.memory_space<vmem>>, vector<1x1x8xf32>
    tpu.vector_store %arg8[%c0_19, %c0_20, %c0_21], %26 {strides = array<i32>} : memref<1x1x8xf32, #tpu.memory_space<vmem>>, vector<1x1x8xf32>,
    return
  }
  func.func @transform_0(%arg0: i32, %arg1: i32) -> (i32, i32) {
    %c2_i32 = arith.constant 2 : i32
    %0 = arith.muli %arg0, %c2_i32 : i32
    %1 = arith.addi %0, %arg1 : i32
    %c0_i32 = arith.constant 0 : i32
    %c0_i32_0 = arith.constant 0 : i32
    return %1, %c0_i32 : i32, i32
  }
  func.func @transform_1(%arg0: i32, %arg1: i32) -> (i32, i32) {
    %c0_i32 = arith.constant 0 : i32
    %c0_i32_0 = arith.constant 0 : i32
    %c0_i32_1 = arith.constant 0 : i32
    return %c0_i32, %c0_i32_0 : i32, i32
  }
  func.func @transform_2(%arg0: i32, %arg1: i32) -> (i32, i32) {
    %c0_i32 = arith.constant 0 : i32
    %c0_i32_0 = arith.constant 0 : i32
    %c0_i32_1 = arith.constant 0 : i32
    return %c0_i32, %c0_i32_0 : i32, i32
  }
  func.func @transform_3(%arg0: i32, %arg1: i32) -> (i32, i32) {
    %c0_i32 = arith.constant 0 : i32
    %c0_i32_0 = arith.constant 0 : i32
    %c0_i32_1 = arith.constant 0 : i32
    return %c0_i32, %c0_i32_0 : i32, i32
  }
  func.func @transform_4(%arg0: i32, %arg1: i32) -> (i32, i32) {
    %c0_i32 = arith.constant 0 : i32
    %c0_i32_0 = arith.constant 0 : i32
    %c0_i32_1 = arith.constant 0 : i32
    return %c0_i32, %c0_i32_0 : i32, i32
  }
  func.func @transform_5(%arg0: i32, %arg1: i32) -> (i32, i32) {
    %c2_i32 = arith.constant 2 : i32
    %0 = arith.muli %arg0, %c2_i32 : i32
    %1 = arith.addi %0, %arg1 : i32
    %c0_i32 = arith.constant 0 : i32
    %c0_i32_0 = arith.constant 0 : i32
    return %1, %c0_i32 : i32, i32
  }
  func.func @transform_6(%arg0: i32, %arg1: i32) -> (i32, i32, i32) {
    %c0_i32 = arith.constant 0 : i32
    %c0_i32_0 = arith.constant 0 : i32
    %c0_i32_1 = arith.constant 0 : i32
    return %arg0, %c0_i32, %c0_i32_0 : i32, i32, i32
  }
}

module attributes {stable_mosaic.version = 11 : i64} {
  func.func @_conv3_pool_kernel(%arg0: i32, %arg1: i32, %arg2: memref<1024x108xbf16, #tpu.memory_space<vmem>>, %arg3: memref<108x8xbf16, #tpu.memory_space<vmem>>, %arg4: memref<1x8xf32, #tpu.memory_space<vmem>>, %arg5: memref<1x1x8xf32, #tpu.memory_space<vmem>>) attributes {dimension_semantics = [#tpu.dimension_semantics<parallel>, #tpu.dimension_semantics<arbitrary>], iteration_bounds = array<i64: 2, 2>, scalar_prefetch = 0 : i64, scratch_operands = 0 : i64, tpu.core_type = #tpu.core_type<tc>, window_params = [{transform_indices = @transform_0, window_bounds = array<i64: 1024, 108>}, {pipeline_mode = #tpu.pipeline_mode<synchronous>, transform_indices = @transform_1, window_bounds = array<i64: 108, 8>}, {pipeline_mode = #tpu.pipeline_mode<synchronous>, transform_indices = @transform_2, window_bounds = array<i64: 1, 8>}, {transform_indices = @transform_3, window_bounds = array<i64: 1, 1, 8>}]} {
    %c0 = arith.constant 0 : index
    %c0_0 = arith.constant 0 : index
    %0 = vector.load %arg2[%c0, %c0_0] : memref<1024x108xbf16, #tpu.memory_space<vmem>>, vector<1024x108xbf16>
    %c0_1 = arith.constant 0 : index
    %c0_2 = arith.constant 0 : index
    %1 = vector.load %arg3[%c0_1, %c0_2] : memref<108x8xbf16, #tpu.memory_space<vmem>>, vector<108x8xbf16>
    %cst = arith.constant dense<0.000000e+00> : vector<1024x8xf32>
    %2 = tpu.matmul %0, %1, %cst {dimension_numbers = #tpu.dot_dimension_numbers<[1], [0], [0], [1], [0, 0, 1, 1], [], []>} : vector<1024x108xbf16>, vector<108x8xbf16>, vector<1024x8xf32> -> vector<1024x8xf32>
    %c0_3 = arith.constant 0 : index
    %c0_4 = arith.constant 0 : index
    %3 = vector.load %arg4[%c0_3, %c0_4] : memref<1x8xf32, #tpu.memory_space<vmem>>, vector<1x8xf32>
    %4 = vector.broadcast %3 : vector<1x8xf32> to vector<1024x8xf32>
    %5 = arith.addf %2, %4 : vector<1024x8xf32>
    %cst_5 = arith.constant 0.000000e+00 : f32
    %6 = vector.broadcast %cst_5 : f32 to vector<1024x8xf32>
    %7 = arith.maximumf %5, %6 : vector<1024x8xf32>
    %c0_i32 = arith.constant 0 : i32
    %8 = arith.cmpi eq, %arg1, %c0_i32 : i32
    %9 = arith.extui %8 : i1 to i32
    %c0_i32_6 = arith.constant 0 : i32
    %10 = arith.cmpi ne, %9, %c0_i32_6 : i32
    scf.if %10 {
      %cst_14 = arith.constant 0.000000e+00 : f32
      %16 = vector.broadcast %cst_14 : f32 to vector<1x1x8xf32>
      %c0_15 = arith.constant 0 : index
      %c0_16 = arith.constant 0 : index
      %c0_17 = arith.constant 0 : index
      %17 = vector.load %arg5[%c0_15, %c0_16, %c0_17] : memref<1x1x8xf32, #tpu.memory_space<vmem>>, vector<1x1x8xf32>
      tpu.vector_store %arg5[%c0_15, %c0_16, %c0_17], %16 {strides = array<i32>} : memref<1x1x8xf32, #tpu.memory_space<vmem>>, vector<1x1x8xf32>,
    } else {
    }
    %c0_7 = arith.constant 0 : index
    %c0_8 = arith.constant 0 : index
    %c0_9 = arith.constant 0 : index
    %11 = vector.load %arg5[%c0_7, %c0_8, %c0_9] : memref<1x1x8xf32, #tpu.memory_space<vmem>>, vector<1x1x8xf32>
    %cst_10 = arith.constant dense<0.000000e+00> : vector<8xf32>
    %12 = vector.multi_reduction <add>, %7, %cst_10 [0] : vector<1024x8xf32> to vector<8xf32>
    %13 = vector.shape_cast %12 : vector<8xf32> to vector<1x1x8xf32>
    %14 = arith.addf %11, %13 : vector<1x1x8xf32>
    %c0_11 = arith.constant 0 : index
    %c0_12 = arith.constant 0 : index
    %c0_13 = arith.constant 0 : index
    %15 = vector.load %arg5[%c0_11, %c0_12, %c0_13] : memref<1x1x8xf32, #tpu.memory_space<vmem>>, vector<1x1x8xf32>
    tpu.vector_store %arg5[%c0_11, %c0_12, %c0_13], %14 {strides = array<i32>} : memref<1x1x8xf32, #tpu.memory_space<vmem>>, vector<1x1x8xf32>,
    return
  }
  func.func @transform_0(%arg0: i32, %arg1: i32) -> (i32, i32) {
    %c2_i32 = arith.constant 2 : i32
    %0 = arith.muli %arg0, %c2_i32 : i32
    %1 = arith.addi %0, %arg1 : i32
    %c0_i32 = arith.constant 0 : i32
    %c0_i32_0 = arith.constant 0 : i32
    return %1, %c0_i32 : i32, i32
  }
  func.func @transform_1(%arg0: i32, %arg1: i32) -> (i32, i32) {
    %c0_i32 = arith.constant 0 : i32
    %c0_i32_0 = arith.constant 0 : i32
    %c0_i32_1 = arith.constant 0 : i32
    return %c0_i32, %c0_i32_0 : i32, i32
  }
  func.func @transform_2(%arg0: i32, %arg1: i32) -> (i32, i32) {
    %c0_i32 = arith.constant 0 : i32
    %c0_i32_0 = arith.constant 0 : i32
    %c0_i32_1 = arith.constant 0 : i32
    return %c0_i32, %c0_i32_0 : i32, i32
  }
  func.func @transform_3(%arg0: i32, %arg1: i32) -> (i32, i32, i32) {
    %c0_i32 = arith.constant 0 : i32
    %c0_i32_0 = arith.constant 0 : i32
    %c0_i32_1 = arith.constant 0 : i32
    return %arg0, %c0_i32, %c0_i32_0 : i32, i32, i32
  }
}

</mosaic_0001>

<bundles_post_ra>
// kernel: inception_rgb_forward.2
= control target key start
LH: loop header
LB: loop body
LE: loop exit
PB: predicated region body
PF: predicated region fallthrough
CT: control target
= control target key end

     0   :  { %s3940_s21 = smov 0   ;;  %s3942_s22 = smov 0   ;;  %s5668_s0 = inlined_call_operand.vmem [shape: bf16[4096,81], index: 0, kind: input, shape index: {}]   ;;  %s5669_s1 = inlined_call_operand.vmem [shape: bf16[81,8], index: 1, kind: input, shape index: {}]   ;;  %s5670_s2 = inlined_call_operand.vmem [shape: f32[1,8], index: 2, kind: input, shape index: {}]   ;;  %s5671_s3 = inlined_call_operand.vmem [shape: bf16[8,12], index: 3, kind: input, shape index: {}]   ;;  %s5672_s4 = inlined_call_operand.vmem [shape: f32[1,12], index: 4, kind: input, shape index: {}]   ;;  %s5673_s5 = inlined_call_operand.vmem [shape: bf16[4096,4], index: 5, kind: output, shape index: {0}]   ;;  %s5674_s6 = inlined_call_operand.vmem [shape: f32[2,1,8], index: 6, kind: output, shape index: {1}]  }
   0x1   :  { %s3944_s23 = smov 0   ;;  %s3946_s24 = smov 0  }
   0x2   :  { %s3948_s25 = smov 0  }
   0x3 LB: > { %s26_s26 = sadd.s32 1, %s3892_s23  ;;  %s29_s27 = sadd.s32 1, %s3896_s24  ;;  %s3900_s25 = sphi %s3948_s25, %s17_s25   ;;  %s3896_s24 = sphi %s3946_s24, %s5900_s24   ;;  %s3892_s23 = sphi %s3944_s23, %s5899_s23   ;;  %s3888_s22 = sphi %s3942_s22, %s5898_s22   ;;  %s3884_s21 = sphi %s3940_s21, %s5897_s21  }
   0x4   : > { %p27_p0 = scmp.ge.s32.totalorder %s26_s26, 2  ;;  %p3323_p1 = scmp.ge.s32.totalorder %s3900_s25, 1 }
   0x5   : > { %p240_p2 = scmp.lt.s32.totalorder %s3900_s25, 5 }
   0x6   : > { %s5902_s26 = smov (%p27_p0, %s26_s26), 0  ;;  %s5904_s27 = smov (!%p27_p0, %s29_s27), %s3896_s24 }
   0x7   : > { %p241_p3 = pnand %p3323_p1, %p240_p2  ;;  %p31_p4 = scmp.ge.s32.totalorder %s5904_s27, 2 }
   0x9   : > { %s5906_s27 = smov (%p31_p4, %s5904_s27), 0  ;;  %244 = sbr.rel (%p241_p3) target bundleno = 1224 (0x4c8), region = 40 }
   0xe   : > { %p297_p5 = scmp.lt.s32.totalorder %s3888_s22, 1  ;;  %v439_v0 = vld [vmem:[%s5669_s1 + $0x28] sm:$0x1]  ;;  %vm990_vm0 = vcmask 1040384   ;;  %v3902_v2 = vmov 0   ;;  %s3324_s7 = sshll.u32 %s3888_s22, 1 }
   0xf   : > { %v785_v1 = vunpack.c.l.b16 %v439_v0  ;;  %v992_v3 = vsel %vm990_vm0, 65535, %v3902_v2  ;;  %s278_s11 = sadd.s32 %s3884_s21, %s3324_s7  ;;  %v3805_v6 = vld [vmem:[%s5669_s1 + $0x20] sm:$0xff]  ;;  %v3804_v7 = vld [vmem:[%s5669_s1 + $0x18] sm:$0xff]  ;;  %v3803_v8 = vld [vmem:[%s5669_s1 + $0x10] sm:$0xff]  ;;  %vm797_vm1 = vcmask 662528   ;;  %vm1715_vm2 = vcmask 1043456  }
  0x10   : > { %s298_s30 = scalar_select %p297_p5, %s3888_s22, 1  ;;  %v3802_v9 = vld [vmem:[%s5669_s1 + $0x8] sm:$0xff]  ;;  %v3801_v10 = vld [vmem:[%s5669_s1] sm:$0xff]  ;;  %vm1522_vm3 = vcmask 64512   ;;  %vm2816_vm4 = vcmask 27648  }
  0x11   : > { %v791_v4 = vpack.c.b16 %v785_v1, %v785_v1  ;;  %s3325_s14 = sshll.u32 %s278_s11, 7  ;;  %v1517_v25 = vld [vmem:[%s5671_s3] sm:$0xf]  ;;  %s3903_s17 = smov 120  }
  0x12   : > { %s3978_s10 = scalar_lea.vmem %s5674_s6, %s298_s30  ;;  %p280_p6 = scmp.lt.s32.totalorder %s3325_s14, 511  ;;  %v1717_v26 = vsel %vm1715_vm2, %v1517_v25, 0  ;;  %v4046_v32 = vld [vmem:[%s5670_s2] ss:$0 sm:$0xff] }
  0x13   : > { %v994_v5 = vand.u32 %v992_v3, %v791_v4  ;;  %1726 = vmatpush.bf16.msra.mxu1 %v1717_v26  ;;  %3812 = vmatpush.bf16.msra.mxu3 %v1717_v26  ;;  %p3734_p7 = scmp.ne.s32.totalorder %s3884_s21, 0 }
  0x14   : > { %s5908_s14 = smov (!%p280_p6, %s3325_s14), 511 }
  0x15   : > { %998 = vmatpush.bf16.msra.mxu0 %v994_v5  ;;  %3806 = vmatpush.bf16.msra.mxu2 %v994_v5  ;;  %s3326_s22 = sshll.u32 %s5908_s14, 2 }
  0x16   : > { %s4004_s8 = scalar_lea.vmem %s5668_s0, %s3326_s22  ;;  %s4377_s20 = scalar_lea.vmem %s5673_s5, %s3326_s22 }
  0x17   : > { %v3737_v11 = vld [vmem:[%s4004_s8] sm:$0xff]  ;;  %v3738_v13 = vld [vmem:[%s4004_s8 + $0x8] sm:$0xff]  ;;  %v3739_v15 = vld [vmem:[%s4004_s8 + $0x10] sm:$0xff] }
  0x18   : > { %v3769_v12 = vld [vmem:[%s4004_s8 + $0x100] sm:$0xff]  ;;  %v3770_v14 = vld [vmem:[%s4004_s8 + $0x108] sm:$0xff]  ;;  %v3771_v16 = vld [vmem:[%s4004_s8 + $0x110] sm:$0xff] }
  0x19   : > { %999 = vmatpush.bf16.msra.mxu0 %v3805_v6  ;;  %3807 = vmatpush.bf16.msra.mxu2 %v3805_v6  ;;  %v3740_v17 = vld [vmem:[%s4004_s8 + $0x18] sm:$0xff]  ;;  %v3741_v19 = vld [vmem:[%s4004_s8 + $0x20] sm:$0xff]  ;;  %v3742_v21 = vld [vmem:[%s4004_s8 + $0x28] sm:$0xff] }
  0x1a   : > { %v3772_v18 = vld [vmem:[%s4004_s8 + $0x118] sm:$0xff]  ;;  %v3773_v20 = vld [vmem:[%s4004_s8 + $0x120] sm:$0xff]  ;;  %v3774_v22 = vld [vmem:[%s4004_s8 + $0x128] sm:$0xff] }
  0x1b   : > { %v3743_v23 = vld [vmem:[%s4004_s8 + $0x30] sm:$0xff]  ;;  %v3744_v27 = vld [vmem:[%s4004_s8 + $0x38] sm:$0xff]  ;;  %v3745_v29 = vld [vmem:[%s4004_s8 + $0x40] sm:$0xff] }
  0x1c   : > { %v3775_v24 = vld [vmem:[%s4004_s8 + $0x130] sm:$0xff]  ;;  %v3776_v28 = vld [vmem:[%s4004_s8 + $0x138] sm:$0xff]  ;;  %v3777_v30 = vld [vmem:[%s4004_s8 + $0x140] sm:$0xff] }
  0x1d   : > { %1000 = vmatpush.bf16.msra.mxu0 %v3804_v7  ;;  %3808 = vmatpush.bf16.msra.mxu2 %v3804_v7  ;;  %v3746_v43 = vld [vmem:[%s4004_s8 + $0x48] sm:$0xff]  ;;  %v3747_v59 = vld [vmem:[%s4004_s8 + $0x50] sm:$0xff] }
  0x1e   : > { %v3778_v44 = vld [vmem:[%s4004_s8 + $0x148] sm:$0xff]  ;;  %v3779_v60 = vld [vmem:[%s4004_s8 + $0x150] sm:$0xff] }
  0x21   : > { %1001 = vmatpush.bf16.msra.mxu0 %v3803_v8  ;;  %3809 = vmatpush.bf16.msra.mxu2 %v3803_v8 }
  0x25   : > { %1002 = vmatpush.bf16.msra.mxu0 %v3802_v9  ;;  %3810 = vmatpush.bf16.msra.mxu2 %v3802_v9 }
  0x29   : > { %1003 = vmatpush.bf16.msra.mxu0 %v3801_v10  ;;  %3811 = vmatpush.bf16.msra.mxu2 %v3801_v10 }
  0x2c   : > { %3606 = vmatmul.msk.bf16.vlgmr.msra.gmra.mxu0 %vm797_vm1, %v3737_v11  ;;  %3638 = vmatmul.msk.bf16.vlgmr.msra.gmra.mxu2 %vm797_vm1, %v3769_v12  ;;  %v3748_v11 = vld [vmem:[%s4004_s8 + $0x58] sm:$0xff] }
  0x2d   : > { %v3780_v12 = vld [vmem:[%s4004_s8 + $0x158] sm:$0xff] }
  0x3c   : > { %3607 = vmatmul.msk.bf16.gmra.mxu0 %vm797_vm1, %v3738_v13  ;;  %3639 = vmatmul.msk.bf16.gmra.mxu2 %vm797_vm1, %v3770_v14 }
  0x4c   : > { %3608 = vmatmul.msk.bf16.gmra.mxu0 %vm797_vm1, %v3739_v15  ;;  %3640 = vmatmul.msk.bf16.gmra.mxu2 %vm797_vm1, %v3771_v16 }
  0x5c   : > { %3609 = vmatmul.msk.bf16.gmra.mxu0 %vm797_vm1, %v3740_v17  ;;  %3641 = vmatmul.msk.bf16.gmra.mxu2 %vm797_vm1, %v3772_v18 }
  0x6c   : > { %3610 = vmatmul.msk.bf16.gmra.mxu0 %vm797_vm1, %v3741_v19  ;;  %3642 = vmatmul.msk.bf16.gmra.mxu2 %vm797_vm1, %v3773_v20 }
  0x7c   : > { %3611 = vmatmul.msk.bf16.gmra.mxu0 %vm797_vm1, %v3742_v21  ;;  %3643 = vmatmul.msk.bf16.gmra.mxu2 %vm797_vm1, %v3774_v22 }
  0x8c   : > { %3612 = vmatmul.msk.bf16.gmra.mxu0 %vm797_vm1, %v3743_v23  ;;  %3644 = vmatmul.msk.bf16.gmra.mxu2 %vm797_vm1, %v3775_v24 }
  0x9c   : > { %3613 = vmatmul.msk.bf16.gmra.mxu0 %vm797_vm1, %v3744_v27  ;;  %3645 = vmatmul.msk.bf16.gmra.mxu2 %vm797_vm1, %v3776_v28  ;;  %v3749_v27 = vld [vmem:[%s4004_s8 + $0x60] sm:$0xff] }
  0x9d   : > { %v3781_v28 = vld [vmem:[%s4004_s8 + $0x160] sm:$0xff] }
  0xa9   : > { %v1005_v31 = vpop.f32.mrf.mxu0 }
  0xaa   : > { %v1006_v34 = vadd.f32 %v4046_v32, %v1005_v31 }
  0xac   : > { %3614 = vmatmul.msk.bf16.gmra.mxu0 %vm797_vm1, %v3745_v29  ;;  %3646 = vmatmul.msk.bf16.gmra.mxu2 %vm797_vm1, %v3777_v30  ;;  %v1325_v37 = vmax.f32 %v1006_v34, 0.0 }
  0xaf   : > { %v1165_v33 = vpop.f32.mrf.mxu2 }
  0xb0   : > { %v1166_v39 = vadd.f32 %v4046_v32, %v1165_v33 }
  0xb1   : > { %v1007_v35 = vpop.f32.mrf.mxu0 }
  0xb2   : > { %v1008_v36 = vadd.f32 %v4046_v32, %v1007_v35  ;;  %v1389_v46 = vmax.f32 %v1166_v39, 0.0 }
  0xb4   : > { %v1326_v38 = vmax.f32 %v1008_v36, 0.0 }
  0xb6   : > { %v1453_v40 = vpack.c.bf16 %v1326_v38, %v1325_v37 }
  0xb7   : > { %v1167_v41 = vpop.f32.mrf.mxu2 }
  0xb8   : > { %v1168_v42 = vadd.f32 %v4046_v32, %v1167_v41  ;;  %3670 = vmatmul.msk.bf16.vlgmr.msra.gmra.mxu1 %vm1522_vm3, %v1453_v40 }
  0xb9   : > { %v1010_v45 = vpop.f32.mrf.mxu0 }
  0xba   : > { %v1390_v47 = vmax.f32 %v1168_v42, 0.0  ;;  %v1011_v50 = vadd.f32 %v4046_v32, %v1010_v45  ;;  %v3782_v45 = vld [vmem:[%s4004_s8 + $0x168] sm:$0xff] }
  0xbc   : > { %v4057_v48 = vpack.c.bf16 %v1390_v47, %v1389_v46  ;;  %3615 = vmatmul.msk.bf16.gmra.mxu0 %vm797_vm1, %v3746_v43  ;;  %3647 = vmatmul.msk.bf16.gmra.mxu2 %vm797_vm1, %v3778_v44  ;;  %v1327_v53 = vmax.f32 %v1011_v50, 0.0  ;;  %v3750_v44 = vld [vmem:[%s4004_s8 + $0x68] sm:$0xff] }
  0xbf   : > { %v1170_v49 = vpop.f32.mrf.mxu2 }
  0xc0   : > { %v1171_v55 = vadd.f32 %v4046_v32, %v1170_v49 }
  0xc1   : > { %v1012_v51 = vpop.f32.mrf.mxu0 }
  0xc2   : > { %v1013_v52 = vadd.f32 %v4046_v32, %v1012_v51  ;;  %v1391_v62 = vmax.f32 %v1171_v55, 0.0 }
  0xc4   : > { %v1328_v54 = vmax.f32 %v1013_v52, 0.0 }
  0xc6   : > { %v1454_v56 = vpack.c.bf16 %v1328_v54, %v1327_v53 }
  0xc7   : > { %v1172_v57 = vpop.f32.mrf.mxu2 }
  0xc8   : > { %v1173_v58 = vadd.f32 %v4046_v32, %v1172_v57  ;;  %3671 = vmatmul.msk.bf16.gmra.mxu1 %vm1522_vm3, %v1454_v56 }
  0xc9   : > { %v1015_v61 = vpop.f32.mrf.mxu0 }
  0xca   : > { %v1392_v63 = vmax.f32 %v1173_v58, 0.0  ;;  %v1016_v2 = vadd.f32 %v4046_v32, %v1015_v61  ;;  %v3751_v61 = vld [vmem:[%s4004_s8 + $0x70] sm:$0xff] }
  0xcc   : > { %3616 = vmatmul.msk.bf16.gmra.mxu0 %vm797_vm1, %v3747_v59  ;;  %3648 = vmatmul.msk.bf16.gmra.mxu2 %vm797_vm1, %v3779_v60  ;;  %v1486_v0 = vpack.c.bf16 %v1392_v63, %v1391_v62  ;;  %v1329_v5 = vmax.f32 %v1016_v2, 0.0  ;;  %v3783_v62 = vld [vmem:[%s4004_s8 + $0x170] sm:$0xff] }
  0xce   : > { %3703 = vmatmul.msk.bf16.vlgmr.msra.gmra.mxu3 %vm1522_vm3, %v1486_v0 }
  0xcf   : > { %v1175_v1 = vpop.f32.mrf.mxu2 }
  0xd0   : > { %v1176_v7 = vadd.f32 %v4046_v32, %v1175_v1 }
  0xd1   : > { %v1017_v3 = vpop.f32.mrf.mxu0 }
  0xd2   : > { %v1018_v4 = vadd.f32 %v4046_v32, %v1017_v3  ;;  %v1393_v14 = vmax.f32 %v1176_v7, 0.0 }
  0xd4   : > { %v1330_v6 = vmax.f32 %v1018_v4, 0.0 }
  0xd6   : > { %v1455_v8 = vpack.c.bf16 %v1330_v6, %v1329_v5 }
  0xd7   : > { %v1177_v9 = vpop.f32.mrf.mxu2 }
  0xd8   : > { %v1178_v10 = vadd.f32 %v4046_v32, %v1177_v9  ;;  %3672 = vmatmul.msk.bf16.gmra.mxu1 %vm1522_vm3, %v1455_v8 }
  0xd9   : > { %v1020_v13 = vpop.f32.mrf.mxu0 }
  0xda   : > { %v1394_v15 = vmax.f32 %v1178_v10, 0.0  ;;  %v1021_v18 = vadd.f32 %v4046_v32, %v1020_v13  ;;  %v3752_v13 = vld [vmem:[%s4004_s8 + $0x78] sm:$0xff] }
  0xdc   : > { %3617 = vmatmul.msk.bf16.gmra.mxu0 %vm797_vm1, %v3748_v11  ;;  %3649 = vmatmul.msk.bf16.gmra.mxu2 %vm797_vm1, %v3780_v12  ;;  %v1487_v16 = vpack.c.bf16 %v1394_v15, %v1393_v14  ;;  %v1331_v21 = vmax.f32 %v1021_v18, 0.0  ;;  %v3784_v14 = vld [vmem:[%s4004_s8 + $0x178] sm:$0xff] }
  0xde   : > { %3704 = vmatmul.msk.bf16.gmra.mxu3 %vm1522_vm3, %v1487_v16 }
  0xdf   : > { %v1180_v17 = vpop.f32.mrf.mxu2 }
  0xe0   : > { %v1181_v23 = vadd.f32 %v4046_v32, %v1180_v17 }
  0xe1   : > { %v1022_v19 = vpop.f32.mrf.mxu0 }
  0xe2   : > { %v1023_v20 = vadd.f32 %v4046_v32, %v1022_v19  ;;  %v1395_v30 = vmax.f32 %v1181_v23, 0.0 }
  0xe4   : > { %v1332_v22 = vmax.f32 %v1023_v20, 0.0 }
  0xe6   : > { %v1456_v24 = vpack.c.bf16 %v1332_v22, %v1331_v21 }
  0xe7   : > { %v1182_v25 = vpop.f32.mrf.mxu2 }
  0xe8   : > { %v1183_v26 = vadd.f32 %v4046_v32, %v1182_v25  ;;  %3673 = vmatmul.msk.bf16.gmra.mxu1 %vm1522_vm3, %v1456_v24 }
  0xe9   : > { %v1025_v29 = vpop.f32.mrf.mxu0 }
  0xea   : > { %v1396_v31 = vmax.f32 %v1183_v26, 0.0  ;;  %v1026_v35 = vadd.f32 %v4046_v32, %v1025_v29  ;;  %v3753_v29 = vld [vmem:[%s4004_s8 + $0x80] sm:$0xff] }
  0xec   : > { %3618 = vmatmul.msk.bf16.gmra.mxu0 %vm797_vm1, %v3749_v27  ;;  %3650 = vmatmul.msk.bf16.gmra.mxu2 %vm797_vm1, %v3781_v28  ;;  %v1488_v33 = vpack.c.bf16 %v1396_v31, %v1395_v30  ;;  %v1333_v38 = vmax.f32 %v1026_v35, 0.0  ;;  %v3785_v30 = vld [vmem:[%s4004_s8 + $0x180] sm:$0xff] }
  0xee   : > { %3705 = vmatmul.msk.bf16.gmra.mxu3 %vm1522_vm3, %v1488_v33 }
  0xef   : > { %v1185_v34 = vpop.f32.mrf.mxu2 }
  0xf0   : > { %v1186_v40 = vadd.f32 %v4046_v32, %v1185_v34 }
  0xf1   : > { %v1027_v36 = vpop.f32.mrf.mxu0 }
  0xf2   : > { %v1028_v37 = vadd.f32 %v4046_v32, %v1027_v36  ;;  %v1397_v47 = vmax.f32 %v1186_v40, 0.0  ;;  %v4136_v40 = vld [vmem:[%s5672_s4] ss:$0 sm:$0xff] }
  0xf4   : > { %v1334_v39 = vmax.f32 %v1028_v37, 0.0 }
  0xf6   : > { %v1457_v41 = vpack.c.bf16 %v1334_v39, %v1333_v38 }
  0xf7   : > { %v1187_v42 = vpop.f32.mrf.mxu2 }
  0xf8   : > { %v1188_v43 = vadd.f32 %v4046_v32, %v1187_v42  ;;  %3674 = vmatmul.msk.bf16.gmra.mxu1 %vm1522_vm3, %v1457_v41 }
  0xf9   : > { %v1030_v46 = vpop.f32.mrf.mxu0 }
  0xfa   : > { %v1398_v49 = vmax.f32 %v1188_v43, 0.0  ;;  %v1031_v52 = vadd.f32 %v4046_v32, %v1030_v46 }
  0xfc   : > { %3619 = vmatmul.msk.bf16.gmra.mxu0 %vm797_vm1, %v3750_v44  ;;  %3651 = vmatmul.msk.bf16.gmra.mxu2 %vm797_vm1, %v3782_v45  ;;  %v1489_v50 = vpack.c.bf16 %v1398_v49, %v1397_v47  ;;  %v1335_v55 = vmax.f32 %v1031_v52, 0.0  ;;  %v3786_v52 = vld [vmem:[%s4004_s8 + $0x188] sm:$0xff] }
  0xfe   : > { %3706 = vmatmul.msk.bf16.gmra.mxu3 %vm1522_vm3, %v1489_v50 }
  0xff   : > { %v1190_v51 = vpop.f32.mrf.mxu2 }
 0x100   : > { %v1191_v57 = vadd.f32 %v4046_v32, %v1190_v51  ;;  %v3754_v51 = vld [vmem:[%s4004_s8 + $0x88] sm:$0xff] }
 0x101   : > { %v1032_v53 = vpop.f32.mrf.mxu0 }
 0x102   : > { %v1033_v54 = vadd.f32 %v4046_v32, %v1032_v53  ;;  %v1399_v0 = vmax.f32 %v1191_v57, 0.0 }
 0x104   : > { %v1336_v56 = vmax.f32 %v1033_v54, 0.0 }
 0x106   : > { %v1458_v58 = vpack.c.bf16 %v1336_v56, %v1335_v55 }
 0x107   : > { %v1192_v59 = vpop.f32.mrf.mxu2 }
 0x108   : > { %v1193_v60 = vadd.f32 %v4046_v32, %v1192_v59  ;;  %3675 = vmatmul.msk.bf16.gmra.mxu1 %vm1522_vm3, %v1458_v58 }
 0x109   : > { %v1035_v63 = vpop.f32.mrf.mxu0 }
 0x10a   : > { %v1400_v1 = vmax.f32 %v1193_v60, 0.0  ;;  %v1036_v4 = vadd.f32 %v4046_v32, %v1035_v63 }
 0x10c   : > { %3620 = vmatmul.msk.bf16.gmra.mxu0 %vm797_vm1, %v3751_v61  ;;  %3652 = vmatmul.msk.bf16.gmra.mxu2 %vm797_vm1, %v3783_v62  ;;  %v1490_v2 = vpack.c.bf16 %v1400_v1, %v1399_v0  ;;  %v1337_v7 = vmax.f32 %v1036_v4, 0.0 }
 0x10e   : > { %3707 = vmatmul.msk.bf16.gmra.mxu3 %vm1522_vm3, %v1490_v2 }
 0x10f   : > { %v1195_v3 = vpop.f32.mrf.mxu2 }
 0x110   : > { %v1196_v9 = vadd.f32 %v4046_v32, %v1195_v3 }
 0x111   : > { %v1037_v5 = vpop.f32.mrf.mxu0 }
 0x112   : > { %v1038_v6 = vadd.f32 %v4046_v32, %v1037_v5  ;;  %v1401_v16 = vmax.f32 %v1196_v9, 0.0 }
 0x114   : > { %v1338_v8 = vmax.f32 %v1038_v6, 0.0 }
 0x116   : > { %v1459_v10 = vpack.c.bf16 %v1338_v8, %v1337_v7 }
 0x117   : > { %v1197_v11 = vpop.f32.mrf.mxu2 }
 0x118   : > { %v1198_v12 = vadd.f32 %v4046_v32, %v1197_v11  ;;  %3676 = vmatmul.msk.bf16.gmra.mxu1 %vm1522_vm3, %v1459_v10  ;;  %v3755_v11 = vld [vmem:[%s4004_s8 + $0x90] sm:$0xff] }
 0x119   : > { %v1040_v15 = vpop.f32.mrf.mxu0 }
 0x11a   : > { %v1402_v17 = vmax.f32 %v1198_v12, 0.0  ;;  %v1041_v20 = vadd.f32 %v4046_v32, %v1040_v15  ;;  %v3787_v12 = vld [vmem:[%s4004_s8 + $0x190] sm:$0xff] }
 0x11c   : > { %3621 = vmatmul.msk.bf16.gmra.mxu0 %vm797_vm1, %v3752_v13  ;;  %3653 = vmatmul.msk.bf16.gmra.mxu2 %vm797_vm1, %v3784_v14  ;;  %v1491_v18 = vpack.c.bf16 %v1402_v17, %v1401_v16  ;;  %v1339_v23 = vmax.f32 %v1041_v20, 0.0 }
 0x11e   : > { %3708 = vmatmul.msk.bf16.gmra.mxu3 %vm1522_vm3, %v1491_v18 }
 0x11f   : > { %v1200_v19 = vpop.f32.mrf.mxu2 }
 0x120   : > { %v1201_v25 = vadd.f32 %v4046_v32, %v1200_v19 }
 0x121   : > { %v1042_v21 = vpop.f32.mrf.mxu0 }
 0x122   : > { %v1043_v22 = vadd.f32 %v4046_v32, %v1042_v21  ;;  %v1403_v33 = vmax.f32 %v1201_v25, 0.0 }
 0x124   : > { %v1340_v24 = vmax.f32 %v1043_v22, 0.0 }
 0x126   : > { %v1460_v26 = vpack.c.bf16 %v1340_v24, %v1339_v23 }
 0x127   : > { %v1202_v27 = vpop.f32.mrf.mxu2 }
 0x128   : > { %v1203_v28 = vadd.f32 %v4046_v32, %v1202_v27  ;;  %3677 = vmatmul.msk.bf16.gmra.mxu1 %vm1522_vm3, %v1460_v26 }
 0x129   : > { %v1045_v31 = vpop.f32.mrf.mxu0 }
 0x12a   : > { %v1404_v34 = vmax.f32 %v1203_v28, 0.0  ;;  %v1046_v37 = vadd.f32 %v4046_v32, %v1045_v31 }
 0x12c   : > { %3622 = vmatmul.msk.bf16.gmra.mxu0 %vm797_vm1, %v3753_v29  ;;  %3654 = vmatmul.msk.bf16.gmra.mxu2 %vm797_vm1, %v3785_v30  ;;  %v1492_v35 = vpack.c.bf16 %v1404_v34, %v1403_v33  ;;  %v1341_v41 = vmax.f32 %v1046_v37, 0.0 }
 0x12e   : > { %3709 = vmatmul.msk.bf16.gmra.mxu3 %vm1522_vm3, %v1492_v35 }
 0x12f   : > { %v1205_v36 = vpop.f32.mrf.mxu2 }
 0x130   : > { %v1206_v44 = vadd.f32 %v4046_v32, %v1205_v36 }
 0x131   : > { %v1047_v38 = vpop.f32.mrf.mxu0 }
 0x132   : > { %v1048_v39 = vadd.f32 %v4046_v32, %v1047_v38  ;;  %v1405_v54 = vmax.f32 %v1206_v44, 0.0 }
 0x134   : > { %v1342_v42 = vmax.f32 %v1048_v39, 0.0 }
 0x135   : > { %v1728_v43 = vpop.f32.mrf.mxu1 }
 0x136   : > { %v1729_v45 = vadd.f32 %v4136_v40, %v1728_v43  ;;  %v1461_v46 = vpack.c.bf16 %v1342_v42, %v1341_v41  ;;  %v3756_v41 = vld [vmem:[%s4004_s8 + $0x98] sm:$0xff] }
 0x137   : > { %v1207_v47 = vpop.f32.mrf.mxu2  ;;  %v3788_v42 = vld [vmem:[%s4004_s8 + $0x198] sm:$0xff] }
 0x138   : > { %v4140_v49 = vmax.f32 %v1729_v45, 0.0  ;;  %v1208_v50 = vadd.f32 %v4046_v32, %v1207_v47  ;;  %3678 = vmatmul.msk.bf16.gmra.mxu1 %vm1522_vm3, %v1461_v46 }
 0x139   : > { %v1050_v53 = vpop.f32.mrf.mxu0 }
 0x13a   : > { %v1406_v55 = vmax.f32 %v1208_v50, 0.0  ;;  %v2176_v56 = vpack.c.bf16 %v4140_v49, %v4140_v49  ;;  %v1051_v61 = vadd.f32 %v4046_v32, %v1050_v53 }
 0x13c   : > { %3623 = vmatmul.msk.bf16.gmra.mxu0 %vm797_vm1, %v3754_v51  ;;  %3655 = vmatmul.msk.bf16.gmra.mxu2 %vm797_vm1, %v3786_v52  ;;  %v1493_v57 = vpack.c.bf16 %v1406_v55, %v1405_v54  ;;  %v1343_v2 = vmax.f32 %v1051_v61, 0.0 }
 0x13d   : > { %2432 = vrot.lane.b32.xlu0 %v2176_v56, %s3903_s17  ;;  %v1730_v58 = vpop.f32.mrf.mxu1 }
 0x13e   : > { %v1731_v59 = vadd.f32 %v4136_v40, %v1730_v58  ;;  %3710 = vmatmul.msk.bf16.gmra.mxu3 %vm1522_vm3, %v1493_v57 }
 0x13f   : > { %v1210_v60 = vpop.f32.mrf.mxu2 }
 0x140   : > { %v4154_v62 = vmax.f32 %v1731_v59, 0.0  ;;  %v1211_v5 = vadd.f32 %v4046_v32, %v1210_v60 }
 0x141   : > { %v1052_v63 = vpop.f32.mrf.mxu0 }
 0x142   : > { %v2177_v0 = vpack.c.bf16 %v4154_v62, %v4154_v62  ;;  %v1053_v1 = vadd.f32 %v4046_v32, %v1052_v63  ;;  %v1407_v14 = vmax.f32 %v1211_v5, 0.0 }
 0x144   : > { %v1344_v3 = vmax.f32 %v1053_v1, 0.0 }
 0x145   : > { %2434 = vrot.lane.b32.xlu0 %v2177_v0, %s3903_s17  ;;  %v1733_v4 = vpop.f32.mrf.mxu1 }
 0x146   : > { %v1734_v6 = vadd.f32 %v4136_v40, %v1733_v4  ;;  %v1462_v7 = vpack.c.bf16 %v1344_v3, %v1343_v2 }
 0x147   : > { %v1212_v8 = vpop.f32.mrf.mxu2 }
 0x148   : > { %v4162_v9 = vmax.f32 %v1734_v6, 0.0  ;;  %v1213_v10 = vadd.f32 %v4046_v32, %v1212_v8  ;;  %3679 = vmatmul.msk.bf16.gmra.mxu1 %vm1522_vm3, %v1462_v7 }
 0x149   : > { %v1055_v13 = vpop.f32.mrf.mxu0 }
 0x14a   : > { %v1408_v15 = vmax.f32 %v1213_v10, 0.0  ;;  %v2178_v16 = vpack.c.bf16 %v4162_v9, %v4162_v9  ;;  %v1056_v21 = vadd.f32 %v4046_v32, %v1055_v13  ;;  %v3789_v13 = vld [vmem:[%s4004_s8 + $0x1a0] sm:$0xff] }
 0x14c   : > { %3624 = vmatmul.msk.bf16.gmra.mxu0 %vm797_vm1, %v3755_v11  ;;  %3656 = vmatmul.msk.bf16.gmra.mxu2 %vm797_vm1, %v3787_v12  ;;  %v1494_v17 = vpack.c.bf16 %v1408_v15, %v1407_v14  ;;  %v1345_v28 = vmax.f32 %v1056_v21, 0.0  ;;  %v3757_v12 = vld [vmem:[%s4004_s8 + $0xa0] sm:$0xff] }
 0x14d   : > { %2436 = vrot.lane.b32.xlu1 %v2178_v16, %s3903_s17  ;;  %v1735_v18 = vpop.f32.mrf.mxu1 }
 0x14e   : > { %v1736_v19 = vadd.f32 %v4136_v40, %v1735_v18  ;;  %3711 = vmatmul.msk.bf16.gmra.mxu3 %vm1522_vm3, %v1494_v17 }
 0x14f   : > { %v1215_v20 = vpop.f32.mrf.mxu2 }
 0x150   : > { %v4176_v22 = vmax.f32 %v1736_v19, 0.0  ;;  %v1216_v33 = vadd.f32 %v4046_v32, %v1215_v20 }
 0x151   : > { %v1057_v23 = vpop.f32.mrf.mxu0  ;;  %v1893_v24 = vpop.f32.mrf.mxu3 }
 0x152   : > { %v2179_v25 = vpack.c.bf16 %v4176_v22, %v4176_v22  ;;  %v1058_v26 = vadd.f32 %v4046_v32, %v1057_v23  ;;  %v1894_v27 = vadd.f32 %v4136_v40, %v1893_v24  ;;  %v1409_v45 = vmax.f32 %v1216_v33, 0.0 }
 0x154   : > { %v1346_v29 = vmax.f32 %v1058_v26, 0.0  ;;  %v4182_v30 = vmax.f32 %v1894_v27, 0.0 }
 0x155   : > { %2438 = vrot.lane.b32.xlu1 %v2179_v25, %s3903_s17  ;;  %v1738_v31 = vpop.f32.mrf.mxu1 }
 0x156   : > { %5749 = vst [vmem:[#allocation2_spill] sm:$0xff] %v4182_v30  ;;  %v2242_v34 = vpack.c.bf16 %v4182_v30, %v4182_v30  ;;  %v1739_v35 = vadd.f32 %v4136_v40, %v1738_v31  ;;  %v1463_v36 = vpack.c.bf16 %v1346_v29, %v1345_v28 }
 0x157   : > { %v1217_v37 = vpop.f32.mrf.mxu2 }
 0x158   : > { %v4189_v38 = vmax.f32 %v1739_v35, 0.0  ;;  %v1218_v39 = vadd.f32 %v4046_v32, %v1217_v37  ;;  %3680 = vmatmul.msk.bf16.gmra.mxu1 %vm1522_vm3, %v1463_v36  ;;  %2564 = vrot.lane.b32.xlu0 %v2242_v34, %s3903_s17 }
 0x159   : > { %v1060_v43 = vpop.f32.mrf.mxu0  ;;  %v1895_v44 = vpop.f32.mrf.mxu3 }
 0x15a   : > { %v1410_v46 = vmax.f32 %v1218_v39, 0.0  ;;  %v1896_v47 = vadd.f32 %v4136_v40, %v1895_v44  ;;  %v2180_v50 = vpack.c.bf16 %v4189_v38, %v4189_v38  ;;  %v1061_v57 = vadd.f32 %v4046_v32, %v1060_v43 }
 0x15c   : > { %v4199_v51 = vmax.f32 %v1896_v47, 0.0  ;;  %3625 = vmatmul.msk.bf16.gmra.mxu0 %vm797_vm1, %v3756_v41  ;;  %3657 = vmatmul.msk.bf16.gmra.mxu2 %vm797_vm1, %v3788_v42  ;;  %v1495_v52 = vpack.c.bf16 %v1410_v46, %v1409_v45  ;;  %v1347_v1 = vmax.f32 %v1061_v57, 0.0 }
 0x15d   : > { %2440 = vrot.lane.b32.xlu2 %v2180_v50, %s3903_s17  ;;  %v1740_v53 = vpop.f32.mrf.mxu1 }
 0x15e   : > { %5750 = vst [vmem:[#allocation3_spill] sm:$0xff] %v4199_v51  ;;  %v2243_v54 = vpack.c.bf16 %v4199_v51, %v4199_v51  ;;  %v1741_v55 = vadd.f32 %v4136_v40, %v1740_v53  ;;  %3712 = vmatmul.msk.bf16.gmra.mxu3 %vm1522_vm3, %v1495_v52  ;;  %v3758_v52 = vld [vmem:[%s4004_s8 + $0xa8] sm:$0xff] }
 0x15f   : > { %v1220_v56 = vpop.f32.mrf.mxu2  ;;  %v3790_v53 = vld [vmem:[%s4004_s8 + $0x1a8] sm:$0xff] }
 0x160   : > { %v4209_v58 = vmax.f32 %v1741_v55, 0.0  ;;  %2566 = vrot.lane.b32.xlu1 %v2243_v54, %s3903_s17  ;;  %v1221_v4 = vadd.f32 %v4046_v32, %v1220_v56 }
 0x161   : > { %v1062_v59 = vpop.f32.mrf.mxu0  ;;  %v1898_v60 = vpop.f32.mrf.mxu3 }
 0x162   : > { %v2181_v61 = vpack.c.bf16 %v4209_v58, %v4209_v58  ;;  %v1063_v63 = vadd.f32 %v4046_v32, %v1062_v59  ;;  %v1899_v0 = vadd.f32 %v4136_v40, %v1898_v60  ;;  %v1411_v16 = vmax.f32 %v1221_v4, 0.0 }
 0x164   : > { %v1348_v2 = vmax.f32 %v1063_v63, 0.0  ;;  %v4219_v7 = vmax.f32 %v1899_v0, 0.0 }
 0x165   : > { %2442 = vrot.lane.b32.xlu2 %v2181_v61, %s3903_s17  ;;  %v1743_v3 = vpop.f32.mrf.mxu1 }
 0x166   : > { %v1744_v5 = vadd.f32 %v4136_v40, %v1743_v3  ;;  %v1464_v6 = vpack.c.bf16 %v1348_v2, %v1347_v1  ;;  %5751 = vst [vmem:[#allocation4_spill] sm:$0xff] %v4219_v7  ;;  %v2244_v19 = vpack.c.bf16 %v4219_v7, %v4219_v7 }
 0x167   : > { %v1222_v8 = vpop.f32.mrf.mxu2 }
 0x168   : > { %v4221_v10 = vmax.f32 %v1744_v5, 0.0  ;;  %v1223_v11 = vadd.f32 %v4046_v32, %v1222_v8  ;;  %3681 = vmatmul.msk.bf16.gmra.mxu1 %vm1522_vm3, %v1464_v6 }
 0x169   : > { %v1065_v14 = vpop.f32.mrf.mxu0  ;;  %v1900_v15 = vpop.f32.mrf.mxu3 }
 0x16a   : > { %v2182_v17 = vpack.c.bf16 %v4221_v10, %v4221_v10  ;;  %v1412_v18 = vmax.f32 %v1223_v11, 0.0  ;;  %v1901_v20 = vadd.f32 %v4136_v40, %v1900_v15  ;;  %v1066_v27 = vadd.f32 %v4046_v32, %v1065_v14 }
 0x16c   : > { %3626 = vmatmul.msk.bf16.gmra.mxu0 %vm797_vm1, %v3757_v12  ;;  %3658 = vmatmul.msk.bf16.gmra.mxu2 %vm797_vm1, %v3789_v13  ;;  %v1496_v21 = vpack.c.bf16 %v1412_v18, %v1411_v16  ;;  %v4238_v25 = vmax.f32 %v1901_v20, 0.0  ;;  %v1349_v37 = vmax.f32 %v1066_v27, 0.0  ;;  %v3759_v27 = vld [vmem:[%s4004_s8 + $0xb0] sm:$0xff] }
 0x16d   : > { %2568 = vrot.lane.b32.xlu2 %v2244_v19, %s3903_s17  ;;  %2444 = vrot.lane.b32.xlu0 %v2182_v17, %s3903_s17  ;;  %v1745_v23 = vpop.f32.mrf.mxu1 }
 0x16e   : > { %v1746_v24 = vadd.f32 %v4136_v40, %v1745_v23  ;;  %3713 = vmatmul.msk.bf16.gmra.mxu3 %vm1522_vm3, %v1496_v21  ;;  %5752 = vst [vmem:[#allocation5_spill] sm:$0xff] %v4238_v25  ;;  %v2245_v35 = vpack.c.bf16 %v4238_v25, %v4238_v25 }
 0x16f   : > { %v1225_v26 = vpop.f32.mrf.mxu2 }
 0x170   : > { %v4241_v28 = vmax.f32 %v1746_v24, 0.0  ;;  %v1226_v42 = vadd.f32 %v4046_v32, %v1225_v26 }
 0x171   : > { %v1067_v29 = vpop.f32.mrf.mxu0  ;;  %v1903_v31 = vpop.f32.mrf.mxu3 }
 0x172   : > { %v2183_v33 = vpack.c.bf16 %v4241_v28, %v4241_v28  ;;  %v1068_v34 = vadd.f32 %v4046_v32, %v1067_v29  ;;  %v1904_v36 = vadd.f32 %v4136_v40, %v1903_v31  ;;  %v1413_v56 = vmax.f32 %v1226_v42, 0.0  ;;  %v3791_v29 = vld [vmem:[%s4004_s8 + $0x1b0] sm:$0xff] }
 0x174   : > { %v1350_v39 = vmax.f32 %v1068_v34, 0.0  ;;  %2446 = vrot.lane.b32.xlu1 %v2183_v33, %s3903_s17  ;;  %v4253_v45 = vmax.f32 %v1904_v36, 0.0 }
 0x175   : > { %2570 = vrot.lane.b32.xlu0 %v2245_v35, %s3903_s17  ;;  %v1748_v41 = vpop.f32.mrf.mxu1 }
 0x176   : > { %v1465_v43 = vpack.c.bf16 %v1350_v39, %v1349_v37  ;;  %v1749_v44 = vadd.f32 %v4136_v40, %v1748_v41  ;;  %5753 = vst [vmem:[#allocation6_spill] sm:$0xff] %v4253_v45  ;;  %v2246_v60 = vpack.c.bf16 %v4253_v45, %v4253_v45 }
 0x177   : > { %v1227_v46 = vpop.f32.mrf.mxu2 }
 0x178   : > { %v4255_v47 = vmax.f32 %v1749_v44, 0.0  ;;  %v1228_v50 = vadd.f32 %v4046_v32, %v1227_v46  ;;  %3682 = vmatmul.msk.bf16.gmra.mxu1 %vm1522_vm3, %v1465_v43 }
 0x179   : > { %v1070_v54 = vpop.f32.mrf.mxu0  ;;  %v1905_v55 = vpop.f32.mrf.mxu3 }
 0x17a   : > { %v2184_v57 = vpack.c.bf16 %v4255_v47, %v4255_v47  ;;  %v1414_v59 = vmax.f32 %v1228_v50, 0.0  ;;  %v1906_v61 = vadd.f32 %v4136_v40, %v1905_v55  ;;  %v1071_v4 = vadd.f32 %v4046_v32, %v1070_v54 }
 0x17c   : > { %3627 = vmatmul.msk.bf16.gmra.mxu0 %vm797_vm1, %v3758_v52  ;;  %3659 = vmatmul.msk.bf16.gmra.mxu2 %vm797_vm1, %v3790_v53  ;;  %v1497_v63 = vpack.c.bf16 %v1414_v59, %v1413_v56  ;;  %v4272_v2 = vmax.f32 %v1906_v61, 0.0  ;;  %v1351_v15 = vmax.f32 %v1071_v4, 0.0 }
 0x17d   : > { %2448 = vrot.lane.b32.xlu2 %v2184_v57, %s3903_s17  ;;  %2572 = vrot.lane.b32.xlu1 %v2246_v60, %s3903_s17  ;;  %v1750_v0 = vpop.f32.mrf.mxu1 }
 0x17e   : > { %v1751_v1 = vadd.f32 %v4136_v40, %v1750_v0  ;;  %3714 = vmatmul.msk.bf16.gmra.mxu3 %vm1522_vm3, %v1497_v63  ;;  %5754 = vst [vmem:[#allocation7_spill] sm:$0xff] %v4272_v2  ;;  %v2247_v13 = vpack.c.bf16 %v4272_v2, %v4272_v2 }
 0x17f   : > { %v1230_v3 = vpop.f32.mrf.mxu2 }
 0x180   : > { %v4275_v5 = vmax.f32 %v1751_v1, 0.0  ;;  %v1231_v18 = vadd.f32 %v4046_v32, %v1230_v3 }
 0x181   : > { %v1072_v6 = vpop.f32.mrf.mxu0  ;;  %v1908_v8 = vpop.f32.mrf.mxu3 }
 0x182   : > { %v2185_v11 = vpack.c.bf16 %v4275_v5, %v4275_v5  ;;  %v1073_v12 = vadd.f32 %v4046_v32, %v1072_v6  ;;  %v1909_v14 = vadd.f32 %v4136_v40, %v1908_v8  ;;  %v1415_v34 = vmax.f32 %v1231_v18, 0.0 }
 0x184   : > { %v1352_v16 = vmax.f32 %v1073_v12, 0.0  ;;  %2450 = vrot.lane.b32.xlu0 %v2185_v11, %s3903_s17  ;;  %v4287_v21 = vmax.f32 %v1909_v14, 0.0  ;;  %v3760_v12 = vld [vmem:[%s4004_s8 + $0xb8] sm:$0xff] }
 0x185   : > { %2574 = vrot.lane.b32.xlu2 %v2247_v13, %s3903_s17  ;;  %v1753_v17 = vpop.f32.mrf.mxu1  ;;  %v3792_v13 = vld [vmem:[%s4004_s8 + $0x1b8] sm:$0xff] }
 0x186   : > { %v1466_v19 = vpack.c.bf16 %v1352_v16, %v1351_v15  ;;  %v1754_v20 = vadd.f32 %v4136_v40, %v1753_v17  ;;  %5755 = vst [vmem:[#allocation8_spill] sm:$0xff] %v4287_v21  ;;  %v2248_v37 = vpack.c.bf16 %v4287_v21, %v4287_v21 }
 0x187   : > { %v1232_v23 = vpop.f32.mrf.mxu2 }
 0x188   : > { %v4289_v24 = vmax.f32 %v1754_v20, 0.0  ;;  %v1233_v26 = vadd.f32 %v4046_v32, %v1232_v23  ;;  %3683 = vmatmul.msk.bf16.gmra.mxu1 %vm1522_vm3, %v1466_v19 }
 0x189   : > { %v1075_v31 = vpop.f32.mrf.mxu0  ;;  %v1910_v33 = vpop.f32.mrf.mxu3 }
 0x18a   : > { %v2186_v35 = vpack.c.bf16 %v4289_v24, %v4289_v24  ;;  %v1416_v36 = vmax.f32 %v1233_v26, 0.0  ;;  %v1911_v39 = vadd.f32 %v4136_v40, %v1910_v33  ;;  %v1076_v50 = vadd.f32 %v4046_v32, %v1075_v31 }
 0x18c   : > { %v1498_v41 = vpack.c.bf16 %v1416_v36, %v1415_v34  ;;  %3628 = vmatmul.msk.bf16.gmra.mxu0 %vm797_vm1, %v3759_v27  ;;  %3660 = vmatmul.msk.bf16.gmra.mxu2 %vm797_vm1, %v3791_v29  ;;  %v4306_v44 = vmax.f32 %v1911_v39, 0.0  ;;  %v1353_v60 = vmax.f32 %v1076_v50, 0.0 }
 0x18d   : > { %2452 = vrot.lane.b32.xlu1 %v2186_v35, %s3903_s17  ;;  %2576 = vrot.lane.b32.xlu0 %v2248_v37, %s3903_s17  ;;  %v1755_v42 = vpop.f32.mrf.mxu1 }
 0x18e   : > { %v1756_v43 = vadd.f32 %v4136_v40, %v1755_v42  ;;  %3715 = vmatmul.msk.bf16.gmra.mxu3 %vm1522_vm3, %v1498_v41  ;;  %5756 = vst [vmem:[#allocation9_spill] sm:$0xff] %v4306_v44  ;;  %v2249_v57 = vpack.c.bf16 %v4306_v44, %v4306_v44 }
 0x18f   : > { %v1235_v46 = vpop.f32.mrf.mxu2 }
 0x190   : > { %v4309_v52 = vmax.f32 %v1756_v43, 0.0  ;;  %v1236_v0 = vadd.f32 %v4046_v32, %v1235_v46 }
 0x191   : > { %v1077_v53 = vpop.f32.mrf.mxu0  ;;  %v1913_v54 = vpop.f32.mrf.mxu3 }
 0x192   : > { %v2187_v55 = vpack.c.bf16 %v4309_v52, %v4309_v52  ;;  %v1078_v56 = vadd.f32 %v4046_v32, %v1077_v53  ;;  %v1914_v59 = vadd.f32 %v4136_v40, %v1913_v54  ;;  %v1417_v16 = vmax.f32 %v1236_v0, 0.0 }
 0x194   : > { %v1354_v61 = vmax.f32 %v1078_v56, 0.0  ;;  %2454 = vrot.lane.b32.xlu2 %v2187_v55, %s3903_s17  ;;  %v4321_v4 = vmax.f32 %v1914_v59, 0.0 }
 0x195   : > { %2578 = vrot.lane.b32.xlu1 %v2249_v57, %s3903_s17  ;;  %v1758_v63 = vpop.f32.mrf.mxu1 }
 0x196   : > { %v1467_v1 = vpack.c.bf16 %v1354_v61, %v1353_v60  ;;  %v1759_v3 = vadd.f32 %v4136_v40, %v1758_v63  ;;  %5757 = vst [vmem:[#allocation10_spill] sm:$0xff] %v4321_v4  ;;  %v2250_v19 = vpack.c.bf16 %v4321_v4, %v4321_v4  ;;  %v3761_v61 = vld [vmem:[%s4004_s8 + $0xc0] sm:$0xff] }
 0x197   : > { %v1237_v6 = vpop.f32.mrf.mxu2  ;;  %v3793_v63 = vld [vmem:[%s4004_s8 + $0x1c0] sm:$0xff] }
 0x198   : > { %v4323_v8 = vmax.f32 %v1759_v3, 0.0  ;;  %v1238_v11 = vadd.f32 %v4046_v32, %v1237_v6  ;;  %3684 = vmatmul.msk.bf16.gmra.mxu1 %vm1522_vm3, %v1467_v1 }
 0x199   : > { %v1080_v14 = vpop.f32.mrf.mxu0  ;;  %v1915_v15 = vpop.f32.mrf.mxu3 }
 0x19a   : > { %v2188_v17 = vpack.c.bf16 %v4323_v8, %v4323_v8  ;;  %v1418_v18 = vmax.f32 %v1238_v11, 0.0  ;;  %v1916_v20 = vadd.f32 %v4136_v40, %v1915_v15  ;;  %v1081_v33 = vadd.f32 %v4046_v32, %v1080_v14 }
 0x19c   : > { %v1499_v23 = vpack.c.bf16 %v1418_v18, %v1417_v16  ;;  %3629 = vmatmul.msk.bf16.gmra.mxu0 %vm797_vm1, %v3760_v12  ;;  %3661 = vmatmul.msk.bf16.gmra.mxu2 %vm797_vm1, %v3792_v13  ;;  %v4340_v29 = vmax.f32 %v1916_v20, 0.0  ;;  %v1355_v43 = vmax.f32 %v1081_v33, 0.0 }
 0x19d   : > { %2580 = vrot.lane.b32.xlu2 %v2250_v19, %s3903_s17  ;;  %2456 = vrot.lane.b32.xlu0 %v2188_v17, %s3903_s17  ;;  %v1760_v26 = vpop.f32.mrf.mxu1 }
 0x19e   : > { %v1761_v27 = vadd.f32 %v4136_v40, %v1760_v26  ;;  %3716 = vmatmul.msk.bf16.gmra.mxu3 %vm1522_vm3, %v1499_v23  ;;  %5758 = vst [vmem:[#allocation11_spill] sm:$0xff] %v4340_v29  ;;  %v2251_v41 = vpack.c.bf16 %v4340_v29, %v4340_v29 }
 0x19f   : > { %v1240_v31 = vpop.f32.mrf.mxu2 }
 0x1a0   : > { %v4343_v34 = vmax.f32 %v1761_v27, 0.0  ;;  %v1241_v53 = vadd.f32 %v4046_v32, %v1240_v31 }
 0x1a1   : > { %v1082_v35 = vpop.f32.mrf.mxu0  ;;  %v1918_v36 = vpop.f32.mrf.mxu3 }
 0x1a2   : > { %v2189_v37 = vpack.c.bf16 %v4343_v34, %v4343_v34  ;;  %v1083_v39 = vadd.f32 %v4046_v32, %v1082_v35  ;;  %v1919_v42 = vadd.f32 %v4136_v40, %v1918_v36  ;;  %v1419_v3 = vmax.f32 %v1241_v53, 0.0 }
 0x1a4   : > { %v1356_v46 = vmax.f32 %v1083_v39, 0.0  ;;  %2458 = vrot.lane.b32.xlu1 %v2189_v37, %s3903_s17  ;;  %v4355_v56 = vmax.f32 %v1919_v42, 0.0 }
 0x1a5   : > { %2582 = vrot.lane.b32.xlu0 %v2251_v41, %s3903_s17  ;;  %v1763_v50 = vpop.f32.mrf.mxu1 }
 0x1a6   : > { %v1468_v54 = vpack.c.bf16 %v1356_v46, %v1355_v43  ;;  %v1764_v55 = vadd.f32 %v4136_v40, %v1763_v50  ;;  %5759 = vst [vmem:[#allocation12_spill] sm:$0xff] %v4355_v56  ;;  %v2252_v12 = vpack.c.bf16 %v4355_v56, %v4355_v56 }
 0x1a7   : > { %v1242_v57 = vpop.f32.mrf.mxu2 }
 0x1a8   : > { %v4357_v59 = vmax.f32 %v1764_v55, 0.0  ;;  %v1243_v60 = vadd.f32 %v4046_v32, %v1242_v57  ;;  %3685 = vmatmul.msk.bf16.gmra.mxu1 %vm1522_vm3, %v1468_v54 }
 0x1a9   : > { %v1085_v0 = vpop.f32.mrf.mxu0  ;;  %v1920_v1 = vpop.f32.mrf.mxu3 }
 0x1aa   : > { %v2190_v6 = vpack.c.bf16 %v4357_v59, %v4357_v59  ;;  %v1420_v11 = vmax.f32 %v1243_v60, 0.0  ;;  %v1921_v13 = vadd.f32 %v4136_v40, %v1920_v1  ;;  %v1086_v20 = vadd.f32 %v4046_v32, %v1085_v0  ;;  %v3762_v60 = vld [vmem:[%s4004_s8 + $0xc8] sm:$0xff] }
 0x1ac   : > { %v1500_v14 = vpack.c.bf16 %v1420_v11, %v1419_v3  ;;  %3630 = vmatmul.msk.bf16.gmra.mxu0 %vm797_vm1, %v3761_v61  ;;  %3662 = vmatmul.msk.bf16.gmra.mxu2 %vm797_vm1, %v3793_v63  ;;  %v4381_v17 = vmax.f32 %v1921_v13, 0.0  ;;  %v1357_v37 = vmax.f32 %v1086_v20, 0.0  ;;  %v3794_v61 = vld [vmem:[%s4004_s8 + $0x1c8] sm:$0xff] }
 0x1ad   : > { %2460 = vrot.lane.b32.xlu2 %v2190_v6, %s3903_s17  ;;  %2584 = vrot.lane.b32.xlu1 %v2252_v12, %s3903_s17  ;;  %v1765_v15 = vpop.f32.mrf.mxu1 }
 0x1ae   : > { %v1766_v16 = vadd.f32 %v4136_v40, %v1765_v15  ;;  %3717 = vmatmul.msk.bf16.gmra.mxu3 %vm1522_vm3, %v1500_v14  ;;  %5760 = vst [vmem:[#allocation13_spill] sm:$0xff] %v4381_v17  ;;  %v2253_v35 = vpack.c.bf16 %v4381_v17, %v4381_v17 }
 0x1af   : > { %v2433_v18 = vpop.permute.xlu0 %2432  ;;  %v1245_v19 = vpop.f32.mrf.mxu2 }
 0x1b0   : > { %v4384_v23 = vmax.f32 %v1766_v16, 0.0  ;;  %2817 = vst.msk [vmem:[%s4377_s20] sm:$0xf] %vm2816_vm4, %v2433_v18  ;;  %v1246_v46 = vadd.f32 %v4046_v32, %v1245_v19 }
 0x1b1   : > { %v1087_v26 = vpop.f32.mrf.mxu0  ;;  %v1923_v27 = vpop.f32.mrf.mxu3 }
 0x1b2   : > { %v2191_v31 = vpack.c.bf16 %v4384_v23, %v4384_v23  ;;  %v1088_v33 = vadd.f32 %v4046_v32, %v1087_v26  ;;  %v1924_v36 = vadd.f32 %v4136_v40, %v1923_v27  ;;  %v1421_v6 = vmax.f32 %v1246_v46, 0.0 }
 0x1b4   : > { %v1358_v39 = vmax.f32 %v1088_v33, 0.0  ;;  %2462 = vrot.lane.b32.xlu0 %v2191_v31, %s3903_s17  ;;  %v4398_v50 = vmax.f32 %v1924_v36, 0.0 }
 0x1b5   : > { %2586 = vrot.lane.b32.xlu2 %v2253_v35, %s3903_s17  ;;  %v1768_v41 = vpop.f32.mrf.mxu1 }
 0x1b6   : > { %v1469_v42 = vpack.c.bf16 %v1358_v39, %v1357_v37  ;;  %v1769_v43 = vadd.f32 %v4136_v40, %v1768_v41  ;;  %5761 = vst [vmem:[#allocation14_spill] sm:$0xff] %v4398_v50  ;;  %v2254_v11 = vpack.c.bf16 %v4398_v50, %v4398_v50  ;;  %v4435_v37 = vld [vmem:[%s5670_s2] ss:$0 sm:$0xff] }
 0x1b7   : > { %v2441_v53 = vpop.permute.xlu2 %2440  ;;  %v2435_v54 = vpop.permute.xlu0 %2434 }
 0x1b8   : > { %v4400_v55 = vmax.f32 %v1769_v43, 0.0  ;;  %2821 = vst.msk [vmem:[%s4377_s20 + $0x10] sm:$0xf] %vm2816_vm4, %v2441_v53  ;;  %v1247_v57 = vpop.f32.mrf.mxu2  ;;  %3686 = vmatmul.msk.bf16.gmra.mxu1 %vm1522_vm3, %v1469_v42 }
 0x1b9   : > { %2818 = vst.msk [vmem:[%s4377_s20 + $0x4] sm:$0xf] %vm2816_vm4, %v2435_v54  ;;  %v1248_v63 = vadd.f32 %v4046_v32, %v1247_v57  ;;  %v1090_v0 = vpop.f32.mrf.mxu0  ;;  %v1925_v1 = vpop.f32.mrf.mxu3 }
 0x1ba   : > { %v2192_v3 = vpack.c.bf16 %v4400_v55, %v4400_v55  ;;  %v1926_v13 = vadd.f32 %v4136_v40, %v1925_v1  ;;  %v1091_v26 = vadd.f32 %v4046_v32, %v1090_v0 }
 0x1bb   : > { %v1422_v12 = vmax.f32 %v1248_v63, 0.0 }
 0x1bc   : > { %3631 = vmatmul.msk.bf16.gmra.mxu0 %vm797_vm1, %v3762_v60  ;;  %3663 = vmatmul.msk.bf16.gmra.mxu2 %vm797_vm1, %v3794_v61  ;;  %v4420_v18 = vmax.f32 %v1926_v13, 0.0  ;;  %v1359_v42 = vmax.f32 %v1091_v26, 0.0 }
 0x1bd   : > { %v1501_v14 = vpack.c.bf16 %v1422_v12, %v1421_v6  ;;  %2464 = vrot.lane.b32.xlu1 %v2192_v3, %s3903_s17  ;;  %2588 = vrot.lane.b32.xlu0 %v2254_v11, %s3903_s17  ;;  %v1770_v15 = vpop.f32.mrf.mxu1  ;;  %v3763_v3 = vld [vmem:[%s4004_s8 + $0xd0] sm:$0xff] }
 0x1be   : > { %v1771_v16 = vadd.f32 %v4136_v40, %v1770_v15  ;;  %5762 = vst [vmem:[#allocation15_spill] sm:$0xff] %v4420_v18  ;;  %v2255_v39 = vpack.c.bf16 %v4420_v18, %v4420_v18  ;;  %v3795_v6 = vld [vmem:[%s4004_s8 + $0x1d0] sm:$0xff] }
 0x1bf   : > { %3718 = vmatmul.msk.bf16.gmra.mxu3 %vm1522_vm3, %v1501_v14  ;;  %v2443_v19 = vpop.permute.xlu2 %2442  ;;  %v2437_v20 = vpop.permute.xlu1 %2436 }
 0x1c0   : > { %v4424_v27 = vmax.f32 %v1771_v16, 0.0  ;;  %2822 = vst.msk [vmem:[%s4377_s20 + $0x14] sm:$0xf] %vm2816_vm4, %v2443_v19  ;;  %v1250_v31 = vpop.f32.mrf.mxu2 }
 0x1c1   : > { %2819 = vst.msk [vmem:[%s4377_s20 + $0x8] sm:$0xf] %vm2816_vm4, %v2437_v20  ;;  %v1092_v33 = vpop.f32.mrf.mxu0  ;;  %v1928_v35 = vpop.f32.mrf.mxu3  ;;  %v1251_v57 = vadd.f32 %v4435_v37, %v1250_v31 }
 0x1c2   : > { %v2193_v36 = vpack.c.bf16 %v4424_v27, %v4424_v27  ;;  %v1093_v32 = vadd.f32 %v4435_v37, %v1092_v33  ;;  %v1929_v41 = vadd.f32 %v4136_v40, %v1928_v35 }
 0x1c3   : > { %v1423_v16 = vmax.f32 %v1251_v57, 0.0 }
 0x1c4   : > { %v1360_v43 = vmax.f32 %v1093_v32, 0.0  ;;  %2466 = vrot.lane.b32.xlu2 %v2193_v36, %s3903_s17  ;;  %v4445_v60 = vmax.f32 %v1929_v41, 0.0 }
 0x1c5   : > { %2590 = vrot.lane.b32.xlu1 %v2255_v39, %s3903_s17  ;;  %v1773_v46 = vpop.f32.mrf.mxu1 }
 0x1c6   : > { %v1470_v53 = vpack.c.bf16 %v1360_v43, %v1359_v42  ;;  %v1774_v54 = vadd.f32 %v4136_v40, %v1773_v46  ;;  %5763 = vst [vmem:[#allocation16_spill] sm:$0xff] %v4445_v60  ;;  %v2256_v19 = vpack.c.bf16 %v4445_v60, %v4445_v60 }
 0x1c7   : > { %v2569_v61 = vpop.permute.xlu2 %2568  ;;  %v2439_v63 = vpop.permute.xlu1 %2438 }
 0x1c8   : > { %v4447_v0 = vmax.f32 %v1774_v54, 0.0  ;;  %2885 = vst.msk [vmem:[%s4377_s20 + $0x110] sm:$0xf] %vm2816_vm4, %v2569_v61  ;;  %v1252_v1 = vpop.f32.mrf.mxu2  ;;  %3687 = vmatmul.msk.bf16.gmra.mxu1 %vm1522_vm3, %v1470_v53 }
 0x1c9   : > { %2820 = vst.msk [vmem:[%s4377_s20 + $0xc] sm:$0xf] %vm2816_vm4, %v2439_v63  ;;  %v1253_v11 = vadd.f32 %v4435_v37, %v1252_v1  ;;  %v1095_v12 = vpop.f32.mrf.mxu0  ;;  %v1930_v13 = vpop.f32.mrf.mxu3 }
 0x1ca   : > { %v2194_v14 = vpack.c.bf16 %v4447_v0, %v4447_v0  ;;  %v2565_v15 = vpop.permute.xlu0 %2564  ;;  %v1931_v26 = vadd.f32 %v4136_v40, %v1930_v13  ;;  %v1096_v32 = vadd.f32 %v4435_v37, %v1095_v12 }
 0x1cb   : > { %v1424_v20 = vmax.f32 %v1253_v11, 0.0  ;;  %2883 = vst.msk [vmem:[%s4377_s20 + $0x108] sm:$0xf] %vm2816_vm4, %v2565_v15 }
 0x1cc   : > { %3632 = vmatmul.msk.bf16.gmra.mxu0 %vm797_vm1, %v3763_v3  ;;  %3664 = vmatmul.msk.bf16.gmra.mxu2 %vm797_vm1, %v3795_v6  ;;  %v4469_v36 = vmax.f32 %v1931_v26, 0.0  ;;  %v1361_v63 = vmax.f32 %v1096_v32, 0.0 }
 0x1cd   : > { %v1502_v31 = vpack.c.bf16 %v1424_v20, %v1423_v16  ;;  %2592 = vrot.lane.b32.xlu2 %v2256_v19, %s3903_s17  ;;  %2468 = vrot.lane.b32.xlu0 %v2194_v14, %s3903_s17  ;;  %v1775_v33 = vpop.f32.mrf.mxu1  ;;  %v3764_v19 = vld [vmem:[%s4004_s8 + $0xd8] sm:$0xff] }
 0x1ce   : > { %v1776_v35 = vadd.f32 %v4136_v40, %v1775_v33  ;;  %5764 = vst [vmem:[#allocation17_spill] sm:$0xff] %v4469_v36  ;;  %v2257_v57 = vpack.c.bf16 %v4469_v36, %v4469_v36  ;;  %v3796_v20 = vld [vmem:[%s4004_s8 + $0x1d8] sm:$0xff] }
 0x1cf   : > { %3719 = vmatmul.msk.bf16.gmra.mxu3 %vm1522_vm3, %v1502_v31 }
 0x1d0   : > { %v4473_v39 = vmax.f32 %v1776_v35, 0.0  ;;  %v1255_v41 = vpop.f32.mrf.mxu2 }
 0x1d1   : > { %v1097_v42 = vpop.f32.mrf.mxu0  ;;  %v1933_v43 = vpop.f32.mrf.mxu3  ;;  %v1256_v12 = vadd.f32 %v4435_v37, %v1255_v41 }
 0x1d2   : > { %v2195_v46 = vpack.c.bf16 %v4473_v39, %v4473_v39  ;;  %v1098_v53 = vadd.f32 %v4435_v37, %v1097_v42  ;;  %v2567_v54 = vpop.permute.xlu1 %2566  ;;  %v1934_v61 = vadd.f32 %v4136_v40, %v1933_v43 }
 0x1d3   : > { %2884 = vst.msk [vmem:[%s4377_s20 + $0x10c] sm:$0xf] %vm2816_vm4, %v2567_v54  ;;  %v1425_v32 = vmax.f32 %v1256_v12, 0.0 }
 0x1d4   : > { %v1362_v1 = vmax.f32 %v1098_v53, 0.0  ;;  %2470 = vrot.lane.b32.xlu1 %v2195_v46, %s3903_s17  ;;  %v4487_v13 = vmax.f32 %v1934_v61, 0.0 }
 0x1d5   : > { %2594 = vrot.lane.b32.xlu0 %v2257_v57, %s3903_s17  ;;  %v1778_v3 = vpop.f32.mrf.mxu1 }
 0x1d6   : > { %v1471_v6 = vpack.c.bf16 %v1362_v1, %v1361_v63  ;;  %v1779_v11 = vadd.f32 %v4136_v40, %v1778_v3  ;;  %5765 = vst [vmem:[#allocation18_spill] sm:$0xff] %v4487_v13  ;;  %v2258_v41 = vpack.c.bf16 %v4487_v13, %v4487_v13 }
 0x1d7   : > { %v2449_v14 = vpop.permute.xlu2 %2448 }
 0x1d8   : > { %v4489_v15 = vmax.f32 %v1779_v11, 0.0  ;;  %2825 = vst.msk [vmem:[%s4377_s20 + $0x20] sm:$0xf] %vm2816_vm4, %v2449_v14  ;;  %v1257_v16 = vpop.f32.mrf.mxu2  ;;  %3688 = vmatmul.msk.bf16.gmra.mxu1 %vm1522_vm3, %v1471_v6 }
 0x1d9   : > { %v1258_v26 = vadd.f32 %v4435_v37, %v1257_v16  ;;  %v1100_v31 = vpop.f32.mrf.mxu0  ;;  %v1935_v33 = vpop.f32.mrf.mxu3 }
 0x1da   : > { %v2196_v35 = vpack.c.bf16 %v4489_v15, %v4489_v15  ;;  %v1936_v43 = vadd.f32 %v4136_v40, %v1935_v33  ;;  %v1101_v1 = vadd.f32 %v4435_v37, %v1100_v31 }
 0x1db   : > { %v1426_v42 = vmax.f32 %v1258_v26, 0.0 }
 0x1dc   : > { %3633 = vmatmul.msk.bf16.gmra.mxu0 %vm797_vm1, %v3764_v19  ;;  %3665 = vmatmul.msk.bf16.gmra.mxu2 %vm797_vm1, %v3796_v20  ;;  %v4507_v57 = vmax.f32 %v1936_v43, 0.0  ;;  %v1363_v26 = vmax.f32 %v1101_v1, 0.0 }
 0x1dd   : > { %v1503_v46 = vpack.c.bf16 %v1426_v42, %v1425_v32  ;;  %2472 = vrot.lane.b32.xlu2 %v2196_v35, %s3903_s17  ;;  %2596 = vrot.lane.b32.xlu1 %v2258_v41, %s3903_s17  ;;  %v1780_v53 = vpop.f32.mrf.mxu1 }
 0x1de   : > { %v1781_v54 = vadd.f32 %v4136_v40, %v1780_v53  ;;  %5766 = vst [vmem:[#allocation19_spill] sm:$0xff] %v4507_v57  ;;  %v2259_v19 = vpack.c.bf16 %v4507_v57, %v4507_v57 }
 0x1df   : > { %3720 = vmatmul.msk.bf16.gmra.mxu3 %vm1522_vm3, %v1503_v46  ;;  %v2575_v61 = vpop.permute.xlu2 %2574  ;;  %v2445_v63 = vpop.permute.xlu0 %2444 }
 0x1e0   : > { %v4511_v3 = vmax.f32 %v1781_v54, 0.0  ;;  %2888 = vst.msk [vmem:[%s4377_s20 + $0x11c] sm:$0xf] %vm2816_vm4, %v2575_v61  ;;  %v1260_v6 = vpop.f32.mrf.mxu2  ;;  %v3765_v61 = vld [vmem:[%s4004_s8 + $0xe0] sm:$0xff] }
 0x1e1   : > { %2823 = vst.msk [vmem:[%s4377_s20 + $0x18] sm:$0xf] %vm2816_vm4, %v2445_v63  ;;  %v1102_v11 = vpop.f32.mrf.mxu0  ;;  %v1938_v12 = vpop.f32.mrf.mxu3  ;;  %v1261_v42 = vadd.f32 %v4435_v37, %v1260_v6  ;;  %v3797_v63 = vld [vmem:[%s4004_s8 + $0x1e0] sm:$0xff] }
 0x1e2   : > { %v2197_v14 = vpack.c.bf16 %v4511_v3, %v4511_v3  ;;  %v1103_v16 = vadd.f32 %v4435_v37, %v1102_v11  ;;  %v1939_v20 = vadd.f32 %v4136_v40, %v1938_v12 }
 0x1e4   : > { %v1364_v31 = vmax.f32 %v1103_v16, 0.0  ;;  %2474 = vrot.lane.b32.xlu0 %v2197_v14, %s3903_s17  ;;  %v4527_v43 = vmax.f32 %v1939_v20, 0.0  ;;  %v1427_v14 = vmax.f32 %v1261_v42, 0.0 }
 0x1e5   : > { %2598 = vrot.lane.b32.xlu2 %v2259_v19, %s3903_s17  ;;  %v1783_v33 = vpop.f32.mrf.mxu1 }
 0x1e6   : > { %v1472_v35 = vpack.c.bf16 %v1364_v31, %v1363_v26  ;;  %v1784_v32 = vadd.f32 %v4136_v40, %v1783_v33  ;;  %v2447_v41 = vpop.permute.xlu1 %2446  ;;  %5767 = vst [vmem:[#allocation20_spill] sm:$0xff] %v4527_v43  ;;  %v2260_v16 = vpack.c.bf16 %v4527_v43, %v4527_v43 }
 0x1e7   : > { %2824 = vst.msk [vmem:[%s4377_s20 + $0x1c] sm:$0xf] %vm2816_vm4, %v2447_v41  ;;  %v2571_v46 = vpop.permute.xlu0 %2570 }
 0x1e8   : > { %v4531_v53 = vmax.f32 %v1784_v32, 0.0  ;;  %2886 = vst.msk [vmem:[%s4377_s20 + $0x114] sm:$0xf] %vm2816_vm4, %v2571_v46  ;;  %v1262_v54 = vpop.f32.mrf.mxu2  ;;  %3689 = vmatmul.msk.bf16.gmra.mxu1 %vm1522_vm3, %v1472_v35 }
 0x1e9   : > { %v1263_v1 = vadd.f32 %v4435_v37, %v1262_v54  ;;  %v1105_v11 = vpop.f32.mrf.mxu0  ;;  %v1940_v12 = vpop.f32.mrf.mxu3 }
 0x1ea   : > { %v2198_v6 = vpack.c.bf16 %v4531_v53, %v4531_v53  ;;  %v1941_v20 = vadd.f32 %v4136_v40, %v1940_v12  ;;  %v1106_v42 = vadd.f32 %v4435_v37, %v1105_v11 }
 0x1eb   : > { %v1428_v19 = vmax.f32 %v1263_v1, 0.0 }
 0x1ec   : > { %3634 = vmatmul.msk.bf16.gmra.mxu0 %vm797_vm1, %v3765_v61  ;;  %3666 = vmatmul.msk.bf16.gmra.mxu2 %vm797_vm1, %v3797_v63  ;;  %v4549_v32 = vmax.f32 %v1941_v20, 0.0  ;;  %v1365_v11 = vmax.f32 %v1106_v42, 0.0 }
 0x1ed   : > { %v1504_v26 = vpack.c.bf16 %v1428_v19, %v1427_v14  ;;  %2476 = vrot.lane.b32.xlu1 %v2198_v6, %s3903_s17  ;;  %2600 = vrot.lane.b32.xlu0 %v2260_v16, %s3903_s17  ;;  %v1785_v31 = vpop.f32.mrf.mxu1 }
 0x1ee   : > { %v1786_v33 = vadd.f32 %v4136_v40, %v1785_v31  ;;  %v2455_v35 = vpop.permute.xlu2 %2454  ;;  %5768 = vst [vmem:[#allocation21_spill] sm:$0xff] %v4549_v32  ;;  %v2261_v6 = vpack.c.bf16 %v4549_v32, %v4549_v32 }
 0x1ef   : > { %3721 = vmatmul.msk.bf16.gmra.mxu3 %vm1522_vm3, %v1504_v26  ;;  %2828 = vst.msk [vmem:[%s4377_s20 + $0x2c] sm:$0xf] %vm2816_vm4, %v2455_v35  ;;  %v2573_v41 = vpop.permute.xlu1 %2572 }
 0x1f0   : > { %v4555_v46 = vmax.f32 %v1786_v33, 0.0  ;;  %2887 = vst.msk [vmem:[%s4377_s20 + $0x118] sm:$0xf] %vm2816_vm4, %v2573_v41  ;;  %v1265_v54 = vpop.f32.mrf.mxu2 }
 0x1f1   : > { %v1107_v61 = vpop.f32.mrf.mxu0  ;;  %v1943_v63 = vpop.f32.mrf.mxu3  ;;  %v1266_v33 = vadd.f32 %v4435_v37, %v1265_v54 }
 0x1f2   : > { %v2199_v1 = vpack.c.bf16 %v4555_v46, %v4555_v46  ;;  %v1108_v12 = vadd.f32 %v4435_v37, %v1107_v61  ;;  %v1944_v14 = vadd.f32 %v4136_v40, %v1943_v63  ;;  %v3766_v63 = vld [vmem:[%s4004_s8 + $0xe8] sm:$0xff] }
 0x1f4   : > { %v1366_v16 = vmax.f32 %v1108_v12, 0.0  ;;  %2478 = vrot.lane.b32.xlu2 %v2199_v1, %s3903_s17  ;;  %v4569_v35 = vmax.f32 %v1944_v14, 0.0  ;;  %v3798_v1 = vld [vmem:[%s4004_s8 + $0x1e8] sm:$0xff]  ;;  %v1429_v14 = vmax.f32 %v1266_v33, 0.0 }
 0x1f5   : > { %2602 = vrot.lane.b32.xlu1 %v2261_v6, %s3903_s17  ;;  %v1788_v19 = vpop.f32.mrf.mxu1 }
 0x1f6   : > { %v1473_v20 = vpack.c.bf16 %v1366_v16, %v1365_v11  ;;  %v1789_v26 = vadd.f32 %v4136_v40, %v1788_v19  ;;  %v2451_v31 = vpop.permute.xlu0 %2450  ;;  %5769 = vst [vmem:[#allocation22_spill] sm:$0xff] %v4569_v35  ;;  %v2262_v11 = vpack.c.bf16 %v4569_v35, %v4569_v35  ;;  %v4588_v19 = vld [vmem:[%s5672_s4] ss:$0 sm:$0xff] }
 0x1f7   : > { %v2581_v41 = vpop.permute.xlu2 %2580  ;;  %2826 = vst.msk [vmem:[%s4377_s20 + $0x24] sm:$0xf] %vm2816_vm4, %v2451_v31 }
 0x1f8   : > { %v4573_v42 = vmax.f32 %v1789_v26, 0.0  ;;  %2891 = vst.msk [vmem:[%s4377_s20 + $0x128] sm:$0xf] %vm2816_vm4, %v2581_v41  ;;  %v1267_v61 = vpop.f32.mrf.mxu2  ;;  %3690 = vmatmul.msk.bf16.gmra.mxu1 %vm1522_vm3, %v1473_v20 }
 0x1f9   : > { %v1268_v12 = vadd.f32 %v4435_v37, %v1267_v61  ;;  %v1110_v40 = vpop.f32.mrf.mxu0  ;;  %v1945_v6 = vpop.f32.mrf.mxu3 }
 0x1fa   : > { %v2200_v54 = vpack.c.bf16 %v4573_v42, %v4573_v42  ;;  %v1946_v20 = vadd.f32 %v4588_v19, %v1945_v6  ;;  %v1111_v6 = vadd.f32 %v4435_v37, %v1110_v40 }
 0x1fb   : > { %v1430_v16 = vmax.f32 %v1268_v12, 0.0 }
 0x1fc   : > { %3635 = vmatmul.msk.bf16.gmra.mxu0 %vm797_vm1, %v3766_v63  ;;  %3667 = vmatmul.msk.bf16.gmra.mxu2 %vm797_vm1, %v3798_v1  ;;  %v4596_v41 = vmax.f32 %v1946_v20, 0.0  ;;  %v1367_v20 = vmax.f32 %v1111_v6, 0.0 }
 0x1fd   : > { %v1505_v26 = vpack.c.bf16 %v1430_v16, %v1429_v14  ;;  %2604 = vrot.lane.b32.xlu2 %v2262_v11, %s3903_s17  ;;  %2480 = vrot.lane.b32.xlu0 %v2200_v54, %s3903_s17  ;;  %v1790_v31 = vpop.f32.mrf.mxu1 }
 0x1fe   : > { %v1791_v33 = vadd.f32 %v4588_v19, %v1790_v31  ;;  %5770 = vst [vmem:[#allocation23_spill] sm:$0xff] %v4596_v41  ;;  %v2263_v16 = vpack.c.bf16 %v4596_v41, %v4596_v41 }
 0x1ff   : > { %3722 = vmatmul.msk.bf16.gmra.mxu3 %vm1522_vm3, %v1505_v26  ;;  %v2453_v61 = vpop.permute.xlu1 %2452  ;;  %v2577_v12 = vpop.permute.xlu0 %2576 }
 0x200   : > { %v4600_v35 = vmax.f32 %v1791_v33, 0.0  ;;  %2827 = vst.msk [vmem:[%s4377_s20 + $0x28] sm:$0xf] %vm2816_vm4, %v2453_v61  ;;  %v1270_v63 = vpop.f32.mrf.mxu2 }
 0x201   : > { %2889 = vst.msk [vmem:[%s4377_s20 + $0x120] sm:$0xf] %vm2816_vm4, %v2577_v12  ;;  %v1112_v1 = vpop.f32.mrf.mxu0  ;;  %v1948_v54 = vpop.f32.mrf.mxu3  ;;  %v1271_v12 = vadd.f32 %v4435_v37, %v1270_v63 }
 0x202   : > { %v2201_v14 = vpack.c.bf16 %v4600_v35, %v4600_v35  ;;  %v1113_v11 = vadd.f32 %v4435_v37, %v1112_v1  ;;  %v1949_v40 = vadd.f32 %v4588_v19, %v1948_v54 }
 0x204   : > { %v1368_v26 = vmax.f32 %v1113_v11, 0.0  ;;  %2482 = vrot.lane.b32.xlu1 %v2201_v14, %s3903_s17  ;;  %v4616_v1 = vmax.f32 %v1949_v40, 0.0  ;;  %v3767_v14 = vld [vmem:[%s4004_s8 + $0xf0] sm:$0xff]  ;;  %v1431_v40 = vmax.f32 %v1271_v12, 0.0 }
 0x205   : > { %2606 = vrot.lane.b32.xlu0 %v2263_v16, %s3903_s17  ;;  %v1793_v31 = vpop.f32.mrf.mxu1  ;;  %v3799_v11 = vld [vmem:[%s4004_s8 + $0x1f0] sm:$0xff] }
 0x206   : > { %v1474_v33 = vpack.c.bf16 %v1368_v26, %v1367_v20  ;;  %v1794_v61 = vadd.f32 %v4588_v19, %v1793_v31  ;;  %5771 = vst [vmem:[#allocation24_spill] sm:$0xff] %v4616_v1  ;;  %v2264_v31 = vpack.c.bf16 %v4616_v1, %v4616_v1 }
 0x207   : > { %v2461_v41 = vpop.permute.xlu2 %2460  ;;  %v2579_v32 = vpop.permute.xlu1 %2578 }
 0x208   : > { %v4618_v54 = vmax.f32 %v1794_v61, 0.0  ;;  %2831 = vst.msk [vmem:[%s4377_s20 + $0x38] sm:$0xf] %vm2816_vm4, %v2461_v41  ;;  %v1272_v6 = vpop.f32.mrf.mxu2  ;;  %3691 = vmatmul.msk.bf16.gmra.mxu1 %vm1522_vm3, %v1474_v33 }
 0x209   : > { %2890 = vst.msk [vmem:[%s4377_s20 + $0x124] sm:$0xf] %vm2816_vm4, %v2579_v32  ;;  %v1273_v16 = vadd.f32 %v4435_v37, %v1272_v6  ;;  %v1115_v20 = vpop.f32.mrf.mxu0  ;;  %v1950_v26 = vpop.f32.mrf.mxu3 }
 0x20a   : > { %v2202_v63 = vpack.c.bf16 %v4618_v54, %v4618_v54  ;;  %v1951_v61 = vadd.f32 %v4588_v19, %v1950_v26  ;;  %v1116_v26 = vadd.f32 %v4435_v37, %v1115_v20 }
 0x20b   : > { %v1432_v41 = vmax.f32 %v1273_v16, 0.0 }
 0x20c   : > { %3636 = vmatmul.msk.bf16.gmra.mxu0 %vm797_vm1, %v3767_v14  ;;  %3668 = vmatmul.msk.bf16.gmra.mxu2 %vm797_vm1, %v3799_v11  ;;  %v4638_v6 = vmax.f32 %v1951_v61, 0.0  ;;  %v1369_v61 = vmax.f32 %v1116_v26, 0.0 }
 0x20d   : > { %v1506_v32 = vpack.c.bf16 %v1432_v41, %v1431_v40  ;;  %2484 = vrot.lane.b32.xlu2 %v2202_v63, %s3903_s17  ;;  %2608 = vrot.lane.b32.xlu1 %v2264_v31, %s3903_s17  ;;  %v1795_v33 = vpop.f32.mrf.mxu1 }
 0x20e   : > { %v1796_v12 = vadd.f32 %v4588_v19, %v1795_v33  ;;  %5772 = vst [vmem:[#allocation25_spill] sm:$0xff] %v4638_v6  ;;  %v2265_v41 = vpack.c.bf16 %v4638_v6, %v4638_v6 }
 0x20f   : > { %3723 = vmatmul.msk.bf16.gmra.mxu3 %vm1522_vm3, %v1506_v32  ;;  %v2587_v16 = vpop.permute.xlu2 %2586  ;;  %v2457_v1 = vpop.permute.xlu0 %2456 }
 0x210   : > { %v4642_v43 = vmax.f32 %v1796_v12, 0.0  ;;  %2894 = vst.msk [vmem:[%s4377_s20 + $0x134] sm:$0xf] %vm2816_vm4, %v2587_v16  ;;  %v1275_v14 = vpop.f32.mrf.mxu2 }
 0x211   : > { %2829 = vst.msk [vmem:[%s4377_s20 + $0x30] sm:$0xf] %vm2816_vm4, %v2457_v1  ;;  %v1117_v11 = vpop.f32.mrf.mxu0  ;;  %v1953_v63 = vpop.f32.mrf.mxu3 }
 0x212   : > { %v2203_v40 = vpack.c.bf16 %v4642_v43, %v4642_v43  ;;  %v1118_v31 = vadd.f32 %v4435_v37, %v1117_v11  ;;  %v1954_v20 = vadd.f32 %v4588_v19, %v1953_v63  ;;  %v1276_v11 = vadd.f32 %v4435_v37, %v1275_v14 }
 0x214   : > { %v1370_v32 = vmax.f32 %v1118_v31, 0.0  ;;  %2486 = vrot.lane.b32.xlu0 %v2203_v40, %s3903_s17  ;;  %v4658_v57 = vmax.f32 %v1954_v20, 0.0  ;;  %v3768_v40 = vld [vmem:[%s4004_s8 + $0xf8] sm:$0xff]  ;;  %v1433_v20 = vmax.f32 %v1276_v11, 0.0 }
 0x215   : > { %2610 = vrot.lane.b32.xlu2 %v2265_v41, %s3903_s17  ;;  %v1798_v1 = vpop.f32.mrf.mxu1  ;;  %v3800_v41 = vld [vmem:[%s4004_s8 + $0x1f8] sm:$0xff] }
 0x216   : > { %v1475_v33 = vpack.c.bf16 %v1370_v32, %v1369_v61  ;;  %v1799_v12 = vadd.f32 %v4588_v19, %v1798_v1  ;;  %v2459_v16 = vpop.permute.xlu1 %2458  ;;  %5773 = vst [vmem:[#allocation26_spill] sm:$0xff] %v4658_v57 }
 0x217   : > { %2830 = vst.msk [vmem:[%s4377_s20 + $0x34] sm:$0xf] %vm2816_vm4, %v2459_v16  ;;  %v2583_v63 = vpop.permute.xlu0 %2582 }
 0x218   : > { %v4662_v26 = vmax.f32 %v1799_v12, 0.0  ;;  %2892 = vst.msk [vmem:[%s4377_s20 + $0x12c] sm:$0xf] %vm2816_vm4, %v2583_v63  ;;  %v1277_v31 = vpop.f32.mrf.mxu2  ;;  %3692 = vmatmul.msk.bf16.gmra.mxu1 %vm1522_vm3, %v1475_v33  ;;  %v2266_v12 = vpack.c.bf16 %v4658_v57, %v4658_v57 }
 0x219   : > { %v1278_v61 = vadd.f32 %v4435_v37, %v1277_v31  ;;  %v1120_v32 = vpop.f32.mrf.mxu0  ;;  %v1955_v1 = vpop.f32.mrf.mxu3 }
 0x21a   : > { %v2204_v14 = vpack.c.bf16 %v4662_v26, %v4662_v26  ;;  %v1956_v63 = vadd.f32 %v4588_v19, %v1955_v1 }
 0x21b   : > { %v1434_v16 = vmax.f32 %v1278_v61, 0.0 }
 0x21c   : > { %3637 = vmatmul.msk.bf16.gmra.mxu0 %vm797_vm1, %v3768_v40  ;;  %3669 = vmatmul.msk.bf16.gmra.mxu2 %vm797_vm1, %v3800_v41  ;;  %v4680_v13 = vmax.f32 %v1956_v63, 0.0  ;;  %v1121_v40 = vadd.f32 %v4435_v37, %v1120_v32 }
 0x21d   : > { %v1507_v33 = vpack.c.bf16 %v1434_v16, %v1433_v20  ;;  %2488 = vrot.lane.b32.xlu1 %v2204_v14, %s3903_s17  ;;  %2612 = vrot.lane.b32.xlu0 %v2266_v12, %s3903_s17  ;;  %v1800_v31 = vpop.f32.mrf.mxu1 }
 0x21e   : > { %v1801_v6 = vadd.f32 %v4588_v19, %v1800_v31  ;;  %v2467_v11 = vpop.permute.xlu2 %2466  ;;  %5774 = vst [vmem:[#allocation27_spill] sm:$0xff] %v4680_v13  ;;  %v1371_v32 = vmax.f32 %v1121_v40, 0.0 }
 0x21f   : > { %3724 = vmatmul.msk.bf16.gmra.mxu3 %vm1522_vm3, %v1507_v33  ;;  %2834 = vst.msk [vmem:[%s4377_s20 + $0x44] sm:$0xf] %vm2816_vm4, %v2467_v11  ;;  %v2585_v61 = vpop.permute.xlu1 %2584  ;;  %v2267_v33 = vpack.c.bf16 %v4680_v13, %v4680_v13 }
 0x220   : > { %v4686_v1 = vmax.f32 %v1801_v6, 0.0  ;;  %2893 = vst.msk [vmem:[%s4377_s20 + $0x130] sm:$0xf] %vm2816_vm4, %v2585_v61  ;;  %v1280_v41 = vpop.f32.mrf.mxu2 }
 0x221   : > { %v1122_v14 = vpop.f32.mrf.mxu0  ;;  %v1958_v20 = vpop.f32.mrf.mxu3 }
 0x222   : > { %v2205_v12 = vpack.c.bf16 %v4686_v1, %v4686_v1  ;;  %v1123_v16 = vadd.f32 %v4435_v37, %v1122_v14  ;;  %v1959_v63 = vadd.f32 %v4588_v19, %v1958_v20  ;;  %v1281_v14 = vadd.f32 %v4435_v37, %v1280_v41 }
 0x224   : > { %v1372_v6 = vmax.f32 %v1123_v16, 0.0  ;;  %2490 = vrot.lane.b32.xlu2 %v2205_v12, %s3903_s17  ;;  %v4698_v61 = vmax.f32 %v1959_v63, 0.0 }
 0x225   : > { %2614 = vrot.lane.b32.xlu1 %v2267_v33, %s3903_s17  ;;  %v1803_v31 = vpop.f32.mrf.mxu1 }
 0x226   : > { %v1476_v11 = vpack.c.bf16 %v1372_v6, %v1371_v32  ;;  %5775 = vst [vmem:[#allocation28_spill] sm:$0xff] %v4698_v61  ;;  %v1804_v57 = vadd.f32 %v4588_v19, %v1803_v31  ;;  %v2463_v36 = vpop.permute.xlu0 %2462  ;;  %v2268_v33 = vpack.c.bf16 %v4698_v61, %v4698_v61 }
 0x227   : > { %v2593_v60 = vpop.permute.xlu2 %2592  ;;  %2832 = vst.msk [vmem:[%s4377_s20 + $0x3c] sm:$0xf] %vm2816_vm4, %v2463_v36 }
 0x228   : > { %v4704_v20 = vmax.f32 %v1804_v57, 0.0  ;;  %2897 = vst.msk [vmem:[%s4377_s20 + $0x140] sm:$0xf] %vm2816_vm4, %v2593_v60  ;;  %v1282_v40 = vpop.f32.mrf.mxu2  ;;  %3693 = vmatmul.msk.bf16.gmra.mxu1 %vm1522_vm3, %v1476_v11  ;;  %v1435_v57 = vmax.f32 %v1281_v14, 0.0 }
 0x229   : > { %v1283_v12 = vadd.f32 %v4435_v37, %v1282_v40  ;;  %v1125_v16 = vpop.f32.mrf.mxu0  ;;  %v1960_v63 = vpop.f32.mrf.mxu3 }
 0x22a   : > { %v2206_v41 = vpack.c.bf16 %v4704_v20, %v4704_v20  ;;  %v1961_v36 = vadd.f32 %v4588_v19, %v1960_v63  ;;  %v1126_v13 = vadd.f32 %v4435_v37, %v1125_v16 }
 0x22b   : > { %v1436_v32 = vmax.f32 %v1283_v12, 0.0 }
 0x22c   : > { %2616 = vrot.lane.b32.xlu2 %v2268_v33, %s3903_s17  ;;  %2492 = vrot.lane.b32.xlu0 %v2206_v41, %s3903_s17  ;;  %v4717_v31 = vmax.f32 %v1961_v36, 0.0 }
 0x22d   : > { %v1508_v60 = vpack.c.bf16 %v1436_v32, %v1435_v57  ;;  %v1805_v6 = vpop.f32.mrf.mxu1  ;;  %v1373_v32 = vmax.f32 %v1126_v13, 0.0 }
 0x22e   : > { %5776 = vst [vmem:[#allocation29_spill] sm:$0xff] %v4717_v31  ;;  %v1806_v11 = vadd.f32 %v4588_v19, %v1805_v6  ;;  %v2269_v41 = vpack.c.bf16 %v4717_v31, %v4717_v31 }
 0x22f   : > { %3725 = vmatmul.msk.bf16.gmra.mxu3 %vm1522_vm3, %v1508_v60  ;;  %v2465_v40 = vpop.permute.xlu1 %2464  ;;  %v2589_v61 = vpop.permute.xlu0 %2588 }
 0x230   : > { %v4722_v63 = vmax.f32 %v1806_v11, 0.0  ;;  %2833 = vst.msk [vmem:[%s4377_s20 + $0x40] sm:$0xf] %vm2816_vm4, %v2465_v40  ;;  %v1285_v14 = vpop.f32.mrf.mxu2 }
 0x231   : > { %2895 = vst.msk [vmem:[%s4377_s20 + $0x138] sm:$0xf] %vm2816_vm4, %v2589_v61  ;;  %v1127_v12 = vpop.f32.mrf.mxu0  ;;  %v1963_v33 = vpop.f32.mrf.mxu3  ;;  %v1286_v31 = vadd.f32 %v4435_v37, %v1285_v14 }
 0x232   : > { %v2207_v36 = vpack.c.bf16 %v4722_v63, %v4722_v63  ;;  %v1128_v57 = vadd.f32 %v4435_v37, %v1127_v12  ;;  %v1964_v16 = vadd.f32 %v4588_v19, %v1963_v33 }
 0x234   : > { %v1374_v60 = vmax.f32 %v1128_v57, 0.0  ;;  %2494 = vrot.lane.b32.xlu1 %v2207_v36, %s3903_s17  ;;  %2618 = vrot.lane.b32.xlu0 %v2269_v41, %s3903_s17  ;;  %v4736_v11 = vmax.f32 %v1964_v16, 0.0 }
 0x235   : > { %v1808_v61 = vpop.f32.mrf.mxu1 }
 0x236   : > { %v1477_v6 = vpack.c.bf16 %v1374_v60, %v1373_v32  ;;  %5777 = vst [vmem:[#allocation30_spill] sm:$0xff] %v4736_v11  ;;  %v1809_v40 = vadd.f32 %v4588_v19, %v1808_v61  ;;  %v2270_v57 = vpack.c.bf16 %v4736_v11, %v4736_v11 }
 0x237   : > { %v2473_v18 = vpop.permute.xlu2 %2472  ;;  %v2591_v50 = vpop.permute.xlu1 %2590 }
 0x238   : > { %v4740_v12 = vmax.f32 %v1809_v40, 0.0  ;;  %2837 = vst.msk [vmem:[%s4377_s20 + $0x50] sm:$0xf] %vm2816_vm4, %v2473_v18  ;;  %v1287_v13 = vpop.f32.mrf.mxu2  ;;  %3694 = vmatmul.msk.bf16.gmra.mxu1 %vm1522_vm3, %v1477_v6  ;;  %v1437_v18 = vmax.f32 %v1286_v31, 0.0 }
 0x239   : > { %2896 = vst.msk [vmem:[%s4377_s20 + $0x13c] sm:$0xf] %vm2816_vm4, %v2591_v50  ;;  %v1288_v33 = vadd.f32 %v4435_v37, %v1287_v13  ;;  %v1130_v41 = vpop.f32.mrf.mxu0  ;;  %v1965_v36 = vpop.f32.mrf.mxu3 }
 0x23a   : > { %v2208_v14 = vpack.c.bf16 %v4740_v12, %v4740_v12  ;;  %v1966_v16 = vadd.f32 %v4588_v19, %v1965_v36  ;;  %v1131_v11 = vadd.f32 %v4435_v37, %v1130_v41 }
 0x23b   : > { %v1438_v32 = vmax.f32 %v1288_v33, 0.0 }
 0x23c   : > { %2496 = vrot.lane.b32.xlu2 %v2208_v14, %s3903_s17  ;;  %2620 = vrot.lane.b32.xlu1 %v2270_v57, %s3903_s17  ;;  %v4755_v61 = vmax.f32 %v1966_v16, 0.0 }
 0x23d   : > { %v1509_v50 = vpack.c.bf16 %v1438_v32, %v1437_v18  ;;  %v1810_v60 = vpop.f32.mrf.mxu1  ;;  %v1375_v32 = vmax.f32 %v1131_v11, 0.0 }
 0x23e   : > { %5778 = vst [vmem:[#allocation31_spill] sm:$0xff] %v4755_v61  ;;  %v1811_v6 = vadd.f32 %v4588_v19, %v1810_v60  ;;  %v2271_v57 = vpack.c.bf16 %v4755_v61, %v4755_v61 }
 0x23f   : > { %3726 = vmatmul.msk.bf16.gmra.mxu3 %vm1522_vm3, %v1509_v50  ;;  %v2599_v40 = vpop.permute.xlu2 %2598  ;;  %v2469_v13 = vpop.permute.xlu0 %2468 }
 0x240   : > { %v4760_v36 = vmax.f32 %v1811_v6, 0.0  ;;  %2900 = vst.msk [vmem:[%s4377_s20 + $0x14c] sm:$0xf] %vm2816_vm4, %v2599_v40  ;;  %v1290_v31 = vpop.f32.mrf.mxu2 }
 0x241   : > { %2835 = vst.msk [vmem:[%s4377_s20 + $0x48] sm:$0xf] %vm2816_vm4, %v2469_v13  ;;  %v1132_v33 = vpop.f32.mrf.mxu0  ;;  %v1291_v17 = vadd.f32 %v4435_v37, %v1290_v31 }
 0x242   : > { %v2209_v14 = vpack.c.bf16 %v4760_v36, %v4760_v36  ;;  %v1133_v16 = vadd.f32 %v4435_v37, %v1132_v33  ;;  %v1968_v18 = vpop.f32.mrf.mxu3 }
 0x243   : > { %v1969_v41 = vadd.f32 %v4588_v19, %v1968_v18 }
 0x244   : > { %v1376_v50 = vmax.f32 %v1133_v16, 0.0  ;;  %2622 = vrot.lane.b32.xlu2 %v2271_v57, %s3903_s17  ;;  %2498 = vrot.lane.b32.xlu0 %v2209_v14, %s3903_s17 }
 0x245   : > { %v1813_v60 = vpop.f32.mrf.mxu1  ;;  %v4774_v40 = vmax.f32 %v1969_v41, 0.0 }
 0x246   : > { %v1478_v6 = vpack.c.bf16 %v1376_v50, %v1375_v32  ;;  %v1814_v13 = vadd.f32 %v4588_v19, %v1813_v60  ;;  %v2471_v61 = vpop.permute.xlu1 %2470 }
 0x247   : > { %5779 = vst [vmem:[#allocation32_spill] sm:$0xff] %v4774_v40  ;;  %v2595_v33 = vpop.permute.xlu0 %2594  ;;  %v2272_v16 = vpack.c.bf16 %v4774_v40, %v4774_v40 }
 0x248   : > { %2836 = vst.msk [vmem:[%s4377_s20 + $0x4c] sm:$0xf] %vm2816_vm4, %v2471_v61  ;;  %v4780_v56 = vmax.f32 %v1814_v13, 0.0  ;;  %v1292_v11 = vpop.f32.mrf.mxu2  ;;  %3695 = vmatmul.msk.bf16.gmra.mxu1 %vm1522_vm3, %v1478_v6  ;;  %v1439_v61 = vmax.f32 %v1291_v17, 0.0 }
 0x249   : > { %2898 = vst.msk [vmem:[%s4377_s20 + $0x144] sm:$0xf] %vm2816_vm4, %v2595_v33  ;;  %v1293_v57 = vadd.f32 %v4435_v37, %v1292_v11  ;;  %v1135_v14 = vpop.f32.mrf.mxu0 }
 0x24a   : > { %v2210_v31 = vpack.c.bf16 %v4780_v56, %v4780_v56  ;;  %v1970_v18 = vpop.f32.mrf.mxu3  ;;  %v1136_v17 = vadd.f32 %v4435_v37, %v1135_v14 }
 0x24b   : > { %v1440_v41 = vmax.f32 %v1293_v57, 0.0  ;;  %v1971_v32 = vadd.f32 %v4588_v19, %v1970_v18 }
 0x24c   : > { %2500 = vrot.lane.b32.xlu1 %v2210_v31, %s3903_s17  ;;  %2624 = vrot.lane.b32.xlu0 %v2272_v16, %s3903_s17  ;;  %v1377_v14 = vmax.f32 %v1136_v17, 0.0 }
 0x24d   : > { %v1510_v50 = vpack.c.bf16 %v1440_v41, %v1439_v61  ;;  %v1815_v60 = vpop.f32.mrf.mxu1  ;;  %v4793_v6 = vmax.f32 %v1971_v32, 0.0 }
 0x24e   : > { %v1816_v13 = vadd.f32 %v4588_v19, %v1815_v60  ;;  %v2479_v33 = vpop.permute.xlu2 %2478 }
 0x24f   : > { %5780 = vst [vmem:[#allocation33_spill] sm:$0xff] %v4793_v6  ;;  %3727 = vmatmul.msk.bf16.gmra.mxu3 %vm1522_vm3, %v1510_v50  ;;  %v2597_v11 = vpop.permute.xlu1 %2596  ;;  %v2273_v18 = vpack.c.bf16 %v4793_v6, %v4793_v6 }
 0x250   : > { %2840 = vst.msk [vmem:[%s4377_s20 + $0x5c] sm:$0xf] %vm2816_vm4, %v2479_v33  ;;  %v4800_v57 = vmax.f32 %v1816_v13, 0.0  ;;  %v1295_v31 = vpop.f32.mrf.mxu2 }
 0x251   : > { %2899 = vst.msk [vmem:[%s4377_s20 + $0x148] sm:$0xf] %vm2816_vm4, %v2597_v11  ;;  %v1137_v16 = vpop.f32.mrf.mxu0  ;;  %v1296_v29 = vadd.f32 %v4435_v37, %v1295_v31 }
 0x252   : > { %v2211_v61 = vpack.c.bf16 %v4800_v57, %v4800_v57  ;;  %v1138_v41 = vadd.f32 %v4435_v37, %v1137_v16  ;;  %v1973_v32 = vpop.f32.mrf.mxu3 }
 0x253   : > { %v1974_v50 = vadd.f32 %v4588_v19, %v1973_v32 }
 0x254   : > { %v1378_v60 = vmax.f32 %v1138_v41, 0.0  ;;  %2502 = vrot.lane.b32.xlu2 %v2211_v61, %s3903_s17  ;;  %2626 = vrot.lane.b32.xlu1 %v2273_v18, %s3903_s17 }
 0x255   : > { %v1818_v13 = vpop.f32.mrf.mxu1  ;;  %v4812_v11 = vmax.f32 %v1974_v50, 0.0  ;;  %v1441_v50 = vmax.f32 %v1296_v29, 0.0 }
 0x256   : > { %v1479_v33 = vpack.c.bf16 %v1378_v60, %v1377_v14  ;;  %v1819_v6 = vadd.f32 %v4588_v19, %v1818_v13  ;;  %v2475_v40 = vpop.permute.xlu0 %2474 }
 0x257   : > { %5781 = vst [vmem:[#allocation34_spill] sm:$0xff] %v4812_v11  ;;  %v2605_v16 = vpop.permute.xlu2 %2604  ;;  %v2274_v41 = vpack.c.bf16 %v4812_v11, %v4812_v11 }
 0x258   : > { %2838 = vst.msk [vmem:[%s4377_s20 + $0x54] sm:$0xf] %vm2816_vm4, %v2475_v40  ;;  %v4818_v4 = vmax.f32 %v1819_v6, 0.0  ;;  %v1297_v17 = vpop.f32.mrf.mxu2  ;;  %3696 = vmatmul.msk.bf16.gmra.mxu1 %vm1522_vm3, %v1479_v33 }
 0x259   : > { %2903 = vst.msk [vmem:[%s4377_s20 + $0x158] sm:$0xf] %vm2816_vm4, %v2605_v16  ;;  %v1298_v18 = vadd.f32 %v4435_v37, %v1297_v17  ;;  %v1140_v61 = vpop.f32.mrf.mxu0 }
 0x25a   : > { %v2212_v32 = vpack.c.bf16 %v4818_v4, %v4818_v4  ;;  %v1975_v31 = vpop.f32.mrf.mxu3  ;;  %v1141_v29 = vadd.f32 %v4435_v37, %v1140_v61 }
 0x25b   : > { %v1442_v40 = vmax.f32 %v1298_v18, 0.0  ;;  %v1976_v6 = vadd.f32 %v4588_v19, %v1975_v31 }
 0x25c   : > { %2628 = vrot.lane.b32.xlu2 %v2274_v41, %s3903_s17  ;;  %2504 = vrot.lane.b32.xlu0 %v2212_v32, %s3903_s17 }
 0x25d   : > { %v1511_v14 = vpack.c.bf16 %v1442_v40, %v1441_v50  ;;  %v1820_v60 = vpop.f32.mrf.mxu1  ;;  %v4831_v13 = vmax.f32 %v1976_v6, 0.0  ;;  %v1379_v6 = vmax.f32 %v1141_v29, 0.0 }
 0x25e   : > { %v1821_v33 = vadd.f32 %v4588_v19, %v1820_v60 }
 0x25f   : > { %5782 = vst [vmem:[#allocation35_spill] sm:$0xff] %v4831_v13  ;;  %3728 = vmatmul.msk.bf16.gmra.mxu3 %vm1522_vm3, %v1511_v14  ;;  %v2477_v16 = vpop.permute.xlu1 %2476  ;;  %v2601_v17 = vpop.permute.xlu0 %2600  ;;  %v2275_v32 = vpack.c.bf16 %v4831_v13, %v4831_v13 }
 0x260   : > { %v4836_v11 = vmax.f32 %v1821_v33, 0.0  ;;  %2839 = vst.msk [vmem:[%s4377_s20 + $0x58] sm:$0xf] %vm2816_vm4, %v2477_v16  ;;  %v1300_v18 = vpop.f32.mrf.mxu2 }
 0x261   : > { %2901 = vst.msk [vmem:[%s4377_s20 + $0x150] sm:$0xf] %vm2816_vm4, %v2601_v17  ;;  %v1142_v41 = vpop.f32.mrf.mxu0  ;;  %v1301_v13 = vadd.f32 %v4435_v37, %v1300_v18 }
 0x262   : > { %v2213_v31 = vpack.c.bf16 %v4836_v11, %v4836_v11  ;;  %v1143_v50 = vadd.f32 %v4435_v37, %v1142_v41  ;;  %v1978_v40 = vpop.f32.mrf.mxu3 }
 0x263   : > { %v1979_v61 = vadd.f32 %v4588_v19, %v1978_v40 }
 0x264   : > { %v1380_v14 = vmax.f32 %v1143_v50, 0.0  ;;  %2506 = vrot.lane.b32.xlu1 %v2213_v31, %s3903_s17  ;;  %2630 = vrot.lane.b32.xlu0 %v2275_v32, %s3903_s17 }
 0x265   : > { %v1823_v60 = vpop.f32.mrf.mxu1  ;;  %v4850_v16 = vmax.f32 %v1979_v61, 0.0  ;;  %v1443_v61 = vmax.f32 %v1301_v13, 0.0 }
 0x266   : > { %v1480_v33 = vpack.c.bf16 %v1380_v14, %v1379_v6  ;;  %v1824_v17 = vadd.f32 %v4588_v19, %v1823_v60 }
 0x267   : > { %5783 = vst [vmem:[#allocation36_spill] sm:$0xff] %v4850_v16  ;;  %v2485_v44 = vpop.permute.xlu2 %2484  ;;  %v2603_v41 = vpop.permute.xlu1 %2602  ;;  %v2276_v50 = vpack.c.bf16 %v4850_v16, %v4850_v16 }
 0x268   : > { %v4854_v21 = vmax.f32 %v1824_v17, 0.0  ;;  %2843 = vst.msk [vmem:[%s4377_s20 + $0x68] sm:$0xf] %vm2816_vm4, %v2485_v44  ;;  %v1302_v29 = vpop.f32.mrf.mxu2  ;;  %3697 = vmatmul.msk.bf16.gmra.mxu1 %vm1522_vm3, %v1480_v33 }
 0x269   : > { %2902 = vst.msk [vmem:[%s4377_s20 + $0x154] sm:$0xf] %vm2816_vm4, %v2603_v41  ;;  %v1303_v32 = vadd.f32 %v4435_v37, %v1302_v29  ;;  %v1145_v31 = vpop.f32.mrf.mxu0 }
 0x26a   : > { %v2214_v18 = vpack.c.bf16 %v4854_v21, %v4854_v21  ;;  %v1980_v40 = vpop.f32.mrf.mxu3  ;;  %v1146_v13 = vadd.f32 %v4435_v37, %v1145_v31 }
 0x26b   : > { %v1444_v6 = vmax.f32 %v1303_v32, 0.0  ;;  %v1981_v44 = vadd.f32 %v4588_v19, %v1980_v40 }
 0x26c   : > { %2508 = vrot.lane.b32.xlu2 %v2214_v18, %s3903_s17  ;;  %2632 = vrot.lane.b32.xlu1 %v2276_v50, %s3903_s17 }
 0x26d   : > { %v1512_v14 = vpack.c.bf16 %v1444_v6, %v1443_v61  ;;  %v1825_v60 = vpop.f32.mrf.mxu1  ;;  %v4869_v33 = vmax.f32 %v1981_v44, 0.0  ;;  %v1381_v44 = vmax.f32 %v1146_v13, 0.0 }
 0x26e   : > { %v1826_v17 = vadd.f32 %v4588_v19, %v1825_v60 }
 0x26f   : > { %5784 = vst [vmem:[#allocation37_spill] sm:$0xff] %v4869_v33  ;;  %3729 = vmatmul.msk.bf16.gmra.mxu3 %vm1522_vm3, %v1512_v14  ;;  %v2611_v41 = vpop.permute.xlu2 %2610  ;;  %v2481_v29 = vpop.permute.xlu0 %2480  ;;  %v2277_v18 = vpack.c.bf16 %v4869_v33, %v4869_v33 }
 0x270   : > { %v4874_v16 = vmax.f32 %v1826_v17, 0.0  ;;  %2906 = vst.msk [vmem:[%s4377_s20 + $0x164] sm:$0xf] %vm2816_vm4, %v2611_v41  ;;  %v1305_v32 = vpop.f32.mrf.mxu2 }
 0x271   : > { %2841 = vst.msk [vmem:[%s4377_s20 + $0x60] sm:$0xf] %vm2816_vm4, %v2481_v29  ;;  %v1147_v50 = vpop.f32.mrf.mxu0 }
 0x272   : > { %v2215_v40 = vpack.c.bf16 %v4874_v16, %v4874_v16  ;;  %v1148_v61 = vadd.f32 %v4435_v37, %v1147_v50  ;;  %v1983_v6 = vpop.f32.mrf.mxu3  ;;  %v4894_v37 = vld [vmem:[%s5670_s2] ss:$0 sm:$0xff] }
 0x273   : > { %v1984_v31 = vadd.f32 %v4588_v19, %v1983_v6  ;;  %v1306_v50 = vadd.f32 %v4894_v37, %v1305_v32 }
 0x274   : > { %v1382_v14 = vmax.f32 %v1148_v61, 0.0  ;;  %2634 = vrot.lane.b32.xlu2 %v2277_v18, %s3903_s17  ;;  %2510 = vrot.lane.b32.xlu0 %v2215_v40, %s3903_s17 }
 0x275   : > { %v1828_v60 = vpop.f32.mrf.mxu1  ;;  %v4888_v41 = vmax.f32 %v1984_v31, 0.0 }
 0x276   : > { %v1481_v17 = vpack.c.bf16 %v1382_v14, %v1381_v44  ;;  %v1829_v29 = vadd.f32 %v4588_v19, %v1828_v60  ;;  %v2483_v33 = vpop.permute.xlu1 %2482 }
 0x277   : > { %5785 = vst [vmem:[#allocation38_spill] sm:$0xff] %v4888_v41  ;;  %v2607_v13 = vpop.permute.xlu0 %2606  ;;  %v2278_v31 = vpack.c.bf16 %v4888_v41, %v4888_v41 }
 0x278   : > { %2842 = vst.msk [vmem:[%s4377_s20 + $0x64] sm:$0xf] %vm2816_vm4, %v2483_v33  ;;  %v4899_v18 = vmax.f32 %v1829_v29, 0.0  ;;  %v1307_v40 = vpop.f32.mrf.mxu2  ;;  %3698 = vmatmul.msk.bf16.gmra.mxu1 %vm1522_vm3, %v1481_v17  ;;  %v1445_v33 = vmax.f32 %v1306_v50, 0.0 }
 0x279   : > { %2904 = vst.msk [vmem:[%s4377_s20 + $0x15c] sm:$0xf] %vm2816_vm4, %v2607_v13  ;;  %v1308_v61 = vadd.f32 %v4894_v37, %v1307_v40  ;;  %v1150_v6 = vpop.f32.mrf.mxu0 }
 0x27a   : > { %v2216_v32 = vpack.c.bf16 %v4899_v18, %v4899_v18  ;;  %v1985_v44 = vpop.f32.mrf.mxu3  ;;  %v1151_v50 = vadd.f32 %v4894_v37, %v1150_v6 }
 0x27b   : > { %v1446_v14 = vmax.f32 %v1308_v61, 0.0  ;;  %v1986_v60 = vadd.f32 %v4588_v19, %v1985_v44 }
 0x27c   : > { %2512 = vrot.lane.b32.xlu1 %v2216_v32, %s3903_s17  ;;  %2636 = vrot.lane.b32.xlu0 %v2278_v31, %s3903_s17  ;;  %v1383_v6 = vmax.f32 %v1151_v50, 0.0 }
 0x27d   : > { %v1513_v17 = vpack.c.bf16 %v1446_v14, %v1445_v33  ;;  %v1830_v29 = vpop.f32.mrf.mxu1  ;;  %v4912_v13 = vmax.f32 %v1986_v60, 0.0 }
 0x27e   : > { %v1831_v40 = vadd.f32 %v4588_v19, %v1830_v29  ;;  %v2491_v41 = vpop.permute.xlu2 %2490 }
 0x27f   : > { %5786 = vst [vmem:[#allocation39_spill] sm:$0xff] %v4912_v13  ;;  %3730 = vmatmul.msk.bf16.gmra.mxu3 %vm1522_vm3, %v1513_v17  ;;  %v2609_v2 = vpop.permute.xlu1 %2608  ;;  %v2279_v44 = vpack.c.bf16 %v4912_v13, %v4912_v13 }
 0x280   : > { %2846 = vst.msk [vmem:[%s4377_s20 + $0x74] sm:$0xf] %vm2816_vm4, %v2491_v41  ;;  %v4919_v61 = vmax.f32 %v1831_v40, 0.0  ;;  %v1310_v32 = vpop.f32.mrf.mxu2 }
 0x281   : > { %2905 = vst.msk [vmem:[%s4377_s20 + $0x160] sm:$0xf] %vm2816_vm4, %v2609_v2  ;;  %v1152_v31 = vpop.f32.mrf.mxu0 }
 0x282   : > { %v2217_v33 = vpack.c.bf16 %v4919_v61, %v4919_v61  ;;  %v1153_v14 = vadd.f32 %v4894_v37, %v1152_v31  ;;  %v1988_v41 = vpop.f32.mrf.mxu3  ;;  %v1311_v31 = vadd.f32 %v4894_v37, %v1310_v32 }
 0x283   : > { %v1989_v60 = vadd.f32 %v4588_v19, %v1988_v41 }
 0x284   : > { %v1384_v17 = vmax.f32 %v1153_v14, 0.0  ;;  %2514 = vrot.lane.b32.xlu2 %v2217_v33, %s3903_s17  ;;  %2638 = vrot.lane.b32.xlu1 %v2279_v44, %s3903_s17 }
 0x285   : > { %v1833_v2 = vpop.f32.mrf.mxu1  ;;  %v4931_v40 = vmax.f32 %v1989_v60, 0.0  ;;  %v1447_v60 = vmax.f32 %v1311_v31, 0.0 }
 0x286   : > { %v1482_v29 = vpack.c.bf16 %v1384_v17, %v1383_v6  ;;  %v1834_v13 = vadd.f32 %v4588_v19, %v1833_v2  ;;  %v2617_v45 = vpop.permute.xlu2 %2616  ;;  %v2487_v25 = vpop.permute.xlu0 %2486 }
 0x287   : > { %5787 = vst [vmem:[#allocation40_spill] sm:$0xff] %v4931_v40  ;;  %v2280_v14 = vpack.c.bf16 %v4931_v40, %v4931_v40 }
 0x288   : > { %2909 = vst.msk [vmem:[%s4377_s20 + $0x170] sm:$0xf] %vm2816_vm4, %v2617_v45  ;;  %v4937_v7 = vmax.f32 %v1834_v13, 0.0  ;;  %v1312_v50 = vpop.f32.mrf.mxu2  ;;  %3699 = vmatmul.msk.bf16.gmra.mxu1 %vm1522_vm3, %v1482_v29 }
 0x289   : > { %2844 = vst.msk [vmem:[%s4377_s20 + $0x6c] sm:$0xf] %vm2816_vm4, %v2487_v25  ;;  %v1313_v44 = vadd.f32 %v4894_v37, %v1312_v50  ;;  %v1155_v33 = vpop.f32.mrf.mxu0 }
 0x28a   : > { %v2218_v41 = vpack.c.bf16 %v4937_v7, %v4937_v7  ;;  %v1990_v32 = vpop.f32.mrf.mxu3  ;;  %v1156_v31 = vadd.f32 %v4894_v37, %v1155_v33 }
 0x28b   : > { %v1448_v45 = vmax.f32 %v1313_v44, 0.0  ;;  %v1991_v13 = vadd.f32 %v4588_v19, %v1990_v32 }
 0x28c   : > { %2640 = vrot.lane.b32.xlu2 %v2280_v14, %s3903_s17  ;;  %2516 = vrot.lane.b32.xlu0 %v2218_v41, %s3903_s17 }
 0x28d   : > { %v1514_v25 = vpack.c.bf16 %v1448_v45, %v1447_v60  ;;  %v1835_v6 = vpop.f32.mrf.mxu1  ;;  %v4950_v17 = vmax.f32 %v1991_v13, 0.0  ;;  %v1385_v13 = vmax.f32 %v1156_v31, 0.0 }
 0x28e   : > { %v1836_v2 = vadd.f32 %v4588_v19, %v1835_v6 }
 0x28f   : > { %5788 = vst [vmem:[#allocation41_spill] sm:$0xff] %v4950_v17  ;;  %3731 = vmatmul.msk.bf16.gmra.mxu3 %vm1522_vm3, %v1514_v25  ;;  %v2489_v29 = vpop.permute.xlu1 %2488  ;;  %v2613_v50 = vpop.permute.xlu0 %2612  ;;  %v2281_v41 = vpack.c.bf16 %v4950_v17, %v4950_v17 }
 0x290   : > { %v4955_v40 = vmax.f32 %v1836_v2, 0.0  ;;  %2845 = vst.msk [vmem:[%s4377_s20 + $0x70] sm:$0xf] %vm2816_vm4, %v2489_v29  ;;  %v1315_v44 = vpop.f32.mrf.mxu2 }
 0x291   : > { %2907 = vst.msk [vmem:[%s4377_s20 + $0x168] sm:$0xf] %vm2816_vm4, %v2613_v50  ;;  %v1157_v14 = vpop.f32.mrf.mxu0  ;;  %v1316_v51 = vadd.f32 %v4894_v37, %v1315_v44 }
 0x292   : > { %v2219_v32 = vpack.c.bf16 %v4955_v40, %v4955_v40  ;;  %v1158_v60 = vadd.f32 %v4894_v37, %v1157_v14  ;;  %v1993_v45 = vpop.f32.mrf.mxu3 }
 0x293   : > { %v1994_v33 = vadd.f32 %v4588_v19, %v1993_v45 }
 0x294   : > { %v1386_v25 = vmax.f32 %v1158_v60, 0.0  ;;  %2518 = vrot.lane.b32.xlu1 %v2219_v32, %s3903_s17  ;;  %2642 = vrot.lane.b32.xlu0 %v2281_v41, %s3903_s17 }
 0x295   : > { %v1838_v6 = vpop.f32.mrf.mxu1  ;;  %v4969_v29 = vmax.f32 %v1994_v33, 0.0 }
 0x296   : > { %v1483_v2 = vpack.c.bf16 %v1386_v25, %v1385_v13  ;;  %v1839_v50 = vadd.f32 %v4588_v19, %v1838_v6  ;;  %v2497_v17 = vpop.permute.xlu2 %2496 }
 0x297   : > { %5789 = vst [vmem:[#allocation42_spill] sm:$0xff] %v4969_v29  ;;  %v2615_v14 = vpop.permute.xlu1 %2614  ;;  %v2282_v60 = vpack.c.bf16 %v4969_v29, %v4969_v29 }
 0x298   : > { %2849 = vst.msk [vmem:[%s4377_s20 + $0x80] sm:$0xf] %vm2816_vm4, %v2497_v17  ;;  %v4975_v30 = vmax.f32 %v1839_v50, 0.0  ;;  %v1317_v31 = vpop.f32.mrf.mxu2  ;;  %3700 = vmatmul.msk.bf16.gmra.mxu1 %vm1522_vm3, %v1483_v2  ;;  %v1449_v17 = vmax.f32 %v1316_v51, 0.0 }
 0x299   : > { %2908 = vst.msk [vmem:[%s4377_s20 + $0x16c] sm:$0xf] %vm2816_vm4, %v2615_v14  ;;  %v1318_v41 = vadd.f32 %v4894_v37, %v1317_v31  ;;  %v1160_v32 = vpop.f32.mrf.mxu0 }
 0x29a   : > { %5790 = vst [vmem:[#allocation43_spill] sm:$0xff] %v4975_v30  ;;  %v2220_v44 = vpack.c.bf16 %v4975_v30, %v4975_v30  ;;  %v1995_v45 = vpop.f32.mrf.mxu3  ;;  %v1161_v51 = vadd.f32 %v4894_v37, %v1160_v32 }
 0x29b   : > { %v1450_v33 = vmax.f32 %v1318_v41, 0.0  ;;  %v1996_v13 = vadd.f32 %v4588_v19, %v1995_v45 }
 0x29c   : > { %2520 = vrot.lane.b32.xlu2 %v2220_v44, %s3903_s17  ;;  %2644 = vrot.lane.b32.xlu1 %v2282_v60, %s3903_s17  ;;  %v1387_v32 = vmax.f32 %v1161_v51, 0.0 }
 0x29d   : > { %v1515_v25 = vpack.c.bf16 %v1450_v33, %v1449_v17  ;;  %v1840_v6 = vpop.f32.mrf.mxu1  ;;  %v4988_v2 = vmax.f32 %v1996_v13, 0.0 }
 0x29e   : > { %v1841_v50 = vadd.f32 %v4588_v19, %v1840_v6  ;;  %v2623_v14 = vpop.permute.xlu2 %2622  ;;  %v2493_v31 = vpop.permute.xlu0 %2492 }
 0x29f   : > { %5791 = vst [vmem:[#allocation44_spill] sm:$0xff] %v4988_v2  ;;  %3732 = vmatmul.msk.bf16.gmra.mxu3 %vm1522_vm3, %v1515_v25  ;;  %v2283_v45 = vpack.c.bf16 %v4988_v2, %v4988_v2 }
 0x2a0   : > { %2912 = vst.msk [vmem:[%s4377_s20 + $0x17c] sm:$0xf] %vm2816_vm4, %v2623_v14  ;;  %v4995_v41 = vmax.f32 %v1841_v50, 0.0  ;;  %v1320_v44 = vpop.f32.mrf.mxu2 }
 0x2a1   : > { %2847 = vst.msk [vmem:[%s4377_s20 + $0x78] sm:$0xf] %vm2816_vm4, %v2493_v31  ;;  %v1162_v60 = vpop.f32.mrf.mxu0 }
 0x2a2   : > { %5792 = vst [vmem:[#allocation45_spill] sm:$0xff] %v4995_v41  ;;  %v2221_v17 = vpack.c.bf16 %v4995_v41, %v4995_v41  ;;  %v1163_v33 = vadd.f32 %v4894_v37, %v1162_v60  ;;  %v1998_v13 = vpop.f32.mrf.mxu3  ;;  %v1321_v60 = vadd.f32 %v4894_v37, %v1320_v44 }
 0x2a3   : > { %v1999_v25 = vadd.f32 %v4588_v19, %v1998_v13 }
 0x2a4   : > { %v1388_v6 = vmax.f32 %v1163_v33, 0.0  ;;  %2646 = vrot.lane.b32.xlu2 %v2283_v45, %s3903_s17  ;;  %2522 = vrot.lane.b32.xlu0 %v2221_v17, %s3903_s17  ;;  %v1451_v13 = vmax.f32 %v1321_v60, 0.0 }
 0x2a5   : > { %v1843_v50 = vpop.f32.mrf.mxu1  ;;  %v5007_v31 = vmax.f32 %v1999_v25, 0.0 }
 0x2a6   : > { %v1484_v14 = vpack.c.bf16 %v1388_v6, %v1387_v32  ;;  %v1844_v2 = vadd.f32 %v4588_v19, %v1843_v50  ;;  %v2495_v29 = vpop.permute.xlu1 %2494  ;;  %v2619_v41 = vpop.permute.xlu0 %2618 }
 0x2a7   : > { %5793 = vst [vmem:[#allocation46_spill] sm:$0xff] %v5007_v31  ;;  %v2284_v17 = vpack.c.bf16 %v5007_v31, %v5007_v31 }
 0x2a8   : > { %2848 = vst.msk [vmem:[%s4377_s20 + $0x7c] sm:$0xf] %vm2816_vm4, %v2495_v29  ;;  %v5013_v30 = vmax.f32 %v1844_v2, 0.0  ;;  %v1322_v51 = vpop.f32.mrf.mxu2  ;;  %3701 = vmatmul.msk.bf16.gmra.mxu1 %vm1522_vm3, %v1484_v14 }
 0x2a9   : > { %2910 = vst.msk [vmem:[%s4377_s20 + $0x174] sm:$0xf] %vm2816_vm4, %v2619_v41  ;;  %v1323_v45 = vadd.f32 %v4894_v37, %v1322_v51 }
 0x2aa   : > { %v2222_v33 = vpack.c.bf16 %v5013_v30, %v5013_v30  ;;  %v2000_v44 = vpop.f32.mrf.mxu3 }
 0x2ab   : > { %v1452_v29 = vmax.f32 %v1323_v45, 0.0  ;;  %v2001_v2 = vadd.f32 %v4588_v19, %v2000_v44 }
 0x2ac   : > { %2524 = vrot.lane.b32.xlu1 %v2222_v33, %s3903_s17  ;;  %2648 = vrot.lane.b32.xlu0 %v2284_v17, %s3903_s17 }
 0x2ad   : > { %v1516_v41 = vpack.c.bf16 %v1452_v29, %v1451_v13  ;;  %v1845_v25 = vpop.f32.mrf.mxu1  ;;  %v5026_v37 = vmax.f32 %v2001_v2, 0.0  ;;  %v5048_v13 = vld [vmem:[%s5672_s4] ss:$0 sm:$0xff] }
 0x2ae   : > { %v1846_v32 = vadd.f32 %v4588_v19, %v1845_v25  ;;  %v2503_v6 = vpop.permute.xlu2 %2502  ;;  %v2621_v50 = vpop.permute.xlu1 %2620 }
 0x2af   : > { %5794 = vst [vmem:[#allocation47_spill] sm:$0xff] %v5026_v37  ;;  %3733 = vmatmul.msk.bf16.gmra.mxu3 %vm1522_vm3, %v1516_v41  ;;  %v2285_v60 = vpack.c.bf16 %v5026_v37, %v5026_v37 }
 0x2b0   : > { %2852 = vst.msk [vmem:[%s4377_s20 + $0x8c] sm:$0xf] %vm2816_vm4, %v2503_v6  ;;  %v5032_v14 = vmax.f32 %v1846_v32, 0.0 }
 0x2b1   : > { %2911 = vst.msk [vmem:[%s4377_s20 + $0x178] sm:$0xf] %vm2816_vm4, %v2621_v50 }
 0x2b2   : > { %v2223_v51 = vpack.c.bf16 %v5032_v14, %v5032_v14  ;;  %v2003_v45 = vpop.f32.mrf.mxu3 }
 0x2b3   : > { %v2004_v17 = vadd.f32 %v4588_v19, %v2003_v45 }
 0x2b4   : > { %2526 = vrot.lane.b32.xlu2 %v2223_v51, %s3903_s17  ;;  %2650 = vrot.lane.b32.xlu1 %v2285_v60, %s3903_s17 }
 0x2b5   : > { %v1848_v33 = vpop.f32.mrf.mxu1  ;;  %v5043_v44 = vmax.f32 %v2004_v17, 0.0 }
 0x2b6   : > { %v1849_v29 = vadd.f32 %v5048_v13, %v1848_v33  ;;  %v2629_v2 = vpop.permute.xlu2 %2628  ;;  %v2499_v41 = vpop.permute.xlu0 %2498 }
 0x2b7   : > { %5795 = vst [vmem:[#allocation48_spill] sm:$0xff] %v5043_v44  ;;  %v2286_v25 = vpack.c.bf16 %v5043_v44, %v5043_v44 }
 0x2b8   : > { %2915 = vst.msk [vmem:[%s4377_s20 + $0x188] sm:$0xf] %vm2816_vm4, %v2629_v2  ;;  %v5053_v19 = vmax.f32 %v1849_v29, 0.0  ;;  %3702 = vmatmul.msk.bf16.gmra.mxu1 %vm1522_vm3, %v4057_v48 }
 0x2b9   : > { %2850 = vst.msk [vmem:[%s4377_s20 + $0x84] sm:$0xf] %vm2816_vm4, %v2499_v41 }
 0x2ba   : > { %v2224_v32 = vpack.c.bf16 %v5053_v19, %v5053_v19  ;;  %v2005_v6 = vpop.f32.mrf.mxu3 }
 0x2bb   : > { %v2006_v50 = vadd.f32 %v5048_v13, %v2005_v6 }
 0x2bc   : > { %2652 = vrot.lane.b32.xlu2 %v2286_v25, %s3903_s17  ;;  %2528 = vrot.lane.b32.xlu0 %v2224_v32, %s3903_s17 }
 0x2bd   : > { %v1850_v60 = vpop.f32.mrf.mxu1  ;;  %v5066_v51 = vmax.f32 %v2006_v50, 0.0 }
 0x2be   : > { %v1851_v45 = vadd.f32 %v5048_v13, %v1850_v60  ;;  %v2501_v17 = vpop.permute.xlu1 %2500  ;;  %v2625_v48 = vpop.permute.xlu0 %2624 }
 0x2bf   : > { %5796 = vst [vmem:[#allocation49_spill] sm:$0xff] %v5066_v51  ;;  %v2287_v29 = vpack.c.bf16 %v5066_v51, %v5066_v51 }
 0x2c0   : > { %2851 = vst.msk [vmem:[%s4377_s20 + $0x88] sm:$0xf] %vm2816_vm4, %v2501_v17  ;;  %v5071_v33 = vmax.f32 %v1851_v45, 0.0 }
 0x2c1   : > { %2913 = vst.msk [vmem:[%s4377_s20 + $0x180] sm:$0xf] %vm2816_vm4, %v2625_v48 }
 0x2c2   : > { %v2225_v2 = vpack.c.bf16 %v5071_v33, %v5071_v33  ;;  %v2008_v41 = vpop.f32.mrf.mxu3 }
 0x2c3   : > { %v2009_v25 = vadd.f32 %v5048_v13, %v2008_v41 }
 0x2c4   : > { %2530 = vrot.lane.b32.xlu1 %v2225_v2, %s3903_s17  ;;  %2654 = vrot.lane.b32.xlu0 %v2287_v29, %s3903_s17 }
 0x2c5   : > { %v1853_v32 = vpop.f32.mrf.mxu1  ;;  %v5082_v6 = vmax.f32 %v2009_v25, 0.0 }
 0x2c6   : > { %v1854_v50 = vadd.f32 %v5048_v13, %v1853_v32  ;;  %v2509_v60 = vpop.permute.xlu2 %2508  ;;  %v2627_v45 = vpop.permute.xlu1 %2626 }
 0x2c7   : > { %5797 = vst [vmem:[#allocation50_spill] sm:$0xff] %v5082_v6  ;;  %v2288_v48 = vpack.c.bf16 %v5082_v6, %v5082_v6 }
 0x2c8   : > { %2855 = vst.msk [vmem:[%s4377_s20 + $0x98] sm:$0xf] %vm2816_vm4, %v2509_v60  ;;  %v5087_v17 = vmax.f32 %v1854_v50, 0.0 }
 0x2c9   : > { %2914 = vst.msk [vmem:[%s4377_s20 + $0x184] sm:$0xf] %vm2816_vm4, %v2627_v45 }
 0x2ca   : > { %v2226_v29 = vpack.c.bf16 %v5087_v17, %v5087_v17  ;;  %v2010_v2 = vpop.f32.mrf.mxu3 }
 0x2cb   : > { %v2011_v41 = vadd.f32 %v5048_v13, %v2010_v2 }
 0x2cc   : > { %2532 = vrot.lane.b32.xlu2 %v2226_v29, %s3903_s17  ;;  %2656 = vrot.lane.b32.xlu1 %v2288_v48, %s3903_s17 }
 0x2cd   : > { %v1855_v25 = vpop.f32.mrf.mxu1  ;;  %v5098_v32 = vmax.f32 %v2011_v41, 0.0 }
 0x2ce   : > { %v1856_v50 = vadd.f32 %v5048_v13, %v1855_v25  ;;  %v2635_v60 = vpop.permute.xlu2 %2634  ;;  %v2505_v45 = vpop.permute.xlu0 %2504 }
 0x2cf   : > { %5798 = vst [vmem:[#allocation51_spill] sm:$0xff] %v5098_v32  ;;  %v2289_v29 = vpack.c.bf16 %v5098_v32, %v5098_v32 }
 0x2d0   : > { %2918 = vst.msk [vmem:[%s4377_s20 + $0x194] sm:$0xf] %vm2816_vm4, %v2635_v60  ;;  %v5103_v6 = vmax.f32 %v1856_v50, 0.0 }
 0x2d1   : > { %2853 = vst.msk [vmem:[%s4377_s20 + $0x90] sm:$0xf] %vm2816_vm4, %v2505_v45 }
 0x2d2   : > { %v2227_v48 = vpack.c.bf16 %v5103_v6, %v5103_v6  ;;  %v2013_v2 = vpop.f32.mrf.mxu3 }
 0x2d3   : > { %v2014_v41 = vadd.f32 %v5048_v13, %v2013_v2 }
 0x2d4   : > { %2658 = vrot.lane.b32.xlu2 %v2289_v29, %s3903_s17  ;;  %2534 = vrot.lane.b32.xlu0 %v2227_v48, %s3903_s17 }
 0x2d5   : > { %v1858_v25 = vpop.f32.mrf.mxu1  ;;  %v5114_v60 = vmax.f32 %v2014_v41, 0.0 }
 0x2d6   : > { %v1859_v50 = vadd.f32 %v5048_v13, %v1858_v25  ;;  %v2507_v51 = vpop.permute.xlu1 %2506  ;;  %v2631_v45 = vpop.permute.xlu0 %2630 }
 0x2d7   : > { %5799 = vst [vmem:[#allocation52_spill] sm:$0xff] %v5114_v60  ;;  %v2290_v29 = vpack.c.bf16 %v5114_v60, %v5114_v60 }
 0x2d8   : > { %2854 = vst.msk [vmem:[%s4377_s20 + $0x94] sm:$0xf] %vm2816_vm4, %v2507_v51  ;;  %v5119_v32 = vmax.f32 %v1859_v50, 0.0 }
 0x2d9   : > { %2916 = vst.msk [vmem:[%s4377_s20 + $0x18c] sm:$0xf] %vm2816_vm4, %v2631_v45 }
 0x2da   : > { %v2228_v48 = vpack.c.bf16 %v5119_v32, %v5119_v32  ;;  %v2015_v2 = vpop.f32.mrf.mxu3 }
 0x2db   : > { %v2016_v41 = vadd.f32 %v5048_v13, %v2015_v2 }
 0x2dc   : > { %2536 = vrot.lane.b32.xlu1 %v2228_v48, %s3903_s17  ;;  %2660 = vrot.lane.b32.xlu0 %v2290_v29, %s3903_s17 }
 0x2dd   : > { %v1860_v25 = vpop.f32.mrf.mxu1  ;;  %v5130_v51 = vmax.f32 %v2016_v41, 0.0 }
 0x2de   : > { %v1861_v50 = vadd.f32 %v5048_v13, %v1860_v25  ;;  %v2515_v44 = vpop.permute.xlu2 %2514  ;;  %v2633_v45 = vpop.permute.xlu1 %2632 }
 0x2df   : > { %5800 = vst [vmem:[#allocation53_spill] sm:$0xff] %v5130_v51  ;;  %v2291_v48 = vpack.c.bf16 %v5130_v51, %v5130_v51 }
 0x2e0   : > { %2858 = vst.msk [vmem:[%s4377_s20 + $0xa4] sm:$0xf] %vm2816_vm4, %v2515_v44  ;;  %v5135_v60 = vmax.f32 %v1861_v50, 0.0 }
 0x2e1   : > { %2917 = vst.msk [vmem:[%s4377_s20 + $0x190] sm:$0xf] %vm2816_vm4, %v2633_v45 }
 0x2e2   : > { %5801 = vst [vmem:[#allocation54_spill] sm:$0xff] %v5135_v60  ;;  %v2229_v29 = vpack.c.bf16 %v5135_v60, %v5135_v60  ;;  %v2018_v2 = vpop.f32.mrf.mxu3 }
 0x2e3   : > { %v2019_v41 = vadd.f32 %v5048_v13, %v2018_v2 }
 0x2e4   : > { %2538 = vrot.lane.b32.xlu2 %v2229_v29, %s3903_s17  ;;  %2662 = vrot.lane.b32.xlu1 %v2291_v48, %s3903_s17 }
 0x2e5   : > { %v1863_v25 = vpop.f32.mrf.mxu1  ;;  %v5146_v44 = vmax.f32 %v2019_v41, 0.0 }
 0x2e6   : > { %v1864_v50 = vadd.f32 %v5048_v13, %v1863_v25  ;;  %v2641_v37 = vpop.permute.xlu2 %2640  ;;  %v2511_v45 = vpop.permute.xlu0 %2510 }
 0x2e7   : > { %5802 = vst [vmem:[#allocation55_spill] sm:$0xff] %v5146_v44  ;;  %v2292_v29 = vpack.c.bf16 %v5146_v44, %v5146_v44 }
 0x2e8   : > { %2921 = vst.msk [vmem:[%s4377_s20 + $0x1a0] sm:$0xf] %vm2816_vm4, %v2641_v37  ;;  %v5151_v51 = vmax.f32 %v1864_v50, 0.0 }
 0x2e9   : > { %2856 = vst.msk [vmem:[%s4377_s20 + $0x9c] sm:$0xf] %vm2816_vm4, %v2511_v45 }
 0x2ea   : > { %5803 = vst [vmem:[#allocation56_spill] sm:$0xff] %v5151_v51  ;;  %v2230_v48 = vpack.c.bf16 %v5151_v51, %v5151_v51  ;;  %v2020_v2 = vpop.f32.mrf.mxu3 }
 0x2eb   : > { %v2021_v41 = vadd.f32 %v5048_v13, %v2020_v2 }
 0x2ec   : > { %2664 = vrot.lane.b32.xlu2 %v2292_v29, %s3903_s17  ;;  %2540 = vrot.lane.b32.xlu0 %v2230_v48, %s3903_s17 }
 0x2ed   : > { %v1865_v25 = vpop.f32.mrf.mxu1  ;;  %v5162_v37 = vmax.f32 %v2021_v41, 0.0 }
 0x2ee   : > { %v1866_v50 = vadd.f32 %v5048_v13, %v1865_v25  ;;  %v2513_v31 = vpop.permute.xlu1 %2512  ;;  %v2637_v45 = vpop.permute.xlu0 %2636 }
 0x2ef   : > { %5804 = vst [vmem:[#allocation57_spill] sm:$0xff] %v5162_v37  ;;  %v2293_v29 = vpack.c.bf16 %v5162_v37, %v5162_v37 }
 0x2f0   : > { %2857 = vst.msk [vmem:[%s4377_s20 + $0xa0] sm:$0xf] %vm2816_vm4, %v2513_v31  ;;  %v5167_v44 = vmax.f32 %v1866_v50, 0.0 }
 0x2f1   : > { %2919 = vst.msk [vmem:[%s4377_s20 + $0x198] sm:$0xf] %vm2816_vm4, %v2637_v45 }
 0x2f2   : > { %5805 = vst [vmem:[#allocation58_spill] sm:$0xff] %v5167_v44  ;;  %v2231_v48 = vpack.c.bf16 %v5167_v44, %v5167_v44  ;;  %v2023_v2 = vpop.f32.mrf.mxu3 }
 0x2f3   : > { %v2024_v41 = vadd.f32 %v5048_v13, %v2023_v2 }
 0x2f4   : > { %2542 = vrot.lane.b32.xlu1 %v2231_v48, %s3903_s17  ;;  %2666 = vrot.lane.b32.xlu0 %v2293_v29, %s3903_s17 }
 0x2f5   : > { %v1868_v25 = vpop.f32.mrf.mxu1  ;;  %v5178_v31 = vmax.f32 %v2024_v41, 0.0 }
 0x2f6   : > { %v1869_v50 = vadd.f32 %v5048_v13, %v1868_v25  ;;  %v2521_v51 = vpop.permute.xlu2 %2520  ;;  %v2639_v45 = vpop.permute.xlu1 %2638 }
 0x2f7   : > { %5806 = vst [vmem:[#allocation59_spill] sm:$0xff] %v5178_v31  ;;  %v2294_v48 = vpack.c.bf16 %v5178_v31, %v5178_v31 }
 0x2f8   : > { %2861 = vst.msk [vmem:[%s4377_s20 + $0xb0] sm:$0xf] %vm2816_vm4, %v2521_v51  ;;  %v5183_v37 = vmax.f32 %v1869_v50, 0.0 }
 0x2f9   : > { %2920 = vst.msk [vmem:[%s4377_s20 + $0x19c] sm:$0xf] %vm2816_vm4, %v2639_v45 }
 0x2fa   : > { %5807 = vst [vmem:[#allocation60_spill] sm:$0xff] %v5183_v37  ;;  %v2232_v29 = vpack.c.bf16 %v5183_v37, %v5183_v37  ;;  %v2025_v2 = vpop.f32.mrf.mxu3 }
 0x2fb   : > { %v2026_v41 = vadd.f32 %v5048_v13, %v2025_v2 }
 0x2fc   : > { %2544 = vrot.lane.b32.xlu2 %v2232_v29, %s3903_s17  ;;  %2668 = vrot.lane.b32.xlu1 %v2294_v48, %s3903_s17 }
 0x2fd   : > { %v1870_v25 = vpop.f32.mrf.mxu1  ;;  %v5194_v51 = vmax.f32 %v2026_v41, 0.0 }
 0x2fe   : > { %v1871_v50 = vadd.f32 %v5048_v13, %v1870_v25  ;;  %v2647_v44 = vpop.permute.xlu2 %2646  ;;  %v2517_v45 = vpop.permute.xlu0 %2516 }
 0x2ff   : > { %5808 = vst [vmem:[#allocation61_spill] sm:$0xff] %v5194_v51  ;;  %v2295_v29 = vpack.c.bf16 %v5194_v51, %v5194_v51 }
 0x300   : > { %2924 = vst.msk [vmem:[%s4377_s20 + $0x1ac] sm:$0xf] %vm2816_vm4, %v2647_v44  ;;  %v5199_v31 = vmax.f32 %v1871_v50, 0.0 }
 0x301   : > { %2859 = vst.msk [vmem:[%s4377_s20 + $0xa8] sm:$0xf] %vm2816_vm4, %v2517_v45 }
 0x302   : > { %5809 = vst [vmem:[#allocation62_spill] sm:$0xff] %v5199_v31  ;;  %v2233_v48 = vpack.c.bf16 %v5199_v31, %v5199_v31  ;;  %v2028_v2 = vpop.f32.mrf.mxu3 }
 0x303   : > { %v2029_v41 = vadd.f32 %v5048_v13, %v2028_v2 }
 0x304   : > { %2670 = vrot.lane.b32.xlu2 %v2295_v29, %s3903_s17  ;;  %2546 = vrot.lane.b32.xlu0 %v2233_v48, %s3903_s17 }
 0x305   : > { %v1873_v25 = vpop.f32.mrf.mxu1  ;;  %v5210_v44 = vmax.f32 %v2029_v41, 0.0 }
 0x306   : > { %v1874_v50 = vadd.f32 %v5048_v13, %v1873_v25  ;;  %v2519_v37 = vpop.permute.xlu1 %2518  ;;  %v2643_v45 = vpop.permute.xlu0 %2642 }
 0x307   : > { %5810 = vst [vmem:[#allocation63_spill] sm:$0xff] %v5210_v44  ;;  %v2296_v29 = vpack.c.bf16 %v5210_v44, %v5210_v44 }
 0x308   : > { %2860 = vst.msk [vmem:[%s4377_s20 + $0xac] sm:$0xf] %vm2816_vm4, %v2519_v37  ;;  %v5215_v51 = vmax.f32 %v1874_v50, 0.0 }
 0x309   : > { %2922 = vst.msk [vmem:[%s4377_s20 + $0x1a4] sm:$0xf] %vm2816_vm4, %v2643_v45 }
 0x30a   : > { %5811 = vst [vmem:[#allocation64_spill] sm:$0xff] %v5215_v51  ;;  %v2234_v48 = vpack.c.bf16 %v5215_v51, %v5215_v51  ;;  %v2030_v2 = vpop.f32.mrf.mxu3 }
 0x30b   : > { %v2031_v41 = vadd.f32 %v5048_v13, %v2030_v2 }
 0x30c   : > { %2548 = vrot.lane.b32.xlu1 %v2234_v48, %s3903_s17  ;;  %2672 = vrot.lane.b32.xlu0 %v2296_v29, %s3903_s17 }
 0x30d   : > { %v1875_v25 = vpop.f32.mrf.mxu1  ;;  %v5226_v37 = vmax.f32 %v2031_v41, 0.0 }
 0x30e   : > { %v1876_v50 = vadd.f32 %v5048_v13, %v1875_v25  ;;  %v2527_v31 = vpop.permute.xlu2 %2526  ;;  %v2645_v45 = vpop.permute.xlu1 %2644 }
 0x30f   : > { %5812 = vst [vmem:[#allocation65_spill] sm:$0xff] %v5226_v37  ;;  %v2297_v48 = vpack.c.bf16 %v5226_v37, %v5226_v37 }
 0x310   : > { %2864 = vst.msk [vmem:[%s4377_s20 + $0xbc] sm:$0xf] %vm2816_vm4, %v2527_v31  ;;  %v5231_v44 = vmax.f32 %v1876_v50, 0.0 }
 0x311   : > { %2923 = vst.msk [vmem:[%s4377_s20 + $0x1a8] sm:$0xf] %vm2816_vm4, %v2645_v45 }
 0x312   : > { %5813 = vst [vmem:[#allocation66_spill] sm:$0xff] %v5231_v44  ;;  %v2235_v29 = vpack.c.bf16 %v5231_v44, %v5231_v44  ;;  %v2033_v2 = vpop.f32.mrf.mxu3 }
 0x313   : > { %v2034_v41 = vadd.f32 %v5048_v13, %v2033_v2 }
 0x314   : > { %2550 = vrot.lane.b32.xlu2 %v2235_v29, %s3903_s17  ;;  %2674 = vrot.lane.b32.xlu1 %v2297_v48, %s3903_s17 }
 0x315   : > { %v1878_v25 = vpop.f32.mrf.mxu1  ;;  %v5242_v31 = vmax.f32 %v2034_v41, 0.0 }
 0x316   : > { %v1879_v50 = vadd.f32 %v5048_v13, %v1878_v25  ;;  %v2653_v51 = vpop.permute.xlu2 %2652  ;;  %v2523_v45 = vpop.permute.xlu0 %2522 }
 0x317   : > { %5814 = vst [vmem:[#allocation67_spill] sm:$0xff] %v5242_v31  ;;  %v2298_v29 = vpack.c.bf16 %v5242_v31, %v5242_v31 }
 0x318   : > { %2927 = vst.msk [vmem:[%s4377_s20 + $0x1b8] sm:$0xf] %vm2816_vm4, %v2653_v51  ;;  %v5247_v37 = vmax.f32 %v1879_v50, 0.0 }
 0x319   : > { %2862 = vst.msk [vmem:[%s4377_s20 + $0xb4] sm:$0xf] %vm2816_vm4, %v2523_v45 }
 0x31a   : > { %5815 = vst [vmem:[#allocation68_spill] sm:$0xff] %v5247_v37  ;;  %v2236_v48 = vpack.c.bf16 %v5247_v37, %v5247_v37  ;;  %v2035_v2 = vpop.f32.mrf.mxu3 }
 0x31b   : > { %v2036_v41 = vadd.f32 %v5048_v13, %v2035_v2 }
 0x31c   : > { %2676 = vrot.lane.b32.xlu2 %v2298_v29, %s3903_s17  ;;  %2552 = vrot.lane.b32.xlu0 %v2236_v48, %s3903_s17 }
 0x31d   : > { %v1880_v25 = vpop.f32.mrf.mxu1  ;;  %v5258_v51 = vmax.f32 %v2036_v41, 0.0 }
 0x31e   : > { %v1881_v50 = vadd.f32 %v5048_v13, %v1880_v25  ;;  %v2525_v44 = vpop.permute.xlu1 %2524  ;;  %v2649_v45 = vpop.permute.xlu0 %2648 }
 0x31f   : > { %5816 = vst [vmem:[#allocation69_spill] sm:$0xff] %v5258_v51  ;;  %v2299_v29 = vpack.c.bf16 %v5258_v51, %v5258_v51 }
 0x320   : > { %2863 = vst.msk [vmem:[%s4377_s20 + $0xb8] sm:$0xf] %vm2816_vm4, %v2525_v44  ;;  %v5263_v31 = vmax.f32 %v1881_v50, 0.0 }
 0x321   : > { %2925 = vst.msk [vmem:[%s4377_s20 + $0x1b0] sm:$0xf] %vm2816_vm4, %v2649_v45 }
 0x322   : > { %5817 = vst [vmem:[#allocation70_spill] sm:$0xff] %v5263_v31  ;;  %v2237_v48 = vpack.c.bf16 %v5263_v31, %v5263_v31  ;;  %v2038_v2 = vpop.f32.mrf.mxu3 }
 0x323   : > { %v2039_v41 = vadd.f32 %v5048_v13, %v2038_v2 }
 0x324   : > { %2554 = vrot.lane.b32.xlu1 %v2237_v48, %s3903_s17  ;;  %2678 = vrot.lane.b32.xlu0 %v2299_v29, %s3903_s17 }
 0x325   : > { %v1883_v25 = vpop.f32.mrf.mxu1  ;;  %v5274_v44 = vmax.f32 %v2039_v41, 0.0 }
 0x326   : > { %v1884_v50 = vadd.f32 %v5048_v13, %v1883_v25  ;;  %v2533_v45 = vpop.permute.xlu2 %2532  ;;  %v2651_v37 = vpop.permute.xlu1 %2650 }
 0x327   : > { %5818 = vst [vmem:[#allocation71_spill] sm:$0xff] %v5274_v44  ;;  %v2300_v48 = vpack.c.bf16 %v5274_v44, %v5274_v44 }
 0x328   : > { %2867 = vst.msk [vmem:[%s4377_s20 + $0xc8] sm:$0xf] %vm2816_vm4, %v2533_v45  ;;  %v5279_v51 = vmax.f32 %v1884_v50, 0.0 }
 0x329   : > { %2926 = vst.msk [vmem:[%s4377_s20 + $0x1b4] sm:$0xf] %vm2816_vm4, %v2651_v37 }
 0x32a   : > { %5819 = vst [vmem:[#allocation72_spill] sm:$0xff] %v5279_v51  ;;  %v2238_v29 = vpack.c.bf16 %v5279_v51, %v5279_v51  ;;  %v2040_v2 = vpop.f32.mrf.mxu3 }
 0x32c   : > { %2556 = vrot.lane.b32.xlu2 %v2238_v29, %s3903_s17  ;;  %2680 = vrot.lane.b32.xlu1 %v2300_v48, %s3903_s17 }
 0x32d   : > { %v1885_v41 = vpop.f32.mrf.mxu1 }
 0x32e   : > { %v1886_v25 = vadd.f32 %v5048_v13, %v1885_v41  ;;  %v2659_v45 = vpop.permute.xlu2 %2658  ;;  %v2529_v50 = vpop.permute.xlu0 %2528 }
 0x32f   : > { %2930 = vst.msk [vmem:[%s4377_s20 + $0x1c4] sm:$0xf] %vm2816_vm4, %v2659_v45 }
 0x330   : > { %v5292_v37 = vmax.f32 %v1886_v25, 0.0  ;;  %2865 = vst.msk [vmem:[%s4377_s20 + $0xc0] sm:$0xf] %vm2816_vm4, %v2529_v50 }
 0x332   : > { %5820 = vst [vmem:[#allocation73_spill] sm:$0xff] %v5292_v37  ;;  %v2239_v44 = vpack.c.bf16 %v5292_v37, %v5292_v37  ;;  %v2043_v51 = vpop.f32.mrf.mxu3 }
 0x333   : > { %v2044_v29 = vadd.f32 %v5048_v13, %v2043_v51 }
 0x334   : > { %2558 = vrot.lane.b32.xlu0 %v2239_v44, %s3903_s17 }
 0x335   : > { %v1888_v48 = vpop.f32.mrf.mxu1  ;;  %v5300_v31 = vmax.f32 %v2044_v29, 0.0 }
 0x336   : > { %v1889_v41 = vadd.f32 %v5048_v13, %v1888_v48  ;;  %v2531_v60 = vpop.permute.xlu1 %2530  ;;  %v2655_v45 = vpop.permute.xlu0 %2654 }
 0x337   : > { %5821 = vst [vmem:[#allocation74_spill] sm:$0xff] %v5300_v31  ;;  %v2302_v51 = vpack.c.bf16 %v5300_v31, %v5300_v31 }
 0x338   : > { %2866 = vst.msk [vmem:[%s4377_s20 + $0xc4] sm:$0xf] %vm2816_vm4, %v2531_v60  ;;  %v5305_v25 = vmax.f32 %v1889_v41, 0.0 }
 0x339   : > { %2928 = vst.msk [vmem:[%s4377_s20 + $0x1bc] sm:$0xf] %vm2816_vm4, %v2655_v45 }
 0x33a   : > { %v2240_v44 = vpack.c.bf16 %v5305_v25, %v5305_v25  ;;  %v2045_v50 = vpop.f32.mrf.mxu3 }
 0x33b   : > { %v2046_v29 = vadd.f32 %v5048_v13, %v2045_v50 }
 0x33c   : > { %2560 = vrot.lane.b32.xlu1 %v2240_v44, %s3903_s17  ;;  %2684 = vrot.lane.b32.xlu0 %v2302_v51, %s3903_s17  ;;  %v2041_v44 = vadd.f32 %v5048_v13, %v2040_v2 }
 0x33d   : > { %v1890_v48 = vpop.f32.mrf.mxu1  ;;  %v5316_v60 = vmax.f32 %v2046_v29, 0.0 }
 0x33e   : > { %v1891_v41 = vadd.f32 %v5048_v13, %v1890_v48  ;;  %v2539_v45 = vpop.permute.xlu2 %2538  ;;  %v2657_v37 = vpop.permute.xlu1 %2656  ;;  %v5332_v29 = vmax.f32 %v2041_v44, 0.0 }
 0x33f   : > { %5822 = vst [vmem:[#allocation75_spill] sm:$0xff] %v5316_v60  ;;  %v2303_v51 = vpack.c.bf16 %v5316_v60, %v5316_v60 }
 0x340   : > { %2870 = vst.msk [vmem:[%s4377_s20 + $0xd4] sm:$0xf] %vm2816_vm4, %v2539_v45  ;;  %v5321_v31 = vmax.f32 %v1891_v41, 0.0  ;;  %v2301_v13 = vpack.c.bf16 %v5332_v29, %v5332_v29 }
 0x341   : > { %2929 = vst.msk [vmem:[%s4377_s20 + $0x1c0] sm:$0xf] %vm2816_vm4, %v2657_v37 }
 0x342   : > { %v2241_v50 = vpack.c.bf16 %v5321_v31, %v5321_v31 }
 0x344   : > { %2562 = vrot.lane.b32.xlu2 %v2241_v50, %s3903_s17  ;;  %2686 = vrot.lane.b32.xlu1 %v2303_v51, %s3903_s17 }
 0x346   : > { %v2665_v48 = vpop.permute.xlu2 %2664  ;;  %v2535_v37 = vpop.permute.xlu0 %2534 }
 0x347   : > { %2933 = vst.msk [vmem:[%s4377_s20 + $0x1d0] sm:$0xf] %vm2816_vm4, %v2665_v48 }
 0x348   : > { %2868 = vst.msk [vmem:[%s4377_s20 + $0xcc] sm:$0xf] %vm2816_vm4, %v2535_v37 }
 0x34c   : > { %2682 = vrot.lane.b32.xlu2 %v2301_v13, %s3903_s17 }
 0x34e   : > { %v2537_v2 = vpop.permute.xlu1 %2536  ;;  %v2661_v41 = vpop.permute.xlu0 %2660 }
 0x34f   : > { %2869 = vst.msk [vmem:[%s4377_s20 + $0xd0] sm:$0xf] %vm2816_vm4, %v2537_v2 }
 0x350   : > { %2931 = vst.msk [vmem:[%s4377_s20 + $0x1c8] sm:$0xf] %vm2816_vm4, %v2661_v41 }
 0x356   : > { %v2545_v45 = vpop.permute.xlu2 %2544  ;;  %v2663_v44 = vpop.permute.xlu1 %2662 }
 0x357   : > { %2873 = vst.msk [vmem:[%s4377_s20 + $0xe0] sm:$0xf] %vm2816_vm4, %v2545_v45 }
 0x358   : > { %2932 = vst.msk [vmem:[%s4377_s20 + $0x1cc] sm:$0xf] %vm2816_vm4, %v2663_v44 }
 0x35e   : > { %v2671_v51 = vpop.permute.xlu2 %2670  ;;  %v2541_v50 = vpop.permute.xlu0 %2540 }
 0x35f   : > { %2936 = vst.msk [vmem:[%s4377_s20 + $0x1dc] sm:$0xf] %vm2816_vm4, %v2671_v51 }
 0x360   : > { %2871 = vst.msk [vmem:[%s4377_s20 + $0xd8] sm:$0xf] %vm2816_vm4, %v2541_v50 }
 0x366   : > { %v2543_v48 = vpop.permute.xlu1 %2542  ;;  %v2667_v37 = vpop.permute.xlu0 %2666 }
 0x367   : > { %2872 = vst.msk [vmem:[%s4377_s20 + $0xdc] sm:$0xf] %vm2816_vm4, %v2543_v48 }
 0x368   : > { %2934 = vst.msk [vmem:[%s4377_s20 + $0x1d4] sm:$0xf] %vm2816_vm4, %v2667_v37 }
 0x36e   : > { %v2551_v13 = vpop.permute.xlu2 %2550  ;;  %v2669_v2 = vpop.permute.xlu1 %2668 }
 0x36f   : > { %2876 = vst.msk [vmem:[%s4377_s20 + $0xec] sm:$0xf] %vm2816_vm4, %v2551_v13 }
 0x370   : > { %2935 = vst.msk [vmem:[%s4377_s20 + $0x1d8] sm:$0xf] %vm2816_vm4, %v2669_v2 }
 0x376   : > { %v2677_v41 = vpop.permute.xlu2 %2676  ;;  %v2547_v45 = vpop.permute.xlu0 %2546 }
 0x377   : > { %2939 = vst.msk [vmem:[%s4377_s20 + $0x1e8] sm:$0xf] %vm2816_vm4, %v2677_v41 }
 0x378   : > { %2874 = vst.msk [vmem:[%s4377_s20 + $0xe4] sm:$0xf] %vm2816_vm4, %v2547_v45 }
 0x37e   : > { %v2549_v44 = vpop.permute.xlu1 %2548  ;;  %v2673_v51 = vpop.permute.xlu0 %2672 }
 0x37f   : > { %2875 = vst.msk [vmem:[%s4377_s20 + $0xe8] sm:$0xf] %vm2816_vm4, %v2549_v44 }
 0x380   : > { %2937 = vst.msk [vmem:[%s4377_s20 + $0x1e0] sm:$0xf] %vm2816_vm4, %v2673_v51 }
 0x386   : > { %v2557_v50 = vpop.permute.xlu2 %2556  ;;  %v2675_v48 = vpop.permute.xlu1 %2674 }
 0x387   : > { %2879 = vst.msk [vmem:[%s4377_s20 + $0xf8] sm:$0xf] %vm2816_vm4, %v2557_v50 }
 0x388   : > { %2938 = vst.msk [vmem:[%s4377_s20 + $0x1e4] sm:$0xf] %vm2816_vm4, %v2675_v48 }
 0x38e   : > { %v2553_v37 = vpop.permute.xlu0 %2552 }
 0x38f   : > { %2877 = vst.msk [vmem:[%s4377_s20 + $0xf0] sm:$0xf] %vm2816_vm4, %v2553_v37 }
 0x396   : > { %v2555_v13 = vpop.permute.xlu1 %2554  ;;  %v2679_v2 = vpop.permute.xlu0 %2678 }
 0x397   : > { %2878 = vst.msk [vmem:[%s4377_s20 + $0xf4] sm:$0xf] %vm2816_vm4, %v2555_v13 }
 0x398   : > { %2940 = vst.msk [vmem:[%s4377_s20 + $0x1ec] sm:$0xf] %vm2816_vm4, %v2679_v2 }
 0x39e   : > { %v2563_v41 = vpop.permute.xlu2 %2562  ;;  %v2681_v45 = vpop.permute.xlu1 %2680 }
 0x39f   : > { %2882 = vst.msk [vmem:[%s4377_s20 + $0x104] sm:$0xf] %vm2816_vm4, %v2563_v41 }
 0x3a0   : > { %2941 = vst.msk [vmem:[%s4377_s20 + $0x1f0] sm:$0xf] %vm2816_vm4, %v2681_v45 }
 0x3a6   : > { %v2683_v44 = vpop.permute.xlu2 %2682  ;;  %v2559_v51 = vpop.permute.xlu0 %2558 }
 0x3a7   : > { %2942 = vst.msk [vmem:[%s4377_s20 + $0x1f4] sm:$0xf] %vm2816_vm4, %v2683_v44 }
 0x3a8   : > { %2880 = vst.msk [vmem:[%s4377_s20 + $0xfc] sm:$0xf] %vm2816_vm4, %v2559_v51 }
 0x3ae   : > { %v2561_v50 = vpop.permute.xlu1 %2560  ;;  %v2685_v48 = vpop.permute.xlu0 %2684 }
 0x3af   : > { %2881 = vst.msk [vmem:[%s4377_s20 + $0x100] sm:$0xf] %vm2816_vm4, %v2561_v50 }
 0x3b0   : > { %2943 = vst.msk [vmem:[%s4377_s20 + $0x1f8] sm:$0xf] %vm2816_vm4, %v2685_v48 }
 0x3b3   : > { %2948 = sbr.rel (%p3734_p7) target bundleno = 954 (0x3ba), region = 44 }
 0x3b6   : > { %v2687_v37 = vpop.permute.xlu1 %2686 }
 0x3b7   : > { %2944 = vst.msk [vmem:[%s4377_s20 + $0x1fc] sm:$0xf] %vm2816_vm4, %v2687_v37 }
 0x3b8   : > { %vm2949_vm5 = vcmask 57344   ;;  %v3904_v13 = vmov 0.0  }
 0x3b9   : > { %2950 = vst.msk [vmem:[%s3978_s10] sm:$0x1] %vm2949_vm5, %v3904_v13 }
 0x3ba PF: > { %v2952_v2 = vsel %vm1522_vm3, %v4140_v49, 0.0  ;;  %v2953_v41 = vsel %vm1522_vm3, %v4154_v62, 0.0  ;;  %v2955_v45 = vsel %vm1522_vm3, %v4162_v9, 0.0  ;;  %v2957_v51 = vsel %vm1522_vm3, %v4176_v22, 0.0 }
 0x3bb   : > { %v2954_v44 = vadd.f32 %v2953_v41, %v2952_v2  ;;  %v2959_v48 = vsel %vm1522_vm3, %v4189_v38, 0.0  ;;  %v2961_v13 = vsel %vm1522_vm3, %v4209_v58, 0.0  ;;  %v2963_v49 = vsel %vm1522_vm3, %v4221_v10, 0.0 }
 0x3bc   : > { %v2965_v9 = vsel %vm1522_vm3, %v4241_v28, 0.0  ;;  %v2967_v22 = vsel %vm1522_vm3, %v4255_v47, 0.0  ;;  %v2969_v38 = vsel %vm1522_vm3, %v4275_v5, 0.0  ;;  %v2971_v58 = vsel %vm1522_vm3, %v4289_v24, 0.0 }
 0x3bd   : > { %v2956_v50 = vadd.f32 %v2955_v45, %v2954_v44  ;;  %v2973_v10 = vsel %vm1522_vm3, %v4309_v52, 0.0  ;;  %v2975_v28 = vsel %vm1522_vm3, %v4323_v8, 0.0  ;;  %v2977_v47 = vsel %vm1522_vm3, %v4343_v34, 0.0 }
 0x3be   : > { %v2979_v5 = vsel %vm1522_vm3, %v4357_v59, 0.0  ;;  %v2981_v24 = vsel %vm1522_vm3, %v4384_v23, 0.0  ;;  %v2983_v52 = vsel %vm1522_vm3, %v4400_v55, 0.0  ;;  %v2985_v8 = vsel %vm1522_vm3, %v4424_v27, 0.0 }
 0x3bf   : > { %v2958_v37 = vadd.f32 %v2957_v51, %v2956_v50  ;;  %v2987_v34 = vsel %vm1522_vm3, %v4447_v0, 0.0  ;;  %v2989_v59 = vsel %vm1522_vm3, %v4473_v39, 0.0  ;;  %v2991_v23 = vsel %vm1522_vm3, %v4489_v15, 0.0 }
 0x3c0   : > { %v2993_v55 = vsel %vm1522_vm3, %v4511_v3, 0.0  ;;  %v2995_v27 = vsel %vm1522_vm3, %v4531_v53, 0.0  ;;  %v2997_v0 = vsel %vm1522_vm3, %v4555_v46, 0.0  ;;  %v2999_v39 = vsel %vm1522_vm3, %v4573_v42, 0.0 }
 0x3c1   : > { %v2960_v60 = vadd.f32 %v2959_v48, %v2958_v37  ;;  %v3001_v15 = vsel %vm1522_vm3, %v4600_v35, 0.0  ;;  %v3003_v3 = vsel %vm1522_vm3, %v4618_v54, 0.0  ;;  %v3005_v53 = vsel %vm1522_vm3, %v4642_v43, 0.0 }
 0x3c2   : > { %v3007_v46 = vsel %vm1522_vm3, %v4662_v26, 0.0  ;;  %v3009_v42 = vsel %vm1522_vm3, %v4686_v1, 0.0  ;;  %v3011_v35 = vsel %vm1522_vm3, %v4704_v20, 0.0  ;;  %v3013_v54 = vsel %vm1522_vm3, %v4722_v63, 0.0 }
 0x3c3   : > { %v2962_v62 = vadd.f32 %v2961_v13, %v2960_v60  ;;  %v3015_v43 = vsel %vm1522_vm3, %v4740_v12, 0.0  ;;  %v3017_v26 = vsel %vm1522_vm3, %v4760_v36, 0.0  ;;  %v3019_v1 = vsel %vm1522_vm3, %v4780_v56, 0.0 }
 0x3c4   : > { %v3021_v20 = vsel %vm1522_vm3, %v4800_v57, 0.0  ;;  %v3023_v63 = vsel %vm1522_vm3, %v4818_v4, 0.0  ;;  %v3025_v12 = vsel %vm1522_vm3, %v4836_v11, 0.0  ;;  %v3027_v36 = vsel %vm1522_vm3, %v4854_v21, 0.0 }
 0x3c5   : > { %v2964_v2 = vadd.f32 %v2963_v49, %v2962_v62  ;;  %v3029_v56 = vsel %vm1522_vm3, %v4874_v16, 0.0  ;;  %v3031_v57 = vsel %vm1522_vm3, %v4899_v18, 0.0  ;;  %v3033_v4 = vsel %vm1522_vm3, %v4919_v61, 0.0 }
 0x3c6   : > { %v3035_v11 = vsel %vm1522_vm3, %v4937_v7, 0.0  ;;  %v3037_v21 = vsel %vm1522_vm3, %v4955_v40, 0.0  ;;  %v3043_v61 = vsel %vm1522_vm3, %v5013_v30, 0.0  ;;  %v3045_v7 = vsel %vm1522_vm3, %v5032_v14, 0.0 }
 0x3c7   : > { %v2966_v41 = vadd.f32 %v2965_v9, %v2964_v2  ;;  %v3047_v40 = vsel %vm1522_vm3, %v5053_v19, 0.0  ;;  %v3053_v30 = vsel %vm1522_vm3, %v5103_v6, 0.0  ;;  %v3055_v14 = vsel %vm1522_vm3, %v5119_v32, 0.0 }
 0x3c8   : > { %vm3214_vm6 = vcmask 57344  }
 0x3c9   : > { %v2968_v45 = vadd.f32 %v2967_v22, %v2966_v41 }
 0x3cb   : > { %v2970_v44 = vadd.f32 %v2969_v38, %v2968_v45 }
 0x3cd   : > { %v2972_v60 = vadd.f32 %v2971_v58, %v2970_v44 }
 0x3cf   : > { %v2974_v51 = vadd.f32 %v2973_v10, %v2972_v60 }
 0x3d1   : > { %v2976_v50 = vadd.f32 %v2975_v28, %v2974_v51 }
 0x3d3   : > { %v2978_v48 = vadd.f32 %v2977_v47, %v2976_v50 }
 0x3d5   : > { %v2980_v37 = vadd.f32 %v2979_v5, %v2978_v48 }
 0x3d7   : > { %v2982_v13 = vadd.f32 %v2981_v24, %v2980_v37 }
 0x3d9   : > { %v2984_v49 = vadd.f32 %v2983_v52, %v2982_v13 }
 0x3db   : > { %v2986_v62 = vadd.f32 %v2985_v8, %v2984_v49 }
 0x3dd   : > { %v2988_v9 = vadd.f32 %v2987_v34, %v2986_v62 }
 0x3df   : > { %v2990_v2 = vadd.f32 %v2989_v59, %v2988_v9  ;;  %v5823_v9 = vld [vmem:[#allocation43_spill] sm:$0xff] }
 0x3e0   : > { %v3039_v16 = vsel %vm1522_vm3, %v5823_v9, 0.0 }
 0x3e1   : > { %v2992_v22 = vadd.f32 %v2991_v23, %v2990_v2  ;;  %v5824_v2 = vld [vmem:[#allocation45_spill] sm:$0xff] }
 0x3e2   : > { %v3041_v18 = vsel %vm1522_vm3, %v5824_v2, 0.0 }
 0x3e3   : > { %v2994_v41 = vadd.f32 %v2993_v55, %v2992_v22 }
 0x3e5   : > { %v2996_v38 = vadd.f32 %v2995_v27, %v2994_v41 }
 0x3e7   : > { %v2998_v45 = vadd.f32 %v2997_v0, %v2996_v38  ;;  %v3049_v0 = vsel %vm1522_vm3, %v5071_v33, 0.0 }
 0x3e9   : > { %v3000_v58 = vadd.f32 %v2999_v39, %v2998_v45  ;;  %v3051_v39 = vsel %vm1522_vm3, %v5087_v17, 0.0 }
 0x3eb   : > { %v3002_v44 = vadd.f32 %v3001_v15, %v3000_v58 }
 0x3ed   : > { %v3004_v10 = vadd.f32 %v3003_v3, %v3002_v44  ;;  %v5825_v3 = vld [vmem:[#allocation54_spill] sm:$0xff] }
 0x3ee   : > { %v3057_v19 = vsel %vm1522_vm3, %v5825_v3, 0.0 }
 0x3ef   : > { %v3006_v60 = vadd.f32 %v3005_v53, %v3004_v10  ;;  %v5826_v53 = vld [vmem:[#allocation56_spill] sm:$0xff] }
 0x3f0   : > { %v3059_v33 = vsel %vm1522_vm3, %v5826_v53, 0.0 }
 0x3f1   : > { %v3008_v28 = vadd.f32 %v3007_v46, %v3006_v60  ;;  %v5827_v46 = vld [vmem:[#allocation58_spill] sm:$0xff] }
 0x3f2   : > { %v3061_v17 = vsel %vm1522_vm3, %v5827_v46, 0.0 }
 0x3f3   : > { %v3010_v51 = vadd.f32 %v3009_v42, %v3008_v28  ;;  %v5828_v42 = vld [vmem:[#allocation60_spill] sm:$0xff] }
 0x3f4   : > { %v3063_v6 = vsel %vm1522_vm3, %v5828_v42, 0.0 }
 0x3f5   : > { %v3012_v47 = vadd.f32 %v3011_v35, %v3010_v51  ;;  %v5829_v35 = vld [vmem:[#allocation62_spill] sm:$0xff] }
 0x3f6   : > { %v3065_v32 = vsel %vm1522_vm3, %v5829_v35, 0.0 }
 0x3f7   : > { %v3014_v50 = vadd.f32 %v3013_v54, %v3012_v47  ;;  %v5830_v54 = vld [vmem:[#allocation64_spill] sm:$0xff] }
 0x3f8   : > { %v3067_v47 = vsel %vm1522_vm3, %v5830_v54, 0.0 }
 0x3f9   : > { %v3016_v5 = vadd.f32 %v3015_v43, %v3014_v50  ;;  %v5831_v50 = vld [vmem:[#allocation66_spill] sm:$0xff] }
 0x3fb   : > { %v3018_v48 = vadd.f32 %v3017_v26, %v3016_v5  ;;  %v3069_v26 = vsel %vm1522_vm3, %v5831_v50, 0.0 }
 0x3fd   : > { %v3020_v24 = vadd.f32 %v3019_v1, %v3018_v48  ;;  %v5832_v1 = vld [vmem:[#allocation68_spill] sm:$0xff] }
 0x3fe   : > { %v3071_v48 = vsel %vm1522_vm3, %v5832_v1, 0.0 }
 0x3ff   : > { %v3022_v37 = vadd.f32 %v3021_v20, %v3020_v24  ;;  %v5833_v24 = vld [vmem:[#allocation70_spill] sm:$0xff] }
 0x401   : > { %v3024_v52 = vadd.f32 %v3023_v63, %v3022_v37  ;;  %v3073_v63 = vsel %vm1522_vm3, %v5833_v24, 0.0 }
 0x403   : > { %v3026_v13 = vadd.f32 %v3025_v12, %v3024_v52  ;;  %v5834_v12 = vld [vmem:[#allocation72_spill] sm:$0xff] }
 0x404   : > { %v3075_v52 = vsel %vm1522_vm3, %v5834_v12, 0.0 }
 0x405   : > { %v3028_v8 = vadd.f32 %v3027_v36, %v3026_v13  ;;  %v5835_v13 = vld [vmem:[#allocation73_spill] sm:$0xff] }
 0x407   : > { %v3030_v49 = vadd.f32 %v3029_v56, %v3028_v8  ;;  %v3077_v56 = vsel %vm1522_vm3, %v5835_v13, 0.0 }
 0x409   : > { %v3032_v34 = vadd.f32 %v3031_v57, %v3030_v49  ;;  %v3079_v57 = vsel %vm1522_vm3, %v5305_v25, 0.0 }
 0x40b   : > { %v3034_v62 = vadd.f32 %v3033_v4, %v3032_v34  ;;  %v3081_v4 = vsel %vm1522_vm3, %v5321_v31, 0.0 }
 0x40d   : > { %v3036_v59 = vadd.f32 %v3035_v11, %v3034_v62  ;;  %v5836_v11 = vld [vmem:[#allocation2_spill] sm:$0xff] }
 0x40e   : > { %v3083_v62 = vsel %vm1522_vm3, %v5836_v11, 0.0  ;;  %v5857_v11 = vld [vmem:[#allocation23_spill] sm:$0xff] }
 0x40f   : > { %v3038_v23 = vadd.f32 %v3037_v21, %v3036_v59  ;;  %v5837_v59 = vld [vmem:[#allocation3_spill] sm:$0xff] }
 0x410   : > { %v3085_v9 = vsel %vm1522_vm3, %v5837_v59, 0.0  ;;  %v5858_v59 = vld [vmem:[#allocation24_spill] sm:$0xff] }
 0x411   : > { %v3040_v55 = vadd.f32 %v3039_v16, %v3038_v23  ;;  %v5838_v23 = vld [vmem:[#allocation4_spill] sm:$0xff] }
 0x412   : > { %v3087_v2 = vsel %vm1522_vm3, %v5838_v23, 0.0  ;;  %v5859_v23 = vld [vmem:[#allocation25_spill] sm:$0xff] }
 0x413   : > { %v3042_v22 = vadd.f32 %v3041_v18, %v3040_v55  ;;  %v5839_v55 = vld [vmem:[#allocation5_spill] sm:$0xff] }
 0x414   : > { %v3089_v25 = vsel %vm1522_vm3, %v5839_v55, 0.0  ;;  %v5860_v55 = vld [vmem:[#allocation26_spill] sm:$0xff] }
 0x415   : > { %v3044_v27 = vadd.f32 %v3043_v61, %v3042_v22  ;;  %v5840_v22 = vld [vmem:[#allocation6_spill] sm:$0xff] }
 0x416   : > { %v3091_v31 = vsel %vm1522_vm3, %v5840_v22, 0.0  ;;  %v5861_v22 = vld [vmem:[#allocation27_spill] sm:$0xff] }
 0x417   : > { %v3046_v41 = vadd.f32 %v3045_v7, %v3044_v27  ;;  %v5841_v27 = vld [vmem:[#allocation7_spill] sm:$0xff] }
 0x419   : > { %v3048_v38 = vadd.f32 %v3047_v40, %v3046_v41  ;;  %v3093_v40 = vsel %vm1522_vm3, %v5841_v27, 0.0  ;;  %v5862_v27 = vld [vmem:[#allocation28_spill] sm:$0xff] }
 0x41b   : > { %v3050_v45 = vadd.f32 %v3049_v0, %v3048_v38  ;;  %v5842_v0 = vld [vmem:[#allocation8_spill] sm:$0xff] }
 0x41c   : > { %v3095_v38 = vsel %vm1522_vm3, %v5842_v0, 0.0  ;;  %v5863_v0 = vld [vmem:[#allocation29_spill] sm:$0xff] }
 0x41d   : > { %v3052_v15 = vadd.f32 %v3051_v39, %v3050_v45  ;;  %v5843_v45 = vld [vmem:[#allocation9_spill] sm:$0xff] }
 0x41f   : > { %v3054_v58 = vadd.f32 %v3053_v30, %v3052_v15  ;;  %v3097_v30 = vsel %vm1522_vm3, %v5843_v45, 0.0  ;;  %v5864_v45 = vld [vmem:[#allocation30_spill] sm:$0xff] }
 0x421   : > { %v3056_v44 = vadd.f32 %v3055_v14, %v3054_v58  ;;  %v5844_v14 = vld [vmem:[#allocation10_spill] sm:$0xff] }
 0x422   : > { %v3099_v58 = vsel %vm1522_vm3, %v5844_v14, 0.0  ;;  %v5865_v14 = vld [vmem:[#allocation31_spill] sm:$0xff] }
 0x423   : > { %v3058_v10 = vadd.f32 %v3057_v19, %v3056_v44  ;;  %v5845_v19 = vld [vmem:[#allocation11_spill] sm:$0xff] }
 0x424   : > { %v3101_v44 = vsel %vm1522_vm3, %v5845_v19, 0.0  ;;  %v5866_v19 = vld [vmem:[#allocation32_spill] sm:$0xff] }
 0x425   : > { %v3060_v60 = vadd.f32 %v3059_v33, %v3058_v10  ;;  %v5846_v33 = vld [vmem:[#allocation12_spill] sm:$0xff] }
 0x426   : > { %v3103_v10 = vsel %vm1522_vm3, %v5846_v33, 0.0  ;;  %v5867_v33 = vld [vmem:[#allocation33_spill] sm:$0xff] }
 0x427   : > { %v3062_v28 = vadd.f32 %v3061_v17, %v3060_v60  ;;  %v5847_v17 = vld [vmem:[#allocation13_spill] sm:$0xff] }
 0x428   : > { %v3105_v60 = vsel %vm1522_vm3, %v5847_v17, 0.0  ;;  %v5868_v17 = vld [vmem:[#allocation34_spill] sm:$0xff] }
 0x429   : > { %v3064_v51 = vadd.f32 %v3063_v6, %v3062_v28  ;;  %v5848_v6 = vld [vmem:[#allocation14_spill] sm:$0xff] }
 0x42a   : > { %v3107_v28 = vsel %vm1522_vm3, %v5848_v6, 0.0  ;;  %v5869_v6 = vld [vmem:[#allocation35_spill] sm:$0xff] }
 0x42b   : > { %v3066_v43 = vadd.f32 %v3065_v32, %v3064_v51  ;;  %v5849_v32 = vld [vmem:[#allocation15_spill] sm:$0xff] }
 0x42c   : > { %v3109_v51 = vsel %vm1522_vm3, %v5849_v32, 0.0  ;;  %v5870_v32 = vld [vmem:[#allocation36_spill] sm:$0xff] }
 0x42d   : > { %v3068_v5 = vadd.f32 %v3067_v47, %v3066_v43  ;;  %v5850_v47 = vld [vmem:[#allocation16_spill] sm:$0xff] }
 0x42e   : > { %v3111_v43 = vsel %vm1522_vm3, %v5850_v47, 0.0  ;;  %v5871_v47 = vld [vmem:[#allocation37_spill] sm:$0xff] }
 0x42f   : > { %v3070_v20 = vadd.f32 %v3069_v26, %v3068_v5  ;;  %v5851_v26 = vld [vmem:[#allocation17_spill] sm:$0xff] }
 0x430   : > { %v3113_v5 = vsel %vm1522_vm3, %v5851_v26, 0.0  ;;  %v5872_v26 = vld [vmem:[#allocation38_spill] sm:$0xff] }
 0x431   : > { %v3072_v37 = vadd.f32 %v3071_v48, %v3070_v20  ;;  %v5852_v48 = vld [vmem:[#allocation18_spill] sm:$0xff] }
 0x432   : > { %v3115_v20 = vsel %vm1522_vm3, %v5852_v48, 0.0  ;;  %v5873_v48 = vld [vmem:[#allocation39_spill] sm:$0xff] }
 0x433   : > { %v3074_v36 = vadd.f32 %v3073_v63, %v3072_v37  ;;  %v5853_v63 = vld [vmem:[#allocation19_spill] sm:$0xff] }
 0x434   : > { %v3117_v37 = vsel %vm1522_vm3, %v5853_v63, 0.0  ;;  %v5874_v63 = vld [vmem:[#allocation40_spill] sm:$0xff] }
 0x435   : > { %v3076_v8 = vadd.f32 %v3075_v52, %v3074_v36  ;;  %v5854_v52 = vld [vmem:[#allocation20_spill] sm:$0xff] }
 0x436   : > { %v3119_v36 = vsel %vm1522_vm3, %v5854_v52, 0.0  ;;  %v5875_v52 = vld [vmem:[#allocation41_spill] sm:$0xff] }
 0x437   : > { %v3078_v49 = vadd.f32 %v3077_v56, %v3076_v8  ;;  %v5855_v56 = vld [vmem:[#allocation21_spill] sm:$0xff] }
 0x438   : > { %v3121_v8 = vsel %vm1522_vm3, %v5855_v56, 0.0  ;;  %v5876_v56 = vld [vmem:[#allocation42_spill] sm:$0xff] }
 0x439   : > { %v3080_v34 = vadd.f32 %v3079_v57, %v3078_v49  ;;  %v5856_v49 = vld [vmem:[#allocation22_spill] sm:$0xff] }
 0x43b   : > { %v3082_v21 = vadd.f32 %v3081_v4, %v3080_v34  ;;  %v3123_v4 = vsel %vm1522_vm3, %v5856_v49, 0.0  ;;  %v5877_v49 = vld [vmem:[#allocation44_spill] sm:$0xff] }
 0x43d   : > { %v3084_v16 = vadd.f32 %v3083_v62, %v3082_v21  ;;  %v3125_v62 = vsel %vm1522_vm3, %v5857_v11, 0.0  ;;  %v5878_v11 = vld [vmem:[#allocation46_spill] sm:$0xff] }
 0x43f   : > { %v3086_v18 = vadd.f32 %v3085_v9, %v3084_v16  ;;  %v3127_v9 = vsel %vm1522_vm3, %v5858_v59, 0.0  ;;  %v5879_v59 = vld [vmem:[#allocation47_spill] sm:$0xff] }
 0x441   : > { %v3088_v61 = vadd.f32 %v3087_v2, %v3086_v18  ;;  %v3129_v2 = vsel %vm1522_vm3, %v5859_v23, 0.0  ;;  %v5880_v23 = vld [vmem:[#allocation48_spill] sm:$0xff] }
 0x443   : > { %v3090_v7 = vadd.f32 %v3089_v25, %v3088_v61  ;;  %v3131_v25 = vsel %vm1522_vm3, %v5860_v55, 0.0  ;;  %v5881_v55 = vld [vmem:[#allocation49_spill] sm:$0xff] }
 0x445   : > { %v3092_v41 = vadd.f32 %v3091_v31, %v3090_v7  ;;  %v3133_v31 = vsel %vm1522_vm3, %v5861_v22, 0.0  ;;  %v5882_v22 = vld [vmem:[#allocation50_spill] sm:$0xff] }
 0x447   : > { %v3094_v39 = vadd.f32 %v3093_v40, %v3092_v41  ;;  %v3135_v40 = vsel %vm1522_vm3, %v5862_v27, 0.0  ;;  %v5883_v27 = vld [vmem:[#allocation51_spill] sm:$0xff] }
 0x449   : > { %v3096_v15 = vadd.f32 %v3095_v38, %v3094_v39  ;;  %v3137_v38 = vsel %vm1522_vm3, %v5863_v0, 0.0  ;;  %v5884_v0 = vld [vmem:[#allocation52_spill] sm:$0xff] }
 0x44b   : > { %v3098_v3 = vadd.f32 %v3097_v30, %v3096_v15  ;;  %v3139_v30 = vsel %vm1522_vm3, %v5864_v45, 0.0  ;;  %v5885_v45 = vld [vmem:[#allocation53_spill] sm:$0xff] }
 0x44d   : > { %v3100_v53 = vadd.f32 %v3099_v58, %v3098_v3  ;;  %v3141_v58 = vsel %vm1522_vm3, %v5865_v14, 0.0  ;;  %v5886_v14 = vld [vmem:[#allocation55_spill] sm:$0xff] }
 0x44f   : > { %v3102_v46 = vadd.f32 %v3101_v44, %v3100_v53  ;;  %v3143_v44 = vsel %vm1522_vm3, %v5866_v19, 0.0  ;;  %v5887_v19 = vld [vmem:[#allocation57_spill] sm:$0xff] }
 0x451   : > { %v3104_v42 = vadd.f32 %v3103_v10, %v3102_v46  ;;  %v3145_v10 = vsel %vm1522_vm3, %v5867_v33, 0.0  ;;  %v5888_v33 = vld [vmem:[#allocation59_spill] sm:$0xff] }
 0x453   : > { %v3106_v35 = vadd.f32 %v3105_v60, %v3104_v42  ;;  %v3147_v60 = vsel %vm1522_vm3, %v5868_v17, 0.0  ;;  %v5889_v17 = vld [vmem:[#allocation61_spill] sm:$0xff] }
 0x455   : > { %v3108_v54 = vadd.f32 %v3107_v28, %v3106_v35  ;;  %v3149_v28 = vsel %vm1522_vm3, %v5869_v6, 0.0  ;;  %v5890_v6 = vld [vmem:[#allocation63_spill] sm:$0xff] }
 0x457   : > { %v3110_v50 = vadd.f32 %v3109_v51, %v3108_v54  ;;  %v3151_v51 = vsel %vm1522_vm3, %v5870_v32, 0.0  ;;  %v5891_v32 = vld [vmem:[#allocation65_spill] sm:$0xff] }
 0x459   : > { %v3112_v1 = vadd.f32 %v3111_v43, %v3110_v50  ;;  %v3153_v43 = vsel %vm1522_vm3, %v5871_v47, 0.0  ;;  %v5892_v47 = vld [vmem:[#allocation67_spill] sm:$0xff] }
 0x45b   : > { %v3114_v24 = vadd.f32 %v3113_v5, %v3112_v1  ;;  %v3155_v5 = vsel %vm1522_vm3, %v5872_v26, 0.0  ;;  %v5893_v26 = vld [vmem:[#allocation69_spill] sm:$0xff] }
 0x45d   : > { %v3116_v12 = vadd.f32 %v3115_v20, %v3114_v24  ;;  %v3157_v20 = vsel %vm1522_vm3, %v5873_v48, 0.0  ;;  %v5894_v48 = vld [vmem:[#allocation71_spill] sm:$0xff] }
 0x45f   : > { %v3118_v13 = vadd.f32 %v3117_v37, %v3116_v12  ;;  %v3159_v37 = vsel %vm1522_vm3, %v5874_v63, 0.0  ;;  %v3201_v63 = vsel %vm1522_vm3, %v5332_v29, 0.0 }
 0x461   : > { %v3120_v57 = vadd.f32 %v3119_v36, %v3118_v13  ;;  %v3161_v36 = vsel %vm1522_vm3, %v5875_v52, 0.0 }
 0x463   : > { %v3122_v34 = vadd.f32 %v3121_v8, %v3120_v57  ;;  %v3163_v8 = vsel %vm1522_vm3, %v5876_v56, 0.0 }
 0x465   : > { %v3124_v21 = vadd.f32 %v3123_v4, %v3122_v34  ;;  %v3165_v4 = vsel %vm1522_vm3, %v5877_v49, 0.0 }
 0x467   : > { %v3126_v16 = vadd.f32 %v3125_v62, %v3124_v21  ;;  %v3167_v62 = vsel %vm1522_vm3, %v5878_v11, 0.0 }
 0x469   : > { %v3128_v18 = vadd.f32 %v3127_v9, %v3126_v16  ;;  %v3169_v9 = vsel %vm1522_vm3, %v5879_v59, 0.0 }
 0x46b   : > { %v3130_v61 = vadd.f32 %v3129_v2, %v3128_v18  ;;  %v3171_v2 = vsel %vm1522_vm3, %v5880_v23, 0.0 }
 0x46d   : > { %v3132_v7 = vadd.f32 %v3131_v25, %v3130_v61  ;;  %v3173_v25 = vsel %vm1522_vm3, %v5881_v55, 0.0 }
 0x46f   : > { %v3134_v41 = vadd.f32 %v3133_v31, %v3132_v7  ;;  %v3175_v31 = vsel %vm1522_vm3, %v5882_v22, 0.0 }
 0x471   : > { %v3136_v39 = vadd.f32 %v3135_v40, %v3134_v41  ;;  %v3177_v40 = vsel %vm1522_vm3, %v5883_v27, 0.0 }
 0x473   : > { %v3138_v15 = vadd.f32 %v3137_v38, %v3136_v39  ;;  %v3179_v38 = vsel %vm1522_vm3, %v5884_v0, 0.0 }
 0x475   : > { %v3140_v3 = vadd.f32 %v3139_v30, %v3138_v15  ;;  %v3181_v30 = vsel %vm1522_vm3, %v5885_v45, 0.0 }
 0x477   : > { %v3142_v53 = vadd.f32 %v3141_v58, %v3140_v3  ;;  %v3183_v58 = vsel %vm1522_vm3, %v5886_v14, 0.0 }
 0x479   : > { %v3144_v46 = vadd.f32 %v3143_v44, %v3142_v53  ;;  %v3185_v44 = vsel %vm1522_vm3, %v5887_v19, 0.0 }
 0x47b   : > { %v3146_v42 = vadd.f32 %v3145_v10, %v3144_v46  ;;  %v3187_v10 = vsel %vm1522_vm3, %v5888_v33, 0.0 }
 0x47d   : > { %v3148_v35 = vadd.f32 %v3147_v60, %v3146_v42  ;;  %v3189_v60 = vsel %vm1522_vm3, %v5889_v17, 0.0 }
 0x47f   : > { %v3150_v54 = vadd.f32 %v3149_v28, %v3148_v35  ;;  %v3191_v28 = vsel %vm1522_vm3, %v5890_v6, 0.0 }
 0x481   : > { %v3152_v50 = vadd.f32 %v3151_v51, %v3150_v54  ;;  %v3193_v51 = vsel %vm1522_vm3, %v5891_v32, 0.0 }
 0x483   : > { %v3154_v1 = vadd.f32 %v3153_v43, %v3152_v50  ;;  %v3195_v43 = vsel %vm1522_vm3, %v5892_v47, 0.0 }
 0x485   : > { %v3156_v24 = vadd.f32 %v3155_v5, %v3154_v1  ;;  %v3197_v5 = vsel %vm1522_vm3, %v5893_v26, 0.0 }
 0x487   : > { %v3158_v12 = vadd.f32 %v3157_v20, %v3156_v24  ;;  %v3199_v20 = vsel %vm1522_vm3, %v5894_v48, 0.0 }
 0x489   : > { %v3160_v13 = vadd.f32 %v3159_v37, %v3158_v12  ;;  %v5895_v12 = vld [vmem:[#allocation74_spill] sm:$0xff] }
 0x48a   : > { %v3203_v52 = vsel %vm1522_vm3, %v5895_v12, 0.0 }
 0x48b   : > { %v3162_v57 = vadd.f32 %v3161_v36, %v3160_v13  ;;  %v5896_v13 = vld [vmem:[#allocation75_spill] sm:$0xff] }
 0x48c   : > { %v3205_v56 = vsel %vm1522_vm3, %v5896_v13, 0.0 }
 0x48d   : > { %v3164_v34 = vadd.f32 %v3163_v8, %v3162_v57 }
 0x48f   : > { %v3166_v21 = vadd.f32 %v3165_v4, %v3164_v34 }
 0x491   : > { %v3168_v16 = vadd.f32 %v3167_v62, %v3166_v21  ;;  %v2951_v21 = vld [vmem:[%s3978_s10] sm:$0x1] }
 0x493   : > { %v3170_v18 = vadd.f32 %v3169_v9, %v3168_v16 }
 0x495   : > { %v3172_v61 = vadd.f32 %v3171_v2, %v3170_v18 }
 0x497   : > { %v3174_v7 = vadd.f32 %v3173_v25, %v3172_v61 }
 0x499   : > { %v3176_v41 = vadd.f32 %v3175_v31, %v3174_v7 }
 0x49b   : > { %v3178_v39 = vadd.f32 %v3177_v40, %v3176_v41 }
 0x49d   : > { %v3180_v15 = vadd.f32 %v3179_v38, %v3178_v39 }
 0x49f   : > { %v3182_v3 = vadd.f32 %v3181_v30, %v3180_v15 }
 0x4a1   : > { %v3184_v53 = vadd.f32 %v3183_v58, %v3182_v3 }
 0x4a3   : > { %v3186_v46 = vadd.f32 %v3185_v44, %v3184_v53 }
 0x4a5   : > { %v3188_v42 = vadd.f32 %v3187_v10, %v3186_v46 }
 0x4a7   : > { %v3190_v35 = vadd.f32 %v3189_v60, %v3188_v42 }
 0x4a9   : > { %v3192_v54 = vadd.f32 %v3191_v28, %v3190_v35 }
 0x4ab   : > { %v3194_v50 = vadd.f32 %v3193_v51, %v3192_v54 }
 0x4ad   : > { %v3196_v1 = vadd.f32 %v3195_v43, %v3194_v50 }
 0x4af   : > { %v3198_v24 = vadd.f32 %v3197_v5, %v3196_v1 }
 0x4b1   : > { %v3200_v37 = vadd.f32 %v3199_v20, %v3198_v24 }
 0x4b3   : > { %v3202_v36 = vadd.f32 %v3201_v63, %v3200_v37 }
 0x4b5   : > { %v3204_v8 = vadd.f32 %v3203_v52, %v3202_v36 }
 0x4b7   : > { %v3206_v57 = vadd.f32 %v3205_v56, %v3204_v8 }
 0x4b9   : > { %v3207_v49 = vrot.slane %v3206_v57, 4 }
 0x4bb   : > { %v3208_v4 = vadd.f32 %v3207_v49, %v3206_v57 }
 0x4bd   : > { %v3209_v34 = vrot.slane %v3208_v4, 2 }
 0x4bf   : > { %v3210_v11 = vadd.f32 %v3209_v34, %v3208_v4 }
 0x4c1   : > { %v3211_v62 = vrot.slane %v3210_v11, 1 }
 0x4c3   : > { %v3212_v59 = vadd.f32 %v3211_v62, %v3210_v11 }
 0x4c5   : > { %v3213_v29 = vadd.f32 %v3212_v59, %v2951_v21 }
 0x4c7   : > { %3215 = vst.msk [vmem:[%s3978_s10] sm:$0x1] %vm3214_vm6, %v3213_v29 }
 0x4c8 PF: > { %s17_s25 = sadd.s32 1, %s3900_s25   ;;  %s5897_s21 = smov %s3892_s23 }
 0x4c9   : > { %p14_p8 = scmp.ge.s32.totalorder %s17_s25, 6   ;;  %s5898_s22 = smov %s3896_s24 }
 0x4ca   : > { %s5899_s23 = smov %s5902_s26  ;;  %s5900_s24 = smov %s5906_s27 }
 0x4cb   :  { %16 = sbr.rel (!%p14_p8) target bundleno = 3 (0x3), region = 86 }

// kernel: inception_rgb_forward.3
= control target key start
LH: loop header
LB: loop body
LE: loop exit
PB: predicated region body
PF: predicated region fallthrough
CT: control target
= control target key end

     0   :  { %s2243_s12 = smov 0   ;;  %s2245_s13 = smov 0   ;;  %s3363_s0 = inlined_call_operand.vmem [shape: bf16[4096,108], index: 0, kind: input, shape index: {}]   ;;  %s3364_s1 = inlined_call_operand.vmem [shape: bf16[108,8], index: 1, kind: input, shape index: {}]   ;;  %s3365_s2 = inlined_call_operand.vmem [shape: f32[1,8], index: 2, kind: input, shape index: {}]   ;;  %s3366_s3 = inlined_call_operand.vmem [shape: f32[2,1,8], index: 3, kind: output, shape index: {}]  }
   0x1   :  { %s2247_s14 = smov 0   ;;  %s2249_s15 = smov 0  }
   0x2   :  { %s2251_s16 = smov 0  }
   0x3 LB: > { %s22_s17 = sadd.s32 1, %s2212_s14  ;;  %s25_s18 = sadd.s32 1, %s2216_s15  ;;  %s2220_s16 = sphi %s2251_s16, %s13_s16   ;;  %s2216_s15 = sphi %s2249_s15, %s3726_s15   ;;  %s2212_s14 = sphi %s2247_s14, %s3725_s14   ;;  %s2208_s13 = sphi %s2245_s13, %s3724_s13   ;;  %s2204_s12 = sphi %s2243_s12, %s3723_s12  }
   0x4   : > { %p23_p0 = scmp.ge.s32.totalorder %s22_s17, 2  ;;  %p1693_p1 = scmp.ge.s32.totalorder %s2220_s16, 1 }
   0x5   : > { %p158_p2 = scmp.lt.s32.totalorder %s2220_s16, 5 }
   0x6   : > { %s3728_s17 = smov (%p23_p0, %s22_s17), 0  ;;  %s3730_s18 = smov (!%p23_p0, %s25_s18), %s2216_s15 }
   0x7   : > { %p159_p3 = pnand %p1693_p1, %p158_p2  ;;  %p27_p4 = scmp.ge.s32.totalorder %s3730_s18, 2 }
   0x9   : > { %s3732_s18 = smov (%p27_p4, %s3730_s18), 0  ;;  %162 = sbr.rel (%p159_p3) target bundleno = 704 (0x2c0), region = 32 }
   0xe   : > { %p192_p5 = scmp.lt.s32.totalorder %s2208_s13, 1  ;;  %v1979_v0 = vld [vmem:[%s3364_s1 + $0x30] sm:$0xf]  ;;  %v2118_v1 = vld [vmem:[%s3364_s1 + $0x30] sm:$0x30]  ;;  %vm896_vm0 = vcmask 1045504  }
   0xf   : > { %v1980_v2 = vor.u32 %v2118_v1, %v1979_v0  ;;  %v2117_v4 = vld [vmem:[%s3364_s1 + $0x28] sm:$0xff]  ;;  %s1694_s29 = sshll.u32 %s2208_s13, 1  ;;  %v2116_v5 = vld [vmem:[%s3364_s1 + $0x20] sm:$0xff]  ;;  %v2115_v6 = vld [vmem:[%s3364_s1 + $0x18] sm:$0xff]  ;;  %vm703_vm1 = vcmask 883712   ;;  %p2045_p7 = scmp.ne.s32.totalorder %s2204_s12, 0 }
  0x10   : > { %s193_s23 = scalar_select %p192_p5, %s2208_s13, 1  ;;  %v2114_v7 = vld [vmem:[%s3364_s1 + $0x10] sm:$0xff]  ;;  %v2113_v8 = vld [vmem:[%s3364_s1 + $0x8] sm:$0xff]  ;;  %v2112_v9 = vld [vmem:[%s3364_s1] sm:$0xff] }
  0x11   : > { %v898_v3 = vsel %vm896_vm0, %v1980_v2, 0  ;;  %s183_s30 = sadd.s32 %s2204_s12, %s1694_s29  ;;  %v2382_v42 = vld [vmem:[%s3365_s2] ss:$0 sm:$0xff] }
  0x12   : > { %s2288_s26 = scalar_lea.vmem %s3366_s3, %s193_s23  ;;  %901 = vmatpush.bf16.msra.mxu0 %v898_v3  ;;  %2119 = vmatpush.bf16.msra.mxu1 %v898_v3  ;;  %s1695_s6 = sshll.u32 %s183_s30, 7 }
  0x13   : > { %2120 = vmatpush.bf16.msra.mxu2 %v898_v3  ;;  %2121 = vmatpush.bf16.msra.mxu3 %v898_v3  ;;  %p185_p6 = scmp.lt.s32.totalorder %s1695_s6, 511 }
  0x15   : > { %s3734_s6 = smov (!%p185_p6, %s1695_s6), 511 }
  0x16   : > { %902 = vmatpush.bf16.msra.mxu0 %v2117_v4  ;;  %2122 = vmatpush.bf16.msra.mxu1 %v2117_v4  ;;  %s1696_s19 = sshll.u32 %s3734_s6, 2 }
  0x17   : > { %2123 = vmatpush.bf16.msra.mxu2 %v2117_v4  ;;  %2124 = vmatpush.bf16.msra.mxu3 %v2117_v4  ;;  %s2313_s24 = scalar_lea.vmem %s3363_s0, %s1696_s19 }
  0x18   : > { %v2048_v10 = vld [vmem:[%s2313_s24] sm:$0xff]  ;;  %v2049_v14 = vld [vmem:[%s2313_s24 + $0x8] sm:$0xff]  ;;  %v2050_v18 = vld [vmem:[%s2313_s24 + $0x10] sm:$0xff] }
  0x19   : > { %v2064_v11 = vld [vmem:[%s2313_s24 + $0x80] sm:$0xff]  ;;  %v2065_v15 = vld [vmem:[%s2313_s24 + $0x88] sm:$0xff]  ;;  %v2066_v19 = vld [vmem:[%s2313_s24 + $0x90] sm:$0xff] }
  0x1a   : > { %903 = vmatpush.bf16.msra.mxu0 %v2116_v5  ;;  %2125 = vmatpush.bf16.msra.mxu1 %v2116_v5  ;;  %v2080_v12 = vld [vmem:[%s2313_s24 + $0x100] sm:$0xff]  ;;  %v2081_v16 = vld [vmem:[%s2313_s24 + $0x108] sm:$0xff]  ;;  %v2082_v20 = vld [vmem:[%s2313_s24 + $0x110] sm:$0xff] }
  0x1b   : > { %2126 = vmatpush.bf16.msra.mxu2 %v2116_v5  ;;  %2127 = vmatpush.bf16.msra.mxu3 %v2116_v5  ;;  %v2096_v13 = vld [vmem:[%s2313_s24 + $0x180] sm:$0xff]  ;;  %v2097_v17 = vld [vmem:[%s2313_s24 + $0x188] sm:$0xff]  ;;  %v2098_v21 = vld [vmem:[%s2313_s24 + $0x190] sm:$0xff] }
  0x1c   : > { %v2051_v22 = vld [vmem:[%s2313_s24 + $0x18] sm:$0xff]  ;;  %v2052_v26 = vld [vmem:[%s2313_s24 + $0x20] sm:$0xff]  ;;  %v2053_v30 = vld [vmem:[%s2313_s24 + $0x28] sm:$0xff] }
  0x1d   : > { %v2067_v23 = vld [vmem:[%s2313_s24 + $0x98] sm:$0xff]  ;;  %v2068_v27 = vld [vmem:[%s2313_s24 + $0xa0] sm:$0xff]  ;;  %v2069_v31 = vld [vmem:[%s2313_s24 + $0xa8] sm:$0xff] }
  0x1e   : > { %904 = vmatpush.bf16.msra.mxu0 %v2115_v6  ;;  %2128 = vmatpush.bf16.msra.mxu1 %v2115_v6  ;;  %v2083_v24 = vld [vmem:[%s2313_s24 + $0x118] sm:$0xff]  ;;  %v2084_v28 = vld [vmem:[%s2313_s24 + $0x120] sm:$0xff]  ;;  %v2085_v32 = vld [vmem:[%s2313_s24 + $0x128] sm:$0xff] }
  0x1f   : > { %2129 = vmatpush.bf16.msra.mxu2 %v2115_v6  ;;  %2130 = vmatpush.bf16.msra.mxu3 %v2115_v6  ;;  %v2099_v25 = vld [vmem:[%s2313_s24 + $0x198] sm:$0xff]  ;;  %v2100_v29 = vld [vmem:[%s2313_s24 + $0x1a0] sm:$0xff]  ;;  %v2101_v33 = vld [vmem:[%s2313_s24 + $0x1a8] sm:$0xff] }
  0x20   : > { %v2054_v34 = vld [vmem:[%s2313_s24 + $0x30] sm:$0xff]  ;;  %v2055_v38 = vld [vmem:[%s2313_s24 + $0x38] sm:$0xff]  ;;  %v2056_v43 = vld [vmem:[%s2313_s24 + $0x40] sm:$0xff] }
  0x21   : > { %v2070_v35 = vld [vmem:[%s2313_s24 + $0xb0] sm:$0xff]  ;;  %v2071_v39 = vld [vmem:[%s2313_s24 + $0xb8] sm:$0xff]  ;;  %v2072_v44 = vld [vmem:[%s2313_s24 + $0xc0] sm:$0xff] }
  0x22   : > { %905 = vmatpush.bf16.msra.mxu0 %v2114_v7  ;;  %2131 = vmatpush.bf16.msra.mxu1 %v2114_v7  ;;  %v2086_v36 = vld [vmem:[%s2313_s24 + $0x130] sm:$0xff]  ;;  %v2087_v40 = vld [vmem:[%s2313_s24 + $0x138] sm:$0xff]  ;;  %v2088_v47 = vld [vmem:[%s2313_s24 + $0x140] sm:$0xff] }
  0x23   : > { %2132 = vmatpush.bf16.msra.mxu2 %v2114_v7  ;;  %2133 = vmatpush.bf16.msra.mxu3 %v2114_v7  ;;  %v2102_v37 = vld [vmem:[%s2313_s24 + $0x1b0] sm:$0xff]  ;;  %v2103_v41 = vld [vmem:[%s2313_s24 + $0x1b8] sm:$0xff]  ;;  %v2104_v48 = vld [vmem:[%s2313_s24 + $0x1c0] sm:$0xff] }
  0x24   : > { %v2057_v3 = vld [vmem:[%s2313_s24 + $0x48] sm:$0xff]  ;;  %v2092_v62 = vld [vmem:[%s2313_s24 + $0x160] sm:$0xff]  ;;  %v2063_v51 = vld [vmem:[%s2313_s24 + $0x78] sm:$0xff] }
  0x25   : > { %v2073_v4 = vld [vmem:[%s2313_s24 + $0xc8] sm:$0xff] }
  0x26   : > { %906 = vmatpush.bf16.msra.mxu0 %v2113_v8  ;;  %2134 = vmatpush.bf16.msra.mxu1 %v2113_v8 }
  0x27   : > { %2135 = vmatpush.bf16.msra.mxu2 %v2113_v8  ;;  %2136 = vmatpush.bf16.msra.mxu3 %v2113_v8 }
  0x2a   : > { %907 = vmatpush.bf16.msra.mxu0 %v2112_v9  ;;  %2137 = vmatpush.bf16.msra.mxu1 %v2112_v9 }
  0x2b   : > { %2138 = vmatpush.bf16.msra.mxu2 %v2112_v9  ;;  %2139 = vmatpush.bf16.msra.mxu3 %v2112_v9  ;;  %v2089_v9 = vld [vmem:[%s2313_s24 + $0x148] sm:$0xff] }
  0x2d   : > { %1981 = vmatmul.msk.bf16.vlgmr.msra.gmra.mxu0 %vm703_vm1, %v2048_v10  ;;  %1997 = vmatmul.msk.bf16.vlgmr.msra.gmra.mxu1 %vm703_vm1, %v2064_v11  ;;  %v2105_v10 = vld [vmem:[%s2313_s24 + $0x1c8] sm:$0xff] }
  0x2e   : > { %2013 = vmatmul.msk.bf16.vlgmr.msra.gmra.mxu2 %vm703_vm1, %v2080_v12  ;;  %2029 = vmatmul.msk.bf16.vlgmr.msra.gmra.mxu3 %vm703_vm1, %v2096_v13 }
  0x3d   : > { %1982 = vmatmul.msk.bf16.gmra.mxu0 %vm703_vm1, %v2049_v14  ;;  %1998 = vmatmul.msk.bf16.gmra.mxu1 %vm703_vm1, %v2065_v15 }
  0x3e   : > { %2014 = vmatmul.msk.bf16.gmra.mxu2 %vm703_vm1, %v2081_v16  ;;  %2030 = vmatmul.msk.bf16.gmra.mxu3 %vm703_vm1, %v2097_v17 }
  0x4d   : > { %1983 = vmatmul.msk.bf16.gmra.mxu0 %vm703_vm1, %v2050_v18  ;;  %1999 = vmatmul.msk.bf16.gmra.mxu1 %vm703_vm1, %v2066_v19 }
  0x4e   : > { %2015 = vmatmul.msk.bf16.gmra.mxu2 %vm703_vm1, %v2082_v20  ;;  %2031 = vmatmul.msk.bf16.gmra.mxu3 %vm703_vm1, %v2098_v21 }
  0x5d   : > { %1984 = vmatmul.msk.bf16.gmra.mxu0 %vm703_vm1, %v2051_v22  ;;  %2000 = vmatmul.msk.bf16.gmra.mxu1 %vm703_vm1, %v2067_v23 }
  0x5e   : > { %2016 = vmatmul.msk.bf16.gmra.mxu2 %vm703_vm1, %v2083_v24  ;;  %2032 = vmatmul.msk.bf16.gmra.mxu3 %vm703_vm1, %v2099_v25 }
  0x6d   : > { %1985 = vmatmul.msk.bf16.gmra.mxu0 %vm703_vm1, %v2052_v26  ;;  %2001 = vmatmul.msk.bf16.gmra.mxu1 %vm703_vm1, %v2068_v27 }
  0x6e   : > { %2017 = vmatmul.msk.bf16.gmra.mxu2 %vm703_vm1, %v2084_v28  ;;  %2033 = vmatmul.msk.bf16.gmra.mxu3 %vm703_vm1, %v2100_v29  ;;  %v2093_v28 = vld [vmem:[%s2313_s24 + $0x168] sm:$0xff] }
  0x7d   : > { %1986 = vmatmul.msk.bf16.gmra.mxu0 %vm703_vm1, %v2053_v30  ;;  %2002 = vmatmul.msk.bf16.gmra.mxu1 %vm703_vm1, %v2069_v31  ;;  %v2058_v31 = vld [vmem:[%s2313_s24 + $0x50] sm:$0xff] }
  0x7e   : > { %2018 = vmatmul.msk.bf16.gmra.mxu2 %vm703_vm1, %v2085_v32  ;;  %2034 = vmatmul.msk.bf16.gmra.mxu3 %vm703_vm1, %v2101_v33  ;;  %v2074_v32 = vld [vmem:[%s2313_s24 + $0xd0] sm:$0xff] }
  0x8d   : > { %1987 = vmatmul.msk.bf16.gmra.mxu0 %vm703_vm1, %v2054_v34  ;;  %2003 = vmatmul.msk.bf16.gmra.mxu1 %vm703_vm1, %v2070_v35 }
  0x8e   : > { %2019 = vmatmul.msk.bf16.gmra.mxu2 %vm703_vm1, %v2086_v36  ;;  %2035 = vmatmul.msk.bf16.gmra.mxu3 %vm703_vm1, %v2102_v37  ;;  %v2090_v37 = vld [vmem:[%s2313_s24 + $0x150] sm:$0xff] }
  0x9d   : > { %1988 = vmatmul.msk.bf16.gmra.mxu0 %vm703_vm1, %v2055_v38  ;;  %2004 = vmatmul.msk.bf16.gmra.mxu1 %vm703_vm1, %v2071_v39  ;;  %v2106_v38 = vld [vmem:[%s2313_s24 + $0x1d0] sm:$0xff] }
  0x9e   : > { %2020 = vmatmul.msk.bf16.gmra.mxu2 %vm703_vm1, %v2087_v40  ;;  %2036 = vmatmul.msk.bf16.gmra.mxu3 %vm703_vm1, %v2103_v41 }
  0xaa   : > { %v909_v45 = vpop.f32.mrf.mxu0  ;;  %v989_v46 = vpop.f32.mrf.mxu1 }
  0xab   : > { %v2389_v49 = vadd.f32 %v2382_v42, %v909_v45  ;;  %v2392_v50 = vadd.f32 %v2382_v42, %v989_v46 }
  0xad   : > { %1989 = vmatmul.msk.bf16.gmra.mxu0 %vm703_vm1, %v2056_v43  ;;  %2005 = vmatmul.msk.bf16.gmra.mxu1 %vm703_vm1, %v2072_v44  ;;  %v2076_v43 = vld [vmem:[%s2313_s24 + $0xe0] sm:$0xff]  ;;  %v2094_v44 = vld [vmem:[%s2313_s24 + $0x170] sm:$0xff] }
  0xae   : > { %2021 = vmatmul.msk.bf16.gmra.mxu2 %vm703_vm1, %v2088_v47  ;;  %2037 = vmatmul.msk.bf16.gmra.mxu3 %vm703_vm1, %v2104_v48 }
  0xb1   : > { %v1069_v53 = vpop.f32.mrf.mxu2  ;;  %v1149_v54 = vpop.f32.mrf.mxu3 }
  0xb2   : > { %v2401_v55 = vadd.f32 %v2382_v42, %v1069_v53  ;;  %v2404_v56 = vadd.f32 %v2382_v42, %v1149_v54  ;;  %v911_v57 = vpop.f32.mrf.mxu0  ;;  %v991_v58 = vpop.f32.mrf.mxu1 }
  0xb3   : > { %v2407_v59 = vadd.f32 %v2382_v42, %v911_v57  ;;  %v2410_v60 = vadd.f32 %v2382_v42, %v991_v58 }
  0xb4   : > { %3443 = vst [vmem:[#allocation2_spill] sm:$0xff] %v2401_v55 }
  0xb5   : > { %3444 = vst [vmem:[#allocation3_spill] sm:$0xff] %v2404_v56 }
  0xb9   : > { %v1071_v1 = vpop.f32.mrf.mxu2  ;;  %v1151_v2 = vpop.f32.mrf.mxu3 }
  0xba   : > { %v2419_v5 = vadd.f32 %v2382_v42, %v1071_v1  ;;  %v2422_v6 = vadd.f32 %v2382_v42, %v1151_v2  ;;  %v914_v7 = vpop.f32.mrf.mxu0  ;;  %v994_v8 = vpop.f32.mrf.mxu1 }
  0xbb   : > { %v2427_v11 = vadd.f32 %v2382_v42, %v914_v7  ;;  %v2430_v12 = vadd.f32 %v2382_v42, %v994_v8 }
  0xbc   : > { %3445 = vst [vmem:[#allocation4_spill] sm:$0xff] %v2419_v5 }
  0xbd   : > { %3446 = vst [vmem:[#allocation5_spill] sm:$0xff] %v2422_v6  ;;  %1990 = vmatmul.msk.bf16.gmra.mxu0 %vm703_vm1, %v2057_v3  ;;  %2006 = vmatmul.msk.bf16.gmra.mxu1 %vm703_vm1, %v2073_v4  ;;  %v2060_v3 = vld [vmem:[%s2313_s24 + $0x60] sm:$0xff] }
  0xbe   : > { %2022 = vmatmul.msk.bf16.gmra.mxu2 %vm703_vm1, %v2089_v9  ;;  %2038 = vmatmul.msk.bf16.gmra.mxu3 %vm703_vm1, %v2105_v10  ;;  %v2059_v10 = vld [vmem:[%s2313_s24 + $0x58] sm:$0xff] }
  0xc1   : > { %v1074_v17 = vpop.f32.mrf.mxu2  ;;  %v1154_v18 = vpop.f32.mrf.mxu3 }
  0xc2   : > { %v2441_v19 = vadd.f32 %v2382_v42, %v1074_v17  ;;  %v2444_v20 = vadd.f32 %v2382_v42, %v1154_v18  ;;  %v916_v21 = vpop.f32.mrf.mxu0  ;;  %v996_v22 = vpop.f32.mrf.mxu1  ;;  %v2075_v17 = vld [vmem:[%s2313_s24 + $0xd8] sm:$0xff] }
  0xc3   : > { %v2447_v23 = vadd.f32 %v2382_v42, %v916_v21  ;;  %v2450_v24 = vadd.f32 %v2382_v42, %v996_v22 }
  0xc4   : > { %3447 = vst [vmem:[#allocation6_spill] sm:$0xff] %v2441_v19 }
  0xc5   : > { %3448 = vst [vmem:[#allocation7_spill] sm:$0xff] %v2444_v20 }
  0xc9   : > { %v1076_v29 = vpop.f32.mrf.mxu2  ;;  %v1156_v30 = vpop.f32.mrf.mxu3 }
  0xca   : > { %v2459_v33 = vadd.f32 %v2382_v42, %v1076_v29  ;;  %v2462_v34 = vadd.f32 %v2382_v42, %v1156_v30  ;;  %v919_v35 = vpop.f32.mrf.mxu0  ;;  %v999_v36 = vpop.f32.mrf.mxu1  ;;  %v2091_v30 = vld [vmem:[%s2313_s24 + $0x158] sm:$0xff] }
  0xcb   : > { %v2467_v39 = vadd.f32 %v2382_v42, %v919_v35  ;;  %v2470_v40 = vadd.f32 %v2382_v42, %v999_v36 }
  0xcc   : > { %3449 = vst [vmem:[#allocation8_spill] sm:$0xff] %v2459_v33 }
  0xcd   : > { %3450 = vst [vmem:[#allocation9_spill] sm:$0xff] %v2462_v34  ;;  %1991 = vmatmul.msk.bf16.gmra.mxu0 %vm703_vm1, %v2058_v31  ;;  %2007 = vmatmul.msk.bf16.gmra.mxu1 %vm703_vm1, %v2074_v32  ;;  %v2107_v31 = vld [vmem:[%s2313_s24 + $0x1d8] sm:$0xff] }
  0xce   : > { %2023 = vmatmul.msk.bf16.gmra.mxu2 %vm703_vm1, %v2090_v37  ;;  %2039 = vmatmul.msk.bf16.gmra.mxu3 %vm703_vm1, %v2106_v38 }
  0xd1   : > { %v1079_v46 = vpop.f32.mrf.mxu2  ;;  %v1159_v47 = vpop.f32.mrf.mxu3 }
  0xd2   : > { %v2481_v48 = vadd.f32 %v2382_v42, %v1079_v46  ;;  %v2484_v53 = vadd.f32 %v2382_v42, %v1159_v47  ;;  %v921_v54 = vpop.f32.mrf.mxu0  ;;  %v1001_v57 = vpop.f32.mrf.mxu1  ;;  %v2077_v46 = vld [vmem:[%s2313_s24 + $0xe8] sm:$0xff] }
  0xd3   : > { %v2487_v58 = vadd.f32 %v2382_v42, %v921_v54  ;;  %v2490_v1 = vadd.f32 %v2382_v42, %v1001_v57 }
  0xd4   : > { %3451 = vst [vmem:[#allocation10_spill] sm:$0xff] %v2481_v48 }
  0xd5   : > { %3452 = vst [vmem:[#allocation11_spill] sm:$0xff] %v2484_v53 }
  0xd9   : > { %v1081_v8 = vpop.f32.mrf.mxu2  ;;  %v1161_v9 = vpop.f32.mrf.mxu3 }
  0xda   : > { %v2499_v18 = vadd.f32 %v2382_v42, %v1081_v8  ;;  %v2502_v21 = vadd.f32 %v2382_v42, %v1161_v9  ;;  %v924_v22 = vpop.f32.mrf.mxu0  ;;  %v1004_v29 = vpop.f32.mrf.mxu1 }
  0xdb   : > { %v2507_v32 = vadd.f32 %v2382_v42, %v924_v22  ;;  %v2510_v35 = vadd.f32 %v2382_v42, %v1004_v29  ;;  %v2108_v29 = vld [vmem:[%s2313_s24 + $0x1e0] sm:$0xff] }
  0xdc   : > { %3453 = vst [vmem:[#allocation12_spill] sm:$0xff] %v2499_v18 }
  0xdd   : > { %3454 = vst [vmem:[#allocation13_spill] sm:$0xff] %v2502_v21  ;;  %1992 = vmatmul.msk.bf16.gmra.mxu0 %vm703_vm1, %v2059_v10  ;;  %2008 = vmatmul.msk.bf16.gmra.mxu1 %vm703_vm1, %v2075_v17 }
  0xde   : > { %2024 = vmatmul.msk.bf16.gmra.mxu2 %vm703_vm1, %v2091_v30  ;;  %2040 = vmatmul.msk.bf16.gmra.mxu3 %vm703_vm1, %v2107_v31  ;;  %v2078_v31 = vld [vmem:[%s2313_s24 + $0xf0] sm:$0xff] }
  0xe1   : > { %v1084_v47 = vpop.f32.mrf.mxu2  ;;  %v1164_v54 = vpop.f32.mrf.mxu3 }
  0xe2   : > { %v2521_v57 = vadd.f32 %v2382_v42, %v1084_v47  ;;  %v2524_v8 = vadd.f32 %v2382_v42, %v1164_v54  ;;  %v926_v9 = vpop.f32.mrf.mxu0  ;;  %v1006_v22 = vpop.f32.mrf.mxu1  ;;  %v2061_v47 = vld [vmem:[%s2313_s24 + $0x68] sm:$0xff] }
  0xe3   : > { %v2527_v10 = vadd.f32 %v2382_v42, %v926_v9  ;;  %v2530_v17 = vadd.f32 %v2382_v42, %v1006_v22 }
  0xe4   : > { %3455 = vst [vmem:[#allocation14_spill] sm:$0xff] %v2521_v57 }
  0xe5   : > { %3456 = vst [vmem:[#allocation15_spill] sm:$0xff] %v2524_v8 }
  0xe9   : > { %v1086_v54 = vpop.f32.mrf.mxu2  ;;  %v1166_v37 = vpop.f32.mrf.mxu3 }
  0xea   : > { %v2539_v26 = vadd.f32 %v2382_v42, %v1086_v54  ;;  %v2542_v9 = vadd.f32 %v2382_v42, %v1166_v37  ;;  %v929_v22 = vpop.f32.mrf.mxu0  ;;  %v1009_v14 = vpop.f32.mrf.mxu1  ;;  %v2062_v54 = vld [vmem:[%s2313_s24 + $0x70] sm:$0xff] }
  0xeb   : > { %v2547_v30 = vadd.f32 %v2382_v42, %v929_v22  ;;  %v2550_v36 = vadd.f32 %v2382_v42, %v1009_v14 }
  0xec   : > { %3457 = vst [vmem:[#allocation16_spill] sm:$0xff] %v2539_v26 }
  0xed   : > { %3458 = vst [vmem:[#allocation17_spill] sm:$0xff] %v2542_v9  ;;  %1993 = vmatmul.msk.bf16.gmra.mxu0 %vm703_vm1, %v2060_v3  ;;  %2009 = vmatmul.msk.bf16.gmra.mxu1 %vm703_vm1, %v2076_v43  ;;  %v2109_v3 = vld [vmem:[%s2313_s24 + $0x1e8] sm:$0xff] }
  0xee   : > { %2025 = vmatmul.msk.bf16.gmra.mxu2 %vm703_vm1, %v2092_v62  ;;  %2041 = vmatmul.msk.bf16.gmra.mxu3 %vm703_vm1, %v2108_v29 }
  0xf1   : > { %v1089_v14 = vpop.f32.mrf.mxu2  ;;  %v1169_v37 = vpop.f32.mrf.mxu3 }
  0xf2   : > { %v2561_v22 = vadd.f32 %v2382_v42, %v1089_v14  ;;  %v2564_v41 = vadd.f32 %v2382_v42, %v1169_v37  ;;  %v931_v2 = vpop.f32.mrf.mxu0  ;;  %v1011_v13 = vpop.f32.mrf.mxu1 }
  0xf3   : > { %v2567_v43 = vadd.f32 %v2382_v42, %v931_v2  ;;  %v2570_v62 = vadd.f32 %v2382_v42, %v1011_v13 }
  0xf4   : > { %3459 = vst [vmem:[#allocation18_spill] sm:$0xff] %v2561_v22 }
  0xf5   : > { %3460 = vst [vmem:[#allocation19_spill] sm:$0xff] %v2564_v41  ;;  %v2095_v41 = vld [vmem:[%s2313_s24 + $0x178] sm:$0xff] }
  0xf9   : > { %v1091_v37 = vpop.f32.mrf.mxu2  ;;  %v1171_v25 = vpop.f32.mrf.mxu3 }
  0xfa   : > { %v2579_v7 = vadd.f32 %v2382_v42, %v1091_v37  ;;  %v2582_v2 = vadd.f32 %v2382_v42, %v1171_v25  ;;  %v934_v13 = vpop.f32.mrf.mxu0  ;;  %v1014_v45 = vpop.f32.mrf.mxu1 }
  0xfb   : > { %v2587_v29 = vadd.f32 %v2382_v42, %v934_v13  ;;  %v2590_v16 = vadd.f32 %v2382_v42, %v1014_v45 }
  0xfc   : > { %3461 = vst [vmem:[#allocation20_spill] sm:$0xff] %v2579_v7 }
  0xfd   : > { %3462 = vst [vmem:[#allocation21_spill] sm:$0xff] %v2582_v2  ;;  %1994 = vmatmul.msk.bf16.gmra.mxu0 %vm703_vm1, %v2061_v47  ;;  %2010 = vmatmul.msk.bf16.gmra.mxu1 %vm703_vm1, %v2077_v46  ;;  %v2110_v47 = vld [vmem:[%s2313_s24 + $0x1f0] sm:$0xff] }
  0xfe   : > { %2026 = vmatmul.msk.bf16.gmra.mxu2 %vm703_vm1, %v2093_v28  ;;  %2042 = vmatmul.msk.bf16.gmra.mxu3 %vm703_vm1, %v2109_v3 }
 0x101   : > { %v1094_v25 = vpop.f32.mrf.mxu2  ;;  %v1174_v45 = vpop.f32.mrf.mxu3 }
 0x102   : > { %v2601_v13 = vadd.f32 %v2382_v42, %v1094_v25  ;;  %v2604_v0 = vadd.f32 %v2382_v42, %v1174_v45  ;;  %v936_v61 = vpop.f32.mrf.mxu0  ;;  %v1016_v52 = vpop.f32.mrf.mxu1 }
 0x103   : > { %v2607_v46 = vadd.f32 %v2382_v42, %v936_v61  ;;  %v2610_v28 = vadd.f32 %v2382_v42, %v1016_v52 }
 0x104   : > { %3463 = vst [vmem:[#allocation22_spill] sm:$0xff] %v2601_v13 }
 0x105   : > { %3464 = vst [vmem:[#allocation23_spill] sm:$0xff] %v2604_v0 }
 0x109   : > { %v1096_v45 = vpop.f32.mrf.mxu2  ;;  %v1176_v14 = vpop.f32.mrf.mxu3 }
 0x10a   : > { %v2619_v38 = vadd.f32 %v2382_v42, %v1096_v45  ;;  %v2622_v61 = vadd.f32 %v2382_v42, %v1176_v14  ;;  %v939_v52 = vpop.f32.mrf.mxu0  ;;  %v1019_v4 = vpop.f32.mrf.mxu1 }
 0x10b   : > { %v2627_v3 = vadd.f32 %v2382_v42, %v939_v52  ;;  %v2630_v25 = vadd.f32 %v2382_v42, %v1019_v4 }
 0x10c   : > { %3465 = vst [vmem:[#allocation24_spill] sm:$0xff] %v2619_v38 }
 0x10d   : > { %3466 = vst [vmem:[#allocation25_spill] sm:$0xff] %v2622_v61  ;;  %1995 = vmatmul.msk.bf16.gmra.mxu0 %vm703_vm1, %v2062_v54  ;;  %2011 = vmatmul.msk.bf16.gmra.mxu1 %vm703_vm1, %v2078_v31  ;;  %v2079_v61 = vld [vmem:[%s2313_s24 + $0xf8] sm:$0xff] }
 0x10e   : > { %2027 = vmatmul.msk.bf16.gmra.mxu2 %vm703_vm1, %v2094_v44  ;;  %2043 = vmatmul.msk.bf16.gmra.mxu3 %vm703_vm1, %v2110_v47  ;;  %v2111_v54 = vld [vmem:[%s2313_s24 + $0x1f8] sm:$0xff] }
 0x111   : > { %v1099_v4 = vpop.f32.mrf.mxu2  ;;  %v1179_v14 = vpop.f32.mrf.mxu3 }
 0x112   : > { %v2641_v52 = vadd.f32 %v2382_v42, %v1099_v4  ;;  %v2644_v27 = vadd.f32 %v2382_v42, %v1179_v14  ;;  %v941_v37 = vpop.f32.mrf.mxu0  ;;  %v1021_v15 = vpop.f32.mrf.mxu1 }
 0x113   : > { %v2647_v31 = vadd.f32 %v2382_v42, %v941_v37  ;;  %v2650_v44 = vadd.f32 %v2382_v42, %v1021_v15 }
 0x114   : > { %3467 = vst [vmem:[#allocation26_spill] sm:$0xff] %v2641_v52 }
 0x115   : > { %3468 = vst [vmem:[#allocation27_spill] sm:$0xff] %v2644_v27 }
 0x119   : > { %v1101_v14 = vpop.f32.mrf.mxu2  ;;  %v1181_v63 = vpop.f32.mrf.mxu3 }
 0x11a   : > { %v2659_v0 = vadd.f32 %v2382_v42, %v1101_v14  ;;  %v2662_v37 = vadd.f32 %v2382_v42, %v1181_v63  ;;  %v944_v15 = vpop.f32.mrf.mxu0  ;;  %v1024_v2 = vpop.f32.mrf.mxu1 }
 0x11b   : > { %v2667_v47 = vadd.f32 %v2382_v42, %v944_v15  ;;  %v2670_v4 = vadd.f32 %v2382_v42, %v1024_v2 }
 0x11c   : > { %3469 = vst [vmem:[#allocation28_spill] sm:$0xff] %v2659_v0 }
 0x11d   : > { %3470 = vst [vmem:[#allocation29_spill] sm:$0xff] %v2662_v37  ;;  %1996 = vmatmul.msk.bf16.gmra.mxu0 %vm703_vm1, %v2063_v51  ;;  %2012 = vmatmul.msk.bf16.gmra.mxu1 %vm703_vm1, %v2079_v61 }
 0x11e   : > { %2028 = vmatmul.msk.bf16.gmra.mxu2 %vm703_vm1, %v2095_v41  ;;  %2044 = vmatmul.msk.bf16.gmra.mxu3 %vm703_vm1, %v2111_v54 }
 0x121   : > { %v1104_v63 = vpop.f32.mrf.mxu2  ;;  %v1184_v15 = vpop.f32.mrf.mxu3 }
 0x122   : > { %v2681_v2 = vadd.f32 %v2382_v42, %v1104_v63  ;;  %v2684_v45 = vadd.f32 %v2382_v42, %v1184_v15  ;;  %v946_v27 = vpop.f32.mrf.mxu0  ;;  %v1026_v14 = vpop.f32.mrf.mxu1 }
 0x123   : > { %v2687_v9 = vadd.f32 %v2382_v42, %v946_v27  ;;  %v2690_v51 = vadd.f32 %v2382_v42, %v1026_v14 }
 0x124   : > { %3471 = vst [vmem:[#allocation30_spill] sm:$0xff] %v2681_v2 }
 0x125   : > { %3472 = vst [vmem:[#allocation31_spill] sm:$0xff] %v2684_v45 }
 0x129   : > { %v1106_v37 = vpop.f32.mrf.mxu2  ;;  %v1186_v8 = vpop.f32.mrf.mxu3 }
 0x12a   : > { %v2697_v15 = vadd.f32 %v2382_v42, %v1106_v37  ;;  %v2700_v21 = vadd.f32 %v2382_v42, %v1186_v8  ;;  %v949_v27 = vpop.f32.mrf.mxu0  ;;  %v1029_v53 = vpop.f32.mrf.mxu1 }
 0x12b   : > { %v2703_v14 = vadd.f32 %v2382_v42, %v949_v27  ;;  %v2706_v41 = vadd.f32 %v2382_v42, %v1029_v53 }
 0x12c   : > { %3473 = vst [vmem:[#allocation32_spill] sm:$0xff] %v2697_v15 }
 0x12d   : > { %3474 = vst [vmem:[#allocation33_spill] sm:$0xff] %v2700_v21 }
 0x131   : > { %v1109_v45 = vpop.f32.mrf.mxu2  ;;  %v1189_v34 = vpop.f32.mrf.mxu3 }
 0x132   : > { %v2713_v8 = vadd.f32 %v2382_v42, %v1109_v45  ;;  %v2716_v20 = vadd.f32 %v2382_v42, %v1189_v34  ;;  %v951_v27 = vpop.f32.mrf.mxu0  ;;  %v1031_v6 = vpop.f32.mrf.mxu1 }
 0x133   : > { %v2719_v53 = vadd.f32 %v2382_v42, %v951_v27  ;;  %v2722_v61 = vadd.f32 %v2382_v42, %v1031_v6 }
 0x134   : > { %3475 = vst [vmem:[#allocation34_spill] sm:$0xff] %v2713_v8 }
 0x135   : > { %3476 = vst [vmem:[#allocation35_spill] sm:$0xff] %v2716_v20 }
 0x139   : > { %v1111_v21 = vpop.f32.mrf.mxu2  ;;  %v1191_v56 = vpop.f32.mrf.mxu3 }
 0x13a   : > { %v2729_v34 = vadd.f32 %v2382_v42, %v1111_v21  ;;  %v2732_v15 = vadd.f32 %v2382_v42, %v1191_v56  ;;  %v954_v27 = vpop.f32.mrf.mxu0  ;;  %v1034_v2 = vpop.f32.mrf.mxu1 }
 0x13b   : > { %v2735_v6 = vadd.f32 %v2382_v42, %v954_v27  ;;  %v2738_v63 = vadd.f32 %v2382_v42, %v1034_v2 }
 0x13c   : > { %3477 = vst [vmem:[#allocation36_spill] sm:$0xff] %v2729_v34 }
 0x13d   : > { %3478 = vst [vmem:[#allocation37_spill] sm:$0xff] %v2732_v15 }
 0x13e   : > { %3479 = vst [vmem:[#allocation38_spill] sm:$0xff] %v2738_v63 }
 0x141   : > { %v1114_v20 = vpop.f32.mrf.mxu2  ;;  %v1194_v8 = vpop.f32.mrf.mxu3 }
 0x142   : > { %v2745_v56 = vadd.f32 %v2382_v42, %v1114_v20  ;;  %v2748_v0 = vadd.f32 %v2382_v42, %v1194_v8  ;;  %v956_v27 = vpop.f32.mrf.mxu0  ;;  %v1036_v52 = vpop.f32.mrf.mxu1 }
 0x143   : > { %v2751_v2 = vadd.f32 %v2382_v42, %v956_v27  ;;  %v2754_v37 = vadd.f32 %v2382_v42, %v1036_v52 }
 0x144   : > { %3480 = vst [vmem:[#allocation39_spill] sm:$0xff] %v2745_v56 }
 0x145   : > { %3481 = vst [vmem:[#allocation40_spill] sm:$0xff] %v2748_v0 }
 0x146   : > { %3482 = vst [vmem:[#allocation41_spill] sm:$0xff] %v2754_v37 }
 0x149   : > { %v1116_v15 = vpop.f32.mrf.mxu2  ;;  %v1196_v34 = vpop.f32.mrf.mxu3 }
 0x14a   : > { %v2761_v8 = vadd.f32 %v2382_v42, %v1116_v15  ;;  %v2764_v38 = vadd.f32 %v2382_v42, %v1196_v34  ;;  %v959_v27 = vpop.f32.mrf.mxu0  ;;  %v1039_v13 = vpop.f32.mrf.mxu1 }
 0x14b   : > { %v2767_v52 = vadd.f32 %v2382_v42, %v959_v27  ;;  %v2770_v45 = vadd.f32 %v2382_v42, %v1039_v13 }
 0x14c   : > { %3483 = vst [vmem:[#allocation42_spill] sm:$0xff] %v2761_v8 }
 0x14d   : > { %3484 = vst [vmem:[#allocation43_spill] sm:$0xff] %v2764_v38 }
 0x14e   : > { %3485 = vst [vmem:[#allocation44_spill] sm:$0xff] %v2770_v45 }
 0x151   : > { %v1119_v0 = vpop.f32.mrf.mxu2  ;;  %v1199_v56 = vpop.f32.mrf.mxu3 }
 0x152   : > { %v2777_v34 = vadd.f32 %v2382_v42, %v1119_v0  ;;  %v2780_v7 = vadd.f32 %v2382_v42, %v1199_v56  ;;  %v961_v27 = vpop.f32.mrf.mxu0  ;;  %v1041_v22 = vpop.f32.mrf.mxu1 }
 0x153   : > { %v2783_v13 = vadd.f32 %v2382_v42, %v961_v27  ;;  %v2786_v21 = vadd.f32 %v2382_v42, %v1041_v22 }
 0x154   : > { %3486 = vst [vmem:[#allocation45_spill] sm:$0xff] %v2777_v34 }
 0x155   : > { %3487 = vst [vmem:[#allocation46_spill] sm:$0xff] %v2780_v7 }
 0x156   : > { %3488 = vst [vmem:[#allocation47_spill] sm:$0xff] %v2786_v21 }
 0x159   : > { %v1121_v38 = vpop.f32.mrf.mxu2  ;;  %v1201_v8 = vpop.f32.mrf.mxu3 }
 0x15a   : > { %v2793_v56 = vadd.f32 %v2382_v42, %v1121_v38  ;;  %v2796_v26 = vadd.f32 %v2382_v42, %v1201_v8  ;;  %v964_v27 = vpop.f32.mrf.mxu0  ;;  %v1044_v57 = vpop.f32.mrf.mxu1 }
 0x15b   : > { %v2799_v22 = vadd.f32 %v2382_v42, %v964_v27  ;;  %v2802_v20 = vadd.f32 %v2382_v42, %v1044_v57 }
 0x15c   : > { %3489 = vst [vmem:[#allocation48_spill] sm:$0xff] %v2793_v56 }
 0x15d   : > { %3490 = vst [vmem:[#allocation49_spill] sm:$0xff] %v2796_v26 }
 0x15e   : > { %3491 = vst [vmem:[#allocation50_spill] sm:$0xff] %v2802_v20 }
 0x161   : > { %v1124_v7 = vpop.f32.mrf.mxu2  ;;  %v1204_v34 = vpop.f32.mrf.mxu3 }
 0x162   : > { %v2809_v8 = vadd.f32 %v2382_v42, %v1124_v7  ;;  %v2812_v18 = vadd.f32 %v2382_v42, %v1204_v34  ;;  %v966_v27 = vpop.f32.mrf.mxu0  ;;  %v1046_v48 = vpop.f32.mrf.mxu1 }
 0x163   : > { %v2815_v57 = vadd.f32 %v2382_v42, %v966_v27  ;;  %v2818_v15 = vadd.f32 %v2382_v42, %v1046_v48 }
 0x164   : > { %3492 = vst [vmem:[#allocation51_spill] sm:$0xff] %v2809_v8 }
 0x165   : > { %3493 = vst [vmem:[#allocation52_spill] sm:$0xff] %v2812_v18 }
 0x166   : > { %3494 = vst [vmem:[#allocation53_spill] sm:$0xff] %v2818_v15 }
 0x169   : > { %v1126_v26 = vpop.f32.mrf.mxu2  ;;  %v1206_v56 = vpop.f32.mrf.mxu3 }
 0x16a   : > { %v2825_v34 = vadd.f32 %v2382_v42, %v1126_v26  ;;  %v2828_v33 = vadd.f32 %v2382_v42, %v1206_v56  ;;  %v969_v27 = vpop.f32.mrf.mxu0  ;;  %v1049_v19 = vpop.f32.mrf.mxu1 }
 0x16b   : > { %v2831_v48 = vadd.f32 %v2382_v42, %v969_v27  ;;  %v2834_v0 = vadd.f32 %v2382_v42, %v1049_v19 }
 0x16c   : > { %3495 = vst [vmem:[#allocation54_spill] sm:$0xff] %v2825_v34 }
 0x16d   : > { %3496 = vst [vmem:[#allocation55_spill] sm:$0xff] %v2828_v33 }
 0x16e   : > { %3497 = vst [vmem:[#allocation56_spill] sm:$0xff] %v2834_v0 }
 0x171   : > { %v1129_v18 = vpop.f32.mrf.mxu2  ;;  %v1209_v8 = vpop.f32.mrf.mxu3 }
 0x172   : > { %v2841_v56 = vadd.f32 %v2382_v42, %v1129_v18  ;;  %v2844_v5 = vadd.f32 %v2382_v42, %v1209_v8  ;;  %v971_v27 = vpop.f32.mrf.mxu0  ;;  %v1051_v55 = vpop.f32.mrf.mxu1 }
 0x173   : > { %v2847_v19 = vadd.f32 %v2382_v42, %v971_v27  ;;  %v2850_v38 = vadd.f32 %v2382_v42, %v1051_v55 }
 0x174   : > { %3498 = vst [vmem:[#allocation57_spill] sm:$0xff] %v2841_v56 }
 0x175   : > { %3499 = vst [vmem:[#allocation58_spill] sm:$0xff] %v2844_v5 }
 0x176   : > { %3500 = vst [vmem:[#allocation59_spill] sm:$0xff] %v2850_v38 }
 0x179   : > { %v1131_v33 = vpop.f32.mrf.mxu2  ;;  %v1211_v34 = vpop.f32.mrf.mxu3 }
 0x17a   : > { %v2857_v8 = vadd.f32 %v2382_v42, %v1131_v33  ;;  %v2860_v0 = vadd.f32 %v2382_v42, %v1211_v34  ;;  %v974_v27 = vpop.f32.mrf.mxu0  ;;  %v1054_v15 = vpop.f32.mrf.mxu1 }
 0x17b   : > { %v2863_v55 = vadd.f32 %v2382_v42, %v974_v27  ;;  %v2866_v7 = vadd.f32 %v2382_v42, %v1054_v15 }
 0x17c   : > { %3501 = vst [vmem:[#allocation60_spill] sm:$0xff] %v2857_v8 }
 0x17d   : > { %3502 = vst [vmem:[#allocation61_spill] sm:$0xff] %v2860_v0 }
 0x17e   : > { %3503 = vst [vmem:[#allocation62_spill] sm:$0xff] %v2866_v7 }
 0x181   : > { %v1134_v5 = vpop.f32.mrf.mxu2  ;;  %v1214_v56 = vpop.f32.mrf.mxu3 }
 0x182   : > { %v2873_v34 = vadd.f32 %v2382_v42, %v1134_v5  ;;  %v2876_v38 = vadd.f32 %v2382_v42, %v1214_v56  ;;  %v976_v27 = vpop.f32.mrf.mxu0  ;;  %v1056_v20 = vpop.f32.mrf.mxu1 }
 0x183   : > { %v2879_v15 = vadd.f32 %v2382_v42, %v976_v27  ;;  %v2882_v26 = vadd.f32 %v2382_v42, %v1056_v20 }
 0x184   : > { %3504 = vst [vmem:[#allocation63_spill] sm:$0xff] %v2873_v34 }
 0x185   : > { %3505 = vst [vmem:[#allocation64_spill] sm:$0xff] %v2876_v38 }
 0x186   : > { %3506 = vst [vmem:[#allocation65_spill] sm:$0xff] %v2882_v26 }
 0x189   : > { %v1136_v0 = vpop.f32.mrf.mxu2  ;;  %v1216_v8 = vpop.f32.mrf.mxu3 }
 0x18a   : > { %v2889_v56 = vadd.f32 %v2382_v42, %v1136_v0  ;;  %v2892_v7 = vadd.f32 %v2382_v42, %v1216_v8  ;;  %v979_v27 = vpop.f32.mrf.mxu0  ;;  %v1059_v21 = vpop.f32.mrf.mxu1 }
 0x18b   : > { %v2895_v20 = vadd.f32 %v2382_v42, %v979_v27  ;;  %v2898_v18 = vadd.f32 %v2382_v42, %v1059_v21 }
 0x18c   : > { %3507 = vst [vmem:[#allocation66_spill] sm:$0xff] %v2889_v56 }
 0x18d   : > { %3508 = vst [vmem:[#allocation67_spill] sm:$0xff] %v2892_v7 }
 0x18e   : > { %3509 = vst [vmem:[#allocation68_spill] sm:$0xff] %v2898_v18 }
 0x191   : > { %v1139_v38 = vpop.f32.mrf.mxu2  ;;  %v1219_v34 = vpop.f32.mrf.mxu3 }
 0x192   : > { %v2905_v8 = vadd.f32 %v2382_v42, %v1139_v38  ;;  %v2908_v26 = vadd.f32 %v2382_v42, %v1219_v34  ;;  %v981_v27 = vpop.f32.mrf.mxu0  ;;  %v1061_v45 = vpop.f32.mrf.mxu1 }
 0x193   : > { %v2911_v21 = vadd.f32 %v2382_v42, %v981_v27  ;;  %v2914_v33 = vadd.f32 %v2382_v42, %v1061_v45 }
 0x194   : > { %3510 = vst [vmem:[#allocation69_spill] sm:$0xff] %v2905_v8 }
 0x195   : > { %3511 = vst [vmem:[#allocation70_spill] sm:$0xff] %v2908_v26 }
 0x196   : > { %3512 = vst [vmem:[#allocation71_spill] sm:$0xff] %v2914_v33 }
 0x199   : > { %v1141_v7 = vpop.f32.mrf.mxu2  ;;  %v1221_v56 = vpop.f32.mrf.mxu3 }
 0x19a   : > { %v2921_v34 = vadd.f32 %v2382_v42, %v1141_v7  ;;  %v2924_v18 = vadd.f32 %v2382_v42, %v1221_v56  ;;  %v984_v27 = vpop.f32.mrf.mxu0  ;;  %v1064_v37 = vpop.f32.mrf.mxu1 }
 0x19b   : > { %v2927_v45 = vadd.f32 %v2382_v42, %v984_v27  ;;  %v2930_v5 = vadd.f32 %v2382_v42, %v1064_v37 }
 0x19c   : > { %3513 = vst [vmem:[#allocation72_spill] sm:$0xff] %v2921_v34 }
 0x19d   : > { %3514 = vst [vmem:[#allocation73_spill] sm:$0xff] %v2924_v18 }
 0x19e   : > { %3515 = vst [vmem:[#allocation74_spill] sm:$0xff] %v2930_v5 }
 0x1a1   : > { %v1144_v26 = vpop.f32.mrf.mxu2  ;;  %v1224_v8 = vpop.f32.mrf.mxu3 }
 0x1a2   : > { %v2937_v56 = vadd.f32 %v2382_v42, %v1144_v26  ;;  %v2940_v33 = vadd.f32 %v2382_v42, %v1224_v8  ;;  %v986_v27 = vpop.f32.mrf.mxu0  ;;  %v1066_v63 = vpop.f32.mrf.mxu1 }
 0x1a3   : > { %v2943_v37 = vadd.f32 %v2382_v42, %v986_v27  ;;  %v2946_v0 = vadd.f32 %v2382_v42, %v1066_v63 }
 0x1a4   : > { %3516 = vst [vmem:[#allocation75_spill] sm:$0xff] %v2940_v33 }
 0x1a9   : > { %v1146_v18 = vpop.f32.mrf.mxu2  ;;  %v1226_v34 = vpop.f32.mrf.mxu3  ;;  %1360 = sbr.rel (%p2045_p7) target bundleno = 432 (0x1b0), region = 36 }
 0x1aa   : > { %v2953_v8 = vadd.f32 %v2382_v42, %v1146_v18  ;;  %v2956_v5 = vadd.f32 %v2382_v42, %v1226_v34 }
 0x1ac   : > { %3517 = vst [vmem:[#allocation76_spill] sm:$0xff] %v2953_v8 }
 0x1ad   : > { %3518 = vst [vmem:[#allocation77_spill] sm:$0xff] %v2956_v5 }
 0x1ae   : > { %vm1361_vm2 = vcmask 57344   ;;  %v2222_v7 = vmov 0.0  }
 0x1af   : > { %1362 = vst.msk [vmem:[%s2288_s26] sm:$0x1] %vm1361_vm2, %v2222_v7 }
 0x1b0 PF: > { %vm1364_vm3 = vcmask 64512   ;;  %v3519_v38 = vmax.f32 %v2389_v49, 0.0  ;;  %v3520_v42 = vmax.f32 %v2407_v59, 0.0  ;;  %v3521_v27 = vmax.f32 %v2427_v11, 0.0 }
 0x1b1   : > { %v3522_v54 = vmax.f32 %v2447_v23, 0.0  ;;  %v3523_v33 = vmax.f32 %v2467_v39, 0.0  ;;  %v3525_v11 = vmax.f32 %v2507_v32, 0.0  ;;  %v3526_v23 = vmax.f32 %v2527_v10, 0.0 }
 0x1b2   : > { %v1365_v18 = vsel %vm1364_vm3, %v3519_v38, 0.0  ;;  %v1366_v34 = vsel %vm1364_vm3, %v3520_v42, 0.0  ;;  %v1368_v63 = vsel %vm1364_vm3, %v3521_v27, 0.0  ;;  %v3524_v38 = vmax.f32 %v2487_v58, 0.0 }
 0x1b3   : > { %v1367_v26 = vadd.f32 %v1366_v34, %v1365_v18  ;;  %v1370_v5 = vsel %vm1364_vm3, %v3522_v54, 0.0  ;;  %v1372_v49 = vsel %vm1364_vm3, %v3523_v33, 0.0  ;;  %v1376_v27 = vsel %vm1364_vm3, %v3525_v11, 0.0 }
 0x1b4   : > { %v1374_v59 = vsel %vm1364_vm3, %v3524_v38, 0.0  ;;  %v1378_v54 = vsel %vm1364_vm3, %v3526_v23, 0.0  ;;  %v3527_v39 = vmax.f32 %v2547_v30, 0.0  ;;  %v3528_v58 = vmax.f32 %v2567_v43, 0.0 }
 0x1b5   : > { %v1369_v7 = vadd.f32 %v1368_v63, %v1367_v26  ;;  %v3529_v32 = vmax.f32 %v2587_v29, 0.0  ;;  %v3530_v10 = vmax.f32 %v2607_v46, 0.0  ;;  %v3531_v30 = vmax.f32 %v2627_v3, 0.0 }
 0x1b6   : > { %v1380_v33 = vsel %vm1364_vm3, %v3527_v39, 0.0  ;;  %v1382_v63 = vsel %vm1364_vm3, %v3528_v58, 0.0  ;;  %v3532_v43 = vmax.f32 %v2647_v31, 0.0  ;;  %v3533_v29 = vmax.f32 %v2667_v47, 0.0 }
 0x1b7   : > { %v1371_v8 = vadd.f32 %v1370_v5, %v1369_v7  ;;  %v1384_v34 = vsel %vm1364_vm3, %v3529_v32, 0.0  ;;  %v3534_v46 = vmax.f32 %v2687_v9, 0.0  ;;  %v3535_v3 = vmax.f32 %v2703_v14, 0.0 }
 0x1b8   : > { %v1390_v11 = vsel %vm1364_vm3, %v3532_v43, 0.0  ;;  %v3536_v31 = vmax.f32 %v2719_v53, 0.0  ;;  %v3537_v47 = vmax.f32 %v2735_v6, 0.0  ;;  %v3538_v9 = vmax.f32 %v2751_v2, 0.0 }
 0x1b9   : > { %v1373_v42 = vadd.f32 %v1372_v49, %v1371_v8  ;;  %v1386_v49 = vsel %vm1364_vm3, %v3530_v10, 0.0  ;;  %v1396_v39 = vsel %vm1364_vm3, %v3535_v3, 0.0  ;;  %v3539_v14 = vmax.f32 %v2767_v52, 0.0 }
 0x1ba   : > { %v1402_v32 = vsel %vm1364_vm3, %v3538_v9, 0.0  ;;  %v3540_v53 = vmax.f32 %v2783_v13, 0.0  ;;  %v3541_v6 = vmax.f32 %v2799_v22, 0.0  ;;  %v3542_v2 = vmax.f32 %v2815_v57, 0.0 }
 0x1bb   : > { %v1375_v18 = vadd.f32 %v1374_v59, %v1373_v42  ;;  %v1388_v59 = vsel %vm1364_vm3, %v3531_v30, 0.0  ;;  %v3543_v52 = vmax.f32 %v2831_v48, 0.0  ;;  %v3544_v13 = vmax.f32 %v2847_v19, 0.0 }
 0x1bc   : > { %v1408_v30 = vsel %vm1364_vm3, %v3541_v6, 0.0  ;;  %v3545_v22 = vmax.f32 %v2863_v55, 0.0  ;;  %v3546_v57 = vmax.f32 %v2879_v15, 0.0  ;;  %v3547_v48 = vmax.f32 %v2895_v20, 0.0 }
 0x1bd   : > { %v1377_v26 = vadd.f32 %v1376_v27, %v1375_v18  ;;  %v1392_v18 = vsel %vm1364_vm3, %v3533_v29, 0.0  ;;  %v1414_v29 = vsel %vm1364_vm3, %v3544_v13, 0.0  ;;  %v3548_v19 = vmax.f32 %v2911_v21, 0.0 }
 0x1be   : > { %v1420_v3 = vsel %vm1364_vm3, %v3547_v48, 0.0  ;;  %v3549_v55 = vmax.f32 %v2927_v45, 0.0  ;;  %v3550_v15 = vmax.f32 %v2943_v37, 0.0  ;;  %v3551_v20 = vmax.f32 %v2392_v50, 0.0 }
 0x1bf   : > { %v1379_v5 = vadd.f32 %v1378_v54, %v1377_v26  ;;  %v1394_v54 = vsel %vm1364_vm3, %v3534_v46, 0.0  ;;  %v3552_v21 = vmax.f32 %v2410_v60, 0.0  ;;  %v3553_v45 = vmax.f32 %v2430_v12, 0.0 }
 0x1c0   : > { %v3554_v37 = vmax.f32 %v2450_v24, 0.0  ;;  %v3555_v50 = vmax.f32 %v2470_v40, 0.0  ;;  %v3556_v60 = vmax.f32 %v2490_v1, 0.0  ;;  %v3557_v12 = vmax.f32 %v2510_v35, 0.0 }
 0x1c1   : > { %v1381_v8 = vadd.f32 %v1380_v33, %v1379_v5  ;;  %v1398_v5 = vsel %vm1364_vm3, %v3536_v31, 0.0  ;;  %v3558_v24 = vmax.f32 %v2530_v17, 0.0  ;;  %v3559_v40 = vmax.f32 %v2550_v36, 0.0 }
 0x1c2   : > { %v1438_v6 = vsel %vm1364_vm3, %v3556_v60, 0.0  ;;  %v3560_v1 = vmax.f32 %v2570_v62, 0.0  ;;  %v3561_v35 = vmax.f32 %v2590_v16, 0.0  ;;  %v3562_v17 = vmax.f32 %v2610_v28, 0.0 }
 0x1c3   : > { %v1383_v7 = vadd.f32 %v1382_v63, %v1381_v8  ;;  %v1400_v63 = vsel %vm1364_vm3, %v3537_v47, 0.0  ;;  %v1426_v47 = vsel %vm1364_vm3, %v3550_v15, 0.0  ;;  %v3563_v36 = vmax.f32 %v2630_v25, 0.0 }
 0x1c4   : > { %v3564_v62 = vmax.f32 %v2650_v44, 0.0  ;;  %v3565_v16 = vmax.f32 %v2670_v4, 0.0  ;;  %v3566_v28 = vmax.f32 %v2690_v51, 0.0  ;;  %v3567_v25 = vmax.f32 %v2706_v41, 0.0 }
 0x1c5   : > { %v1385_v38 = vadd.f32 %v1384_v34, %v1383_v7  ;;  %v1404_v7 = vsel %vm1364_vm3, %v3539_v14, 0.0  ;;  %v1432_v14 = vsel %vm1364_vm3, %v3553_v45, 0.0  ;;  %v3568_v44 = vmax.f32 %v2722_v61, 0.0 }
 0x1c6   : > { %v1456_v48 = vsel %vm1364_vm3, %v3565_v16, 0.0  ;;  %vm1627_vm4 = vcmask 57344  }
 0x1c7   : > { %v1387_v42 = vadd.f32 %v1386_v49, %v1385_v38  ;;  %v1406_v49 = vsel %vm1364_vm3, %v3540_v53, 0.0 }
 0x1c9   : > { %v1389_v27 = vadd.f32 %v1388_v59, %v1387_v42  ;;  %v1410_v42 = vsel %vm1364_vm3, %v3542_v2, 0.0 }
 0x1cb   : > { %v1391_v23 = vadd.f32 %v1390_v11, %v1389_v27  ;;  %v1412_v11 = vsel %vm1364_vm3, %v3543_v52, 0.0  ;;  %v1444_v52 = vsel %vm1364_vm3, %v3559_v40, 0.0  ;;  %v3585_v40 = vld [vmem:[#allocation62_spill] sm:$0xff] }
 0x1cd   : > { %v1393_v26 = vadd.f32 %v1392_v18, %v1391_v23  ;;  %v1416_v23 = vsel %vm1364_vm3, %v3545_v22, 0.0  ;;  %v1450_v22 = vsel %vm1364_vm3, %v3562_v17, 0.0 }
 0x1cf   : > { %v1395_v33 = vadd.f32 %v1394_v54, %v1393_v26  ;;  %v1418_v54 = vsel %vm1364_vm3, %v3546_v57, 0.0 }
 0x1d1   : > { %v1397_v58 = vadd.f32 %v1396_v39, %v1395_v33  ;;  %v1422_v33 = vsel %vm1364_vm3, %v3548_v19, 0.0 }
 0x1d3   : > { %v1399_v8 = vadd.f32 %v1398_v5, %v1397_v58  ;;  %v1424_v5 = vsel %vm1364_vm3, %v3549_v55, 0.0  ;;  %v1462_v55 = vsel %vm1364_vm3, %v3568_v44, 0.0  ;;  %v3598_v44 = vld [vmem:[#allocation4_spill] sm:$0xff] }
 0x1d5   : > { %v1401_v34 = vadd.f32 %v1400_v63, %v1399_v8  ;;  %v1428_v8 = vsel %vm1364_vm3, %v3551_v20, 0.0 }
 0x1d7   : > { %v1403_v10 = vadd.f32 %v1402_v32, %v1401_v34  ;;  %v1430_v32 = vsel %vm1364_vm3, %v3552_v21, 0.0 }
 0x1d9   : > { %v1405_v38 = vadd.f32 %v1404_v7, %v1403_v10  ;;  %v1434_v10 = vsel %vm1364_vm3, %v3554_v37, 0.0 }
 0x1db   : > { %v1407_v59 = vadd.f32 %v1406_v49, %v1405_v38  ;;  %v1436_v49 = vsel %vm1364_vm3, %v3555_v50, 0.0  ;;  %v3579_v50 = vld [vmem:[#allocation53_spill] sm:$0xff] }
 0x1dd   : > { %v1409_v43 = vadd.f32 %v1408_v30, %v1407_v59  ;;  %v1440_v59 = vsel %vm1364_vm3, %v3557_v12, 0.0 }
 0x1df   : > { %v1411_v27 = vadd.f32 %v1410_v42, %v1409_v43  ;;  %v1442_v42 = vsel %vm1364_vm3, %v3558_v24, 0.0 }
 0x1e1   : > { %v1413_v18 = vadd.f32 %v1412_v11, %v1411_v27  ;;  %v1446_v27 = vsel %vm1364_vm3, %v3560_v1, 0.0 }
 0x1e3   : > { %v1415_v46 = vadd.f32 %v1414_v29, %v1413_v18  ;;  %v1448_v29 = vsel %vm1364_vm3, %v3561_v35, 0.0 }
 0x1e5   : > { %v1417_v26 = vadd.f32 %v1416_v23, %v1415_v46  ;;  %v1452_v46 = vsel %vm1364_vm3, %v3563_v36, 0.0  ;;  %v3591_v36 = vld [vmem:[#allocation71_spill] sm:$0xff] }
 0x1e7   : > { %v1419_v39 = vadd.f32 %v1418_v54, %v1417_v26  ;;  %v1454_v54 = vsel %vm1364_vm3, %v3564_v62, 0.0 }
 0x1e9   : > { %v1421_v31 = vadd.f32 %v1420_v3, %v1419_v39  ;;  %v1458_v39 = vsel %vm1364_vm3, %v3566_v28, 0.0 }
 0x1eb   : > { %v1423_v58 = vadd.f32 %v1422_v33, %v1421_v31  ;;  %v1460_v33 = vsel %vm1364_vm3, %v3567_v25, 0.0 }
 0x1ed   : > { %v1425_v63 = vadd.f32 %v1424_v5, %v1423_v58  ;;  %v3569_v58 = vld [vmem:[#allocation38_spill] sm:$0xff] }
 0x1ee   : > { %v3570_v4 = vmax.f32 %v3569_v58, 0.0 }
 0x1ef   : > { %v1427_v9 = vadd.f32 %v1426_v47, %v1425_v63  ;;  %v3571_v63 = vld [vmem:[#allocation41_spill] sm:$0xff] }
 0x1f0   : > { %v1464_v15 = vsel %vm1364_vm3, %v3570_v4, 0.0  ;;  %v3572_v51 = vmax.f32 %v3571_v63, 0.0  ;;  %v3600_v4 = vld [vmem:[#allocation6_spill] sm:$0xff] }
 0x1f1   : > { %v1429_v34 = vadd.f32 %v1428_v8, %v1427_v9  ;;  %v3573_v9 = vld [vmem:[#allocation44_spill] sm:$0xff] }
 0x1f2   : > { %v1466_v20 = vsel %vm1364_vm3, %v3572_v51, 0.0  ;;  %v3574_v41 = vmax.f32 %v3573_v9, 0.0  ;;  %v3602_v51 = vld [vmem:[#allocation8_spill] sm:$0xff]  ;;  %v3604_v9 = vld [vmem:[#allocation10_spill] sm:$0xff] }
 0x1f3   : > { %v1431_v7 = vadd.f32 %v1430_v32, %v1429_v34  ;;  %v3575_v34 = vld [vmem:[#allocation47_spill] sm:$0xff] }
 0x1f4   : > { %v1468_v21 = vsel %vm1364_vm3, %v3574_v41, 0.0  ;;  %v3576_v61 = vmax.f32 %v3575_v34, 0.0  ;;  %v3605_v41 = vmax.f32 %v3604_v9, 0.0  ;;  %v3606_v34 = vld [vmem:[#allocation12_spill] sm:$0xff] }
 0x1f5   : > { %v1433_v53 = vadd.f32 %v1432_v14, %v1431_v7  ;;  %v3577_v7 = vld [vmem:[#allocation50_spill] sm:$0xff] }
 0x1f6   : > { %v1470_v45 = vsel %vm1364_vm3, %v3576_v61, 0.0  ;;  %v3578_v37 = vmax.f32 %v3577_v7, 0.0  ;;  %v3607_v61 = vmax.f32 %v3606_v34, 0.0  ;;  %v3608_v7 = vld [vmem:[#allocation14_spill] sm:$0xff] }
 0x1f7   : > { %v1435_v38 = vadd.f32 %v1434_v10, %v1433_v53 }
 0x1f8   : > { %v1472_v10 = vsel %vm1364_vm3, %v3578_v37, 0.0  ;;  %v3609_v37 = vmax.f32 %v3608_v7, 0.0 }
 0x1f9   : > { %v1437_v30 = vadd.f32 %v1436_v49, %v1435_v38  ;;  %v3580_v49 = vmax.f32 %v3579_v50, 0.0  ;;  %v3610_v50 = vld [vmem:[#allocation16_spill] sm:$0xff] }
 0x1fb   : > { %v1439_v2 = vadd.f32 %v1438_v6, %v1437_v30  ;;  %v1474_v38 = vsel %vm1364_vm3, %v3580_v49, 0.0  ;;  %v3581_v6 = vld [vmem:[#allocation56_spill] sm:$0xff]  ;;  %v3611_v49 = vmax.f32 %v3610_v50, 0.0 }
 0x1fc   : > { %v3582_v30 = vmax.f32 %v3581_v6, 0.0  ;;  %v3612_v6 = vld [vmem:[#allocation18_spill] sm:$0xff] }
 0x1fd   : > { %v1441_v43 = vadd.f32 %v1440_v59, %v1439_v2  ;;  %v3583_v2 = vld [vmem:[#allocation59_spill] sm:$0xff] }
 0x1fe   : > { %v1476_v12 = vsel %vm1364_vm3, %v3582_v30, 0.0  ;;  %v3584_v24 = vmax.f32 %v3583_v2, 0.0  ;;  %v3613_v30 = vmax.f32 %v3612_v6, 0.0  ;;  %v3614_v2 = vld [vmem:[#allocation20_spill] sm:$0xff] }
 0x1ff   : > { %v1443_v11 = vadd.f32 %v1442_v42, %v1441_v43 }
 0x200   : > { %v1478_v42 = vsel %vm1364_vm3, %v3584_v24, 0.0  ;;  %v3615_v24 = vmax.f32 %v3614_v2, 0.0 }
 0x201   : > { %v1445_v13 = vadd.f32 %v1444_v52, %v1443_v11  ;;  %v3586_v52 = vmax.f32 %v3585_v40, 0.0  ;;  %v3616_v40 = vld [vmem:[#allocation22_spill] sm:$0xff] }
 0x203   : > { %v1447_v18 = vadd.f32 %v1446_v27, %v1445_v13  ;;  %v1480_v11 = vsel %vm1364_vm3, %v3586_v52, 0.0  ;;  %v3587_v27 = vld [vmem:[#allocation65_spill] sm:$0xff]  ;;  %v3617_v52 = vmax.f32 %v3616_v40, 0.0 }
 0x204   : > { %v3588_v13 = vmax.f32 %v3587_v27, 0.0  ;;  %v3618_v27 = vld [vmem:[#allocation24_spill] sm:$0xff] }
 0x205   : > { %v1449_v23 = vadd.f32 %v1448_v29, %v1447_v18  ;;  %v3589_v18 = vld [vmem:[#allocation68_spill] sm:$0xff] }
 0x206   : > { %v1482_v35 = vsel %vm1364_vm3, %v3588_v13, 0.0  ;;  %v3590_v17 = vmax.f32 %v3589_v18, 0.0  ;;  %v3619_v13 = vmax.f32 %v3618_v27, 0.0  ;;  %v3620_v18 = vld [vmem:[#allocation26_spill] sm:$0xff] }
 0x207   : > { %v1451_v57 = vadd.f32 %v1450_v22, %v1449_v23 }
 0x208   : > { %v1484_v22 = vsel %vm1364_vm3, %v3590_v17, 0.0  ;;  %v3621_v17 = vmax.f32 %v3620_v18, 0.0 }
 0x209   : > { %v1453_v26 = vadd.f32 %v1452_v46, %v1451_v57  ;;  %v3592_v46 = vmax.f32 %v3591_v36, 0.0  ;;  %v3622_v36 = vld [vmem:[#allocation28_spill] sm:$0xff] }
 0x20b   : > { %v1455_v3 = vadd.f32 %v1454_v54, %v1453_v26  ;;  %v1486_v57 = vsel %vm1364_vm3, %v3592_v46, 0.0  ;;  %v3593_v54 = vld [vmem:[#allocation74_spill] sm:$0xff]  ;;  %v3623_v46 = vmax.f32 %v3622_v36, 0.0 }
 0x20c   : > { %v3594_v26 = vmax.f32 %v3593_v54, 0.0  ;;  %v3624_v54 = vld [vmem:[#allocation30_spill] sm:$0xff] }
 0x20d   : > { %v1457_v19 = vadd.f32 %v1456_v48, %v1455_v3  ;;  %v3595_v3 = vmax.f32 %v2946_v0, 0.0  ;;  %v3603_v0 = vmax.f32 %v3602_v51, 0.0 }
 0x20e   : > { %v1488_v16 = vsel %vm1364_vm3, %v3594_v26, 0.0  ;;  %v3625_v26 = vmax.f32 %v3624_v54, 0.0 }
 0x20f   : > { %v1459_v31 = vadd.f32 %v1458_v39, %v1457_v19  ;;  %v1490_v28 = vsel %vm1364_vm3, %v3595_v3, 0.0  ;;  %v3596_v19 = vld [vmem:[#allocation2_spill] sm:$0xff]  ;;  %v3626_v3 = vld [vmem:[#allocation32_spill] sm:$0xff] }
 0x210   : > { %v3597_v25 = vmax.f32 %v3596_v19, 0.0 }
 0x211   : > { %v1461_v5 = vadd.f32 %v1460_v33, %v1459_v31 }
 0x212   : > { %v1492_v33 = vsel %vm1364_vm3, %v3597_v25, 0.0  ;;  %v3628_v25 = vld [vmem:[#allocation34_spill] sm:$0xff] }
 0x213   : > { %v1463_v47 = vadd.f32 %v1462_v55, %v1461_v5  ;;  %v3599_v55 = vmax.f32 %v3598_v44, 0.0 }
 0x215   : > { %v1465_v8 = vadd.f32 %v1464_v15, %v1463_v47  ;;  %v1494_v5 = vsel %vm1364_vm3, %v3599_v55, 0.0  ;;  %v3601_v15 = vmax.f32 %v3600_v4, 0.0  ;;  %v3630_v55 = vld [vmem:[#allocation36_spill] sm:$0xff] }
 0x217   : > { %v1467_v32 = vadd.f32 %v1466_v20, %v1465_v8  ;;  %v1496_v47 = vsel %vm1364_vm3, %v3601_v15, 0.0  ;;  %v1498_v20 = vsel %vm1364_vm3, %v3603_v0, 0.0  ;;  %v3632_v15 = vld [vmem:[#allocation39_spill] sm:$0xff]  ;;  %v3634_v0 = vld [vmem:[#allocation42_spill] sm:$0xff] }
 0x219   : > { %v1469_v14 = vadd.f32 %v1468_v21, %v1467_v32  ;;  %v1500_v21 = vsel %vm1364_vm3, %v3605_v41, 0.0  ;;  %v3636_v41 = vld [vmem:[#allocation45_spill] sm:$0xff] }
 0x21b   : > { %v1471_v53 = vadd.f32 %v1470_v45, %v1469_v14  ;;  %v1502_v45 = vsel %vm1364_vm3, %v3607_v61, 0.0  ;;  %v3638_v61 = vld [vmem:[#allocation48_spill] sm:$0xff] }
 0x21d   : > { %v1473_v60 = vadd.f32 %v1472_v10, %v1471_v53  ;;  %v1504_v10 = vsel %vm1364_vm3, %v3609_v37, 0.0  ;;  %v3640_v37 = vld [vmem:[#allocation51_spill] sm:$0xff] }
 0x21f   : > { %v1475_v59 = vadd.f32 %v1474_v38, %v1473_v60  ;;  %v1506_v38 = vsel %vm1364_vm3, %v3611_v49, 0.0  ;;  %v3642_v49 = vld [vmem:[#allocation54_spill] sm:$0xff] }
 0x221   : > { %v1477_v43 = vadd.f32 %v1476_v12, %v1475_v59  ;;  %v1508_v12 = vsel %vm1364_vm3, %v3613_v30, 0.0  ;;  %v3644_v30 = vld [vmem:[#allocation57_spill] sm:$0xff] }
 0x223   : > { %v1479_v1 = vadd.f32 %v1478_v42, %v1477_v43  ;;  %v1510_v42 = vsel %vm1364_vm3, %v3615_v24, 0.0  ;;  %v3646_v24 = vld [vmem:[#allocation60_spill] sm:$0xff] }
 0x225   : > { %v1481_v29 = vadd.f32 %v1480_v11, %v1479_v1  ;;  %v1512_v11 = vsel %vm1364_vm3, %v3617_v52, 0.0  ;;  %v3648_v52 = vld [vmem:[#allocation63_spill] sm:$0xff] }
 0x227   : > { %v1483_v23 = vadd.f32 %v1482_v35, %v1481_v29  ;;  %v1514_v35 = vsel %vm1364_vm3, %v3619_v13, 0.0  ;;  %v3650_v13 = vld [vmem:[#allocation66_spill] sm:$0xff] }
 0x229   : > { %v1485_v62 = vadd.f32 %v1484_v22, %v1483_v23  ;;  %v1516_v22 = vsel %vm1364_vm3, %v3621_v17, 0.0  ;;  %v3652_v17 = vld [vmem:[#allocation69_spill] sm:$0xff] }
 0x22b   : > { %v1487_v48 = vadd.f32 %v1486_v57, %v1485_v62  ;;  %v1518_v57 = vsel %vm1364_vm3, %v3623_v46, 0.0  ;;  %v3654_v46 = vld [vmem:[#allocation72_spill] sm:$0xff] }
 0x22d   : > { %v1489_v39 = vadd.f32 %v1488_v16, %v1487_v48  ;;  %v1520_v16 = vsel %vm1364_vm3, %v3625_v26, 0.0  ;;  %v3656_v26 = vmax.f32 %v2937_v56, 0.0 }
 0x22f   : > { %v1491_v31 = vadd.f32 %v1490_v28, %v1489_v39  ;;  %v3627_v28 = vmax.f32 %v3626_v3, 0.0  ;;  %v3657_v3 = vld [vmem:[#allocation76_spill] sm:$0xff] }
 0x231   : > { %v1493_v58 = vadd.f32 %v1492_v33, %v1491_v31  ;;  %v1522_v39 = vsel %vm1364_vm3, %v3627_v28, 0.0  ;;  %v3629_v33 = vmax.f32 %v3628_v25, 0.0  ;;  %v3658_v28 = vmax.f32 %v3657_v3, 0.0  ;;  %v3659_v25 = vld [vmem:[#allocation3_spill] sm:$0xff]  ;;  %v3689_v3 = vld [vmem:[#allocation33_spill] sm:$0xff] }
 0x233   : > { %v1495_v63 = vadd.f32 %v1494_v5, %v1493_v58  ;;  %v1524_v31 = vsel %vm1364_vm3, %v3629_v33, 0.0  ;;  %v3631_v5 = vmax.f32 %v3630_v55, 0.0  ;;  %v3660_v33 = vmax.f32 %v3659_v25, 0.0  ;;  %v3661_v55 = vld [vmem:[#allocation5_spill] sm:$0xff]  ;;  %v3691_v25 = vld [vmem:[#allocation35_spill] sm:$0xff] }
 0x235   : > { %v1497_v8 = vadd.f32 %v1496_v47, %v1495_v63  ;;  %v1526_v58 = vsel %vm1364_vm3, %v3631_v5, 0.0  ;;  %v3633_v47 = vmax.f32 %v3632_v15, 0.0  ;;  %v3662_v5 = vmax.f32 %v3661_v55, 0.0  ;;  %v3663_v15 = vld [vmem:[#allocation7_spill] sm:$0xff]  ;;  %v3693_v55 = vld [vmem:[#allocation37_spill] sm:$0xff] }
 0x236   : > { %v3664_v56 = vmax.f32 %v3663_v15, 0.0  ;;  %v3695_v15 = vld [vmem:[#allocation40_spill] sm:$0xff] }
 0x237   : > { %v1499_v32 = vadd.f32 %v1498_v20, %v1497_v8  ;;  %v1528_v63 = vsel %vm1364_vm3, %v3633_v47, 0.0  ;;  %v3635_v20 = vmax.f32 %v3634_v0, 0.0 }
 0x238   : > { %v1560_v47 = vsel %vm1364_vm3, %v3664_v56, 0.0  ;;  %v3696_v56 = vmax.f32 %v3695_v15, 0.0 }
 0x239   : > { %v1501_v14 = vadd.f32 %v1500_v21, %v1499_v32  ;;  %v1530_v8 = vsel %vm1364_vm3, %v3635_v20, 0.0  ;;  %v3637_v21 = vmax.f32 %v3636_v41, 0.0 }
 0x23b   : > { %v1503_v53 = vadd.f32 %v1502_v45, %v1501_v14  ;;  %v1532_v32 = vsel %vm1364_vm3, %v3637_v21, 0.0  ;;  %v3639_v45 = vmax.f32 %v3638_v61, 0.0 }
 0x23d   : > { %v1505_v60 = vadd.f32 %v1504_v10, %v1503_v53  ;;  %v1534_v14 = vsel %vm1364_vm3, %v3639_v45, 0.0  ;;  %v3641_v10 = vmax.f32 %v3640_v37, 0.0 }
 0x23f   : > { %v1507_v59 = vadd.f32 %v1506_v38, %v1505_v60  ;;  %v1536_v53 = vsel %vm1364_vm3, %v3641_v10, 0.0  ;;  %v3643_v38 = vmax.f32 %v3642_v49, 0.0 }
 0x241   : > { %v1509_v43 = vadd.f32 %v1508_v12, %v1507_v59  ;;  %v1538_v60 = vsel %vm1364_vm3, %v3643_v38, 0.0  ;;  %v3645_v12 = vmax.f32 %v3644_v30, 0.0 }
 0x243   : > { %v1511_v1 = vadd.f32 %v1510_v42, %v1509_v43  ;;  %v1540_v59 = vsel %vm1364_vm3, %v3645_v12, 0.0  ;;  %v3647_v42 = vmax.f32 %v3646_v24, 0.0 }
 0x245   : > { %v1513_v29 = vadd.f32 %v1512_v11, %v1511_v1  ;;  %v1542_v43 = vsel %vm1364_vm3, %v3647_v42, 0.0  ;;  %v3649_v11 = vmax.f32 %v3648_v52, 0.0 }
 0x247   : > { %v1515_v23 = vadd.f32 %v1514_v35, %v1513_v29  ;;  %v1544_v1 = vsel %vm1364_vm3, %v3649_v11, 0.0  ;;  %v3651_v35 = vmax.f32 %v3650_v13, 0.0 }
 0x249   : > { %v1517_v62 = vadd.f32 %v1516_v22, %v1515_v23  ;;  %v1546_v29 = vsel %vm1364_vm3, %v3651_v35, 0.0  ;;  %v3653_v22 = vmax.f32 %v3652_v17, 0.0 }
 0x24b   : > { %v1519_v48 = vadd.f32 %v1518_v57, %v1517_v62  ;;  %v1548_v23 = vsel %vm1364_vm3, %v3653_v22, 0.0  ;;  %v3655_v57 = vmax.f32 %v3654_v46, 0.0 }
 0x24d   : > { %v1521_v19 = vadd.f32 %v1520_v16, %v1519_v48  ;;  %v1550_v62 = vsel %vm1364_vm3, %v3655_v57, 0.0  ;;  %v1552_v16 = vsel %vm1364_vm3, %v3656_v26, 0.0 }
 0x24f   : > { %v1523_v44 = vadd.f32 %v1522_v39, %v1521_v19  ;;  %v1554_v39 = vsel %vm1364_vm3, %v3658_v28, 0.0  ;;  %v3690_v28 = vmax.f32 %v3689_v3, 0.0  ;;  %v3721_v3 = vld [vmem:[#allocation77_spill] sm:$0xff] }
 0x251   : > { %v1525_v4 = vadd.f32 %v1524_v31, %v1523_v44  ;;  %v1556_v31 = vsel %vm1364_vm3, %v3660_v33, 0.0  ;;  %v3692_v33 = vmax.f32 %v3691_v25, 0.0 }
 0x253   : > { %v1527_v51 = vadd.f32 %v1526_v58, %v1525_v4  ;;  %v1558_v58 = vsel %vm1364_vm3, %v3662_v5, 0.0  ;;  %v3694_v5 = vmax.f32 %v3693_v55, 0.0 }
 0x255   : > { %v1529_v9 = vadd.f32 %v1528_v63, %v1527_v51  ;;  %v3665_v51 = vld [vmem:[#allocation9_spill] sm:$0xff] }
 0x256   : > { %v3666_v0 = vmax.f32 %v3665_v51, 0.0  ;;  %v3697_v51 = vld [vmem:[#allocation43_spill] sm:$0xff] }
 0x257   : > { %v1531_v34 = vadd.f32 %v1530_v8, %v1529_v9  ;;  %v3667_v9 = vld [vmem:[#allocation11_spill] sm:$0xff] }
 0x258   : > { %v1562_v20 = vsel %vm1364_vm3, %v3666_v0, 0.0  ;;  %v3668_v41 = vmax.f32 %v3667_v9, 0.0  ;;  %v3698_v0 = vmax.f32 %v3697_v51, 0.0  ;;  %v3699_v9 = vld [vmem:[#allocation46_spill] sm:$0xff] }
 0x259   : > { %v1533_v7 = vadd.f32 %v1532_v32, %v1531_v34  ;;  %v3669_v34 = vld [vmem:[#allocation13_spill] sm:$0xff] }
 0x25a   : > { %v1564_v21 = vsel %vm1364_vm3, %v3668_v41, 0.0  ;;  %v3670_v61 = vmax.f32 %v3669_v34, 0.0  ;;  %v3700_v41 = vmax.f32 %v3699_v9, 0.0  ;;  %v3701_v34 = vld [vmem:[#allocation49_spill] sm:$0xff] }
 0x25b   : > { %v1535_v50 = vadd.f32 %v1534_v14, %v1533_v7  ;;  %v3671_v7 = vld [vmem:[#allocation15_spill] sm:$0xff] }
 0x25c   : > { %v1566_v45 = vsel %vm1364_vm3, %v3670_v61, 0.0  ;;  %v3672_v37 = vmax.f32 %v3671_v7, 0.0  ;;  %v3702_v61 = vmax.f32 %v3701_v34, 0.0  ;;  %v3703_v7 = vld [vmem:[#allocation52_spill] sm:$0xff] }
 0x25d   : > { %v1537_v6 = vadd.f32 %v1536_v53, %v1535_v50  ;;  %v3673_v50 = vld [vmem:[#allocation17_spill] sm:$0xff] }
 0x25e   : > { %v1568_v10 = vsel %vm1364_vm3, %v3672_v37, 0.0  ;;  %v3674_v49 = vmax.f32 %v3673_v50, 0.0  ;;  %v3704_v37 = vmax.f32 %v3703_v7, 0.0  ;;  %v3705_v50 = vld [vmem:[#allocation55_spill] sm:$0xff] }
 0x25f   : > { %v1539_v2 = vadd.f32 %v1538_v60, %v1537_v6  ;;  %v3675_v6 = vld [vmem:[#allocation19_spill] sm:$0xff] }
 0x260   : > { %v1570_v38 = vsel %vm1364_vm3, %v3674_v49, 0.0  ;;  %v3676_v30 = vmax.f32 %v3675_v6, 0.0  ;;  %v3706_v49 = vmax.f32 %v3705_v50, 0.0  ;;  %v3707_v6 = vld [vmem:[#allocation58_spill] sm:$0xff] }
 0x261   : > { %v1541_v40 = vadd.f32 %v1540_v59, %v1539_v2  ;;  %v3677_v2 = vld [vmem:[#allocation21_spill] sm:$0xff] }
 0x262   : > { %v1572_v12 = vsel %vm1364_vm3, %v3676_v30, 0.0  ;;  %v3678_v24 = vmax.f32 %v3677_v2, 0.0  ;;  %v3708_v30 = vmax.f32 %v3707_v6, 0.0  ;;  %v3709_v2 = vld [vmem:[#allocation61_spill] sm:$0xff] }
 0x263   : > { %v1543_v27 = vadd.f32 %v1542_v43, %v1541_v40  ;;  %v3679_v40 = vld [vmem:[#allocation23_spill] sm:$0xff] }
 0x264   : > { %v1574_v42 = vsel %vm1364_vm3, %v3678_v24, 0.0  ;;  %v3680_v52 = vmax.f32 %v3679_v40, 0.0  ;;  %v3710_v24 = vmax.f32 %v3709_v2, 0.0  ;;  %v3711_v40 = vld [vmem:[#allocation64_spill] sm:$0xff] }
 0x265   : > { %v1545_v18 = vadd.f32 %v1544_v1, %v1543_v27  ;;  %v3681_v27 = vld [vmem:[#allocation25_spill] sm:$0xff] }
 0x266   : > { %v1576_v11 = vsel %vm1364_vm3, %v3680_v52, 0.0  ;;  %v3682_v13 = vmax.f32 %v3681_v27, 0.0  ;;  %v3712_v52 = vmax.f32 %v3711_v40, 0.0  ;;  %v3713_v27 = vld [vmem:[#allocation67_spill] sm:$0xff] }
 0x267   : > { %v1547_v36 = vadd.f32 %v1546_v29, %v1545_v18  ;;  %v3683_v18 = vld [vmem:[#allocation27_spill] sm:$0xff] }
 0x268   : > { %v1578_v35 = vsel %vm1364_vm3, %v3682_v13, 0.0  ;;  %v3684_v17 = vmax.f32 %v3683_v18, 0.0  ;;  %v3714_v13 = vmax.f32 %v3713_v27, 0.0  ;;  %v3715_v18 = vld [vmem:[#allocation70_spill] sm:$0xff] }
 0x269   : > { %v1549_v54 = vadd.f32 %v1548_v23, %v1547_v36  ;;  %v3685_v36 = vld [vmem:[#allocation29_spill] sm:$0xff] }
 0x26a   : > { %v1580_v22 = vsel %vm1364_vm3, %v3684_v17, 0.0  ;;  %v3686_v46 = vmax.f32 %v3685_v36, 0.0  ;;  %v3716_v17 = vmax.f32 %v3715_v18, 0.0  ;;  %v3717_v36 = vld [vmem:[#allocation73_spill] sm:$0xff] }
 0x26b   : > { %v1551_v48 = vadd.f32 %v1550_v62, %v1549_v54  ;;  %v3687_v54 = vld [vmem:[#allocation31_spill] sm:$0xff] }
 0x26c   : > { %v1582_v57 = vsel %vm1364_vm3, %v3686_v46, 0.0  ;;  %v3688_v26 = vmax.f32 %v3687_v54, 0.0  ;;  %v3718_v46 = vmax.f32 %v3717_v36, 0.0  ;;  %v3719_v54 = vld [vmem:[#allocation75_spill] sm:$0xff] }
 0x26d   : > { %v1553_v19 = vadd.f32 %v1552_v16, %v1551_v48 }
 0x26e   : > { %v1584_v16 = vsel %vm1364_vm3, %v3688_v26, 0.0  ;;  %v3720_v26 = vmax.f32 %v3719_v54, 0.0 }
 0x26f   : > { %v1555_v44 = vadd.f32 %v1554_v39, %v1553_v19  ;;  %v1586_v39 = vsel %vm1364_vm3, %v3690_v28, 0.0  ;;  %v3722_v28 = vmax.f32 %v3721_v3, 0.0 }
 0x271   : > { %v1557_v4 = vadd.f32 %v1556_v31, %v1555_v44  ;;  %v1588_v31 = vsel %vm1364_vm3, %v3692_v33, 0.0 }
 0x273   : > { %v1559_v63 = vadd.f32 %v1558_v58, %v1557_v4  ;;  %v1590_v58 = vsel %vm1364_vm3, %v3694_v5, 0.0 }
 0x275   : > { %v1561_v8 = vadd.f32 %v1560_v47, %v1559_v63  ;;  %v1592_v47 = vsel %vm1364_vm3, %v3696_v56, 0.0 }
 0x277   : > { %v1563_v32 = vadd.f32 %v1562_v20, %v1561_v8  ;;  %v1594_v20 = vsel %vm1364_vm3, %v3698_v0, 0.0 }
 0x279   : > { %v1565_v14 = vadd.f32 %v1564_v21, %v1563_v32  ;;  %v1596_v21 = vsel %vm1364_vm3, %v3700_v41, 0.0 }
 0x27b   : > { %v1567_v53 = vadd.f32 %v1566_v45, %v1565_v14  ;;  %v1598_v45 = vsel %vm1364_vm3, %v3702_v61, 0.0 }
 0x27d   : > { %v1569_v60 = vadd.f32 %v1568_v10, %v1567_v53  ;;  %v1600_v10 = vsel %vm1364_vm3, %v3704_v37, 0.0 }
 0x27f   : > { %v1571_v59 = vadd.f32 %v1570_v38, %v1569_v60  ;;  %v1602_v38 = vsel %vm1364_vm3, %v3706_v49, 0.0 }
 0x281   : > { %v1573_v43 = vadd.f32 %v1572_v12, %v1571_v59  ;;  %v1604_v12 = vsel %vm1364_vm3, %v3708_v30, 0.0 }
 0x283   : > { %v1575_v1 = vadd.f32 %v1574_v42, %v1573_v43  ;;  %v1606_v42 = vsel %vm1364_vm3, %v3710_v24, 0.0 }
 0x285   : > { %v1577_v29 = vadd.f32 %v1576_v11, %v1575_v1  ;;  %v1608_v11 = vsel %vm1364_vm3, %v3712_v52, 0.0 }
 0x287   : > { %v1579_v23 = vadd.f32 %v1578_v35, %v1577_v29  ;;  %v1610_v35 = vsel %vm1364_vm3, %v3714_v13, 0.0 }
 0x289   : > { %v1581_v62 = vadd.f32 %v1580_v22, %v1579_v23  ;;  %v1612_v22 = vsel %vm1364_vm3, %v3716_v17, 0.0 }
 0x28b   : > { %v1583_v48 = vadd.f32 %v1582_v57, %v1581_v62  ;;  %v1614_v57 = vsel %vm1364_vm3, %v3718_v46, 0.0 }
 0x28d   : > { %v1585_v19 = vadd.f32 %v1584_v16, %v1583_v48  ;;  %v1616_v16 = vsel %vm1364_vm3, %v3720_v26, 0.0 }
 0x28f   : > { %v1587_v44 = vadd.f32 %v1586_v39, %v1585_v19  ;;  %v1618_v39 = vsel %vm1364_vm3, %v3722_v28, 0.0 }
 0x291   : > { %v1589_v4 = vadd.f32 %v1588_v31, %v1587_v44 }
 0x293   : > { %v1591_v63 = vadd.f32 %v1590_v58, %v1589_v4  ;;  %v1363_v58 = vld [vmem:[%s2288_s26] sm:$0x1] }
 0x295   : > { %v1593_v8 = vadd.f32 %v1592_v47, %v1591_v63 }
 0x297   : > { %v1595_v32 = vadd.f32 %v1594_v20, %v1593_v8 }
 0x299   : > { %v1597_v14 = vadd.f32 %v1596_v21, %v1595_v32 }
 0x29b   : > { %v1599_v53 = vadd.f32 %v1598_v45, %v1597_v14 }
 0x29d   : > { %v1601_v60 = vadd.f32 %v1600_v10, %v1599_v53 }
 0x29f   : > { %v1603_v59 = vadd.f32 %v1602_v38, %v1601_v60 }
 0x2a1   : > { %v1605_v43 = vadd.f32 %v1604_v12, %v1603_v59 }
 0x2a3   : > { %v1607_v1 = vadd.f32 %v1606_v42, %v1605_v43 }
 0x2a5   : > { %v1609_v29 = vadd.f32 %v1608_v11, %v1607_v1 }
 0x2a7   : > { %v1611_v23 = vadd.f32 %v1610_v35, %v1609_v29 }
 0x2a9   : > { %v1613_v62 = vadd.f32 %v1612_v22, %v1611_v23 }
 0x2ab   : > { %v1615_v48 = vadd.f32 %v1614_v57, %v1613_v62 }
 0x2ad   : > { %v1617_v19 = vadd.f32 %v1616_v16, %v1615_v48 }
 0x2af   : > { %v1619_v25 = vadd.f32 %v1618_v39, %v1617_v19 }
 0x2b1   : > { %v1620_v33 = vrot.slane %v1619_v25, 4 }
 0x2b3   : > { %v1621_v31 = vadd.f32 %v1620_v33, %v1619_v25 }
 0x2b5   : > { %v1622_v44 = vrot.slane %v1621_v31, 2 }
 0x2b7   : > { %v1623_v55 = vadd.f32 %v1622_v44, %v1621_v31 }
 0x2b9   : > { %v1624_v5 = vrot.slane %v1623_v55, 1 }
 0x2bb   : > { %v1625_v4 = vadd.f32 %v1624_v5, %v1623_v55 }
 0x2bd   : > { %v1626_v15 = vadd.f32 %v1625_v4, %v1363_v58 }
 0x2bf   : > { %1628 = vst.msk [vmem:[%s2288_s26] sm:$0x1] %vm1627_vm4, %v1626_v15 }
 0x2c0 PF: > { %s13_s16 = sadd.s32 1, %s2220_s16   ;;  %s3723_s12 = smov %s2212_s14 }
 0x2c1   : > { %p10_p8 = scmp.ge.s32.totalorder %s13_s16, 6   ;;  %s3724_s13 = smov %s2216_s15 }
 0x2c2   : > { %s3725_s14 = smov %s3728_s17  ;;  %s3726_s15 = smov %s3732_s18 }
 0x2c3   :  { %12 = sbr.rel (!%p10_p8) target bundleno = 3 (0x3), region = 66 }

</bundles_post_ra>
